<compile_context>
chip_gen: v6e
topology: v6e:2x2x1
jax: 0.10.0
libtpu: 0.0.40
codegen_flags: <defaults>
</compile_context>

<pallas_src>
import numpy as np

import jax
import jax.numpy as jnp
from jax.experimental import pallas as pl
from jax.experimental.pallas import tpu as pltpu

SLOPE = 0.01  # torch.nn.LeakyReLU default negative_slope

# bf16 operands would give ~2x MXU throughput on v6e/v7x but exceed the 1e-3
# correctness tolerance against the f32 reference at this network depth.
MATMUL_DTYPE = jnp.float32


def _leaky(x):
    return jnp.where(x >= 0, x, SLOPE * x)


# (name, kernel_size, stride, padding, fused-pre-LeakyReLU)
_CONV_PLAN = (
    ("c0",    7, 2, 3, False),   # Conv1d(3, H, 7, stride=2, pad=3)
    ("r1_sc", 1, 1, 0, False),   # ResBlock1 shortcut 1x1
    ("r1_a", 11, 1, 5, True),    # LeakyReLU -> Conv1d(H, H, 11, pad=5)
    ("r1_b", 11, 1, 5, True),    # LeakyReLU -> Conv1d(H, H, 11, pad=5)
    ("c2",    7, 2, 3, True),    # LeakyReLU -> Conv1d(H, H, 7, stride=2, pad=3)
    ("r2_sc", 1, 1, 0, False),   # ResBlock2 shortcut 1x1
    ("r2_a",  7, 1, 3, True),    # LeakyReLU -> Conv1d(H, H, 7, pad=3)
    ("r2_b",  7, 1, 3, True),    # LeakyReLU -> Conv1d(H, H, 7, pad=3)
    ("c4",    7, 2, 3, True),    # LeakyReLU -> Conv1d(H, H, 7, stride=2, pad=3)
)


def _build_plan(L):
    plan = []
    lin = L
    for name, K, stride, pad, pre_act in _CONV_PLAN:
        lout = (lin + 2 * pad - K) // stride + 1
        plan.append(dict(name=name, K=K, stride=stride, pad=pad, pre_act=pre_act,
                         lin=lin, lout=lout,
                         has_sel=not (K == 1 and stride == 1 and pad == 0)))
        lin = lout
    return plan


def _tap_selectors(nb, lin, lout, K, stride, pad):
    """sel[k, n*lin + s, n*lout + u] = 1  iff  s == stride*u + k - pad and 0 <= s < lin.

    Right-multiplying a lane-packed activation (C, nb*lin) by sel[k] gathers
    conv tap k for every output position of every sample; out-of-range taps
    select nothing, which implements zero padding in-kernel.
    """
    sel = np.zeros((K, nb * lin, nb * lout), np.float32)
    for k in range(K):
        for u in range(lout):
            s = stride * u + k - pad
            if 0 <= s < lin:
                for n in range(nb):
                    sel[k, n * lin + s, n * lout + u] = 1.0
    return sel


def _group_sum_mask(nb, lseg):
    """(nb*lseg, nb) 0/1 mask whose matmul sums each sample's lseg columns."""
    m = np.zeros((nb * lseg, nb), np.float32)
    for n in range(nb):
        m[n * lseg:(n + 1) * lseg, n] = 1.0
    return m


# ------------------------------ Fused kernel -------------------------------- #

def _make_fused_kernel(plan):
    """Builds the single fused kernel. Ref order (all whole-array VMEM blocks):
       [x] + per conv layer [w(K,Cout,Cin), b(Cout,1), (sel(K,NLin,NLout))]
           + [wl_tiled(H,N*L8), bl(1,1), group_mask(N*L8,N)] + [out(1,N)].
    """

    def kernel(*refs):
        o_ref = refs[-1]
        pos = [1]                                   # refs[0] is the packed input

        def take():
            r = refs[pos[0]]
            pos[0] += 1
            return r

        def conv(xin, cfg):
            w_ref = take()                          # (K, Cout, Cin)
            b_ref = take()                          # (Cout, 1)
            sel_ref = take() if cfg["has_sel"] else None
            xa = _leaky(xin) if cfg["pre_act"] else xin
            xa = xa.astype(MATMUL_DTYPE)
            if sel_ref is None:                     # 1x1 conv, stride 1, no pad
                acc = jnp.dot(w_ref[0].astype(MATMUL_DTYPE), xa,
                              preferred_element_type=jnp.float32)
            else:
                acc = None
                for k in range(cfg["K"]):
                    # padding / stride / per-sample blocking all live in sel[k]
                    xg = jnp.dot(xa, sel_ref[k].astype(MATMUL_DTYPE),
                                 preferred_element_type=jnp.float32)
                    part = jnp.dot(w_ref[k].astype(MATMUL_DTYPE),
                                   xg.astype(MATMUL_DTYPE),
                                   preferred_element_type=jnp.float32)
                    acc = part if acc is None else acc + part
            return acc + b_ref[...]

        x = refs[0][...]                            # (3, N*L)
        h = conv(x, plan[0])                        # c0            (H, N*L/2)
        s = conv(h, plan[1])                        # r1 shortcut
        a = conv(h, plan[2])                        # r1 conv a (pre-LeakyReLU fused)
        a = conv(a, plan[3])                        # r1 conv b
        h = _leaky(s + a)                           # ResBlock1 activation
        h = conv(h, plan[4])                        # c2            (H, N*L/4)
        s = conv(h, plan[5])                        # r2 shortcut
        a = conv(h, plan[6])                        # r2 conv a
        a = conv(a, plan[7])                        # r2 conv b
        h = _leaky(s + a)                           # ResBlock2 activation
        h = conv(h, plan[8])                        # c4            (H, N*L/8)

        # fused head: LeakyReLU -> per-sample flatten -> spectral-norm Linear
        wl_ref = take()                             # (H, N*L/8) pre-tiled weight
        bl_ref = take()                             # (1, 1)
        gm_ref = take()                             # (N*L/8, N)
        c = _leaky(h) * wl_ref[...]
        srow = jnp.sum(c, axis=0, keepdims=True)    # (1, N*L/8) — sum over channels
        o_ref[...] = (jnp.dot(srow, gm_ref[...], preferred_element_type=jnp.float32)
                      + bl_ref[...])                # (1, N), lane-major

    return kernel


# ------------------------------- Forward ------------------------------------ #

@jax.jit
def discriminator_forward(params, X):
    """X: (N, 1, 3, L) as in the PyTorch module; returns (N, 1)."""
    x = jnp.squeeze(X, axis=1)                              # (N, 3, L)
    N, Cin0, L = x.shape
    assert L % 8 == 0
    H = params["c0"][0].shape[0]

    # Batch packed into the lane axis: activations are (C, N*L) slabs.
    x0 = jnp.transpose(x, (1, 0, 2)).reshape(Cin0, N * L)

    plan = _build_plan(L)
    l8 = plan[-1]["lout"]                                   # == L // 8

    args = [x0]
    flops = 0
    for cfg in plan:
        w, b = params[cfg["name"]]
        Cout, Ci, K = w.shape
        args.append(jnp.transpose(w, (2, 0, 1)))            # (K, Cout, Cin)
        args.append(b.reshape(Cout, 1))
        if cfg["has_sel"]:
            args.append(jnp.asarray(_tap_selectors(
                N, cfg["lin"], cfg["lout"], K, cfg["stride"], cfg["pad"])))
            flops += 2 * K * Ci * (N * cfg["lin"]) * (N * cfg["lout"])
        flops += 2 * K * Cout * Ci * N * cfg["lout"]

    wl, bl = params["lin"]                                  # (1, F), (1,)
    wl2 = wl.reshape(H, l8)                                 # F index = h*l8 + t
    args.append(jnp.tile(wl2, (1, N)))                      # (H, N*l8), per-sample tiled
    args.append(bl.reshape(1, 1))
    args.append(jnp.asarray(_group_sum_mask(N, l8)))        # (N*l8, N)
    flops += 2 * H * N * l8

    bytes_accessed = sum(int(np.prod(a.shape)) * a.dtype.itemsize for a in args) + N * 4

    out_1n = pl.pallas_call(
        _make_fused_kernel(plan),
        out_shape=jax.ShapeDtypeStruct((1, N), jnp.float32),
        in_specs=[pl.BlockSpec(memory_space=pltpu.MemorySpace.VMEM)] * len(args),
        out_specs=pl.BlockSpec(memory_space=pltpu.MemorySpace.VMEM),
        compiler_params=pltpu.CompilerParams(vmem_limit_bytes=32 * 1024 * 1024),
        cost_estimate=pl.CostEstimate(flops=int(flops), transcendentals=0,
                                      bytes_accessed=int(bytes_accessed)),
    )(*args)
    return out_1n.reshape(N, 1)


# --------------------------- Parameter setup -------------------------------- #

def spectral_normalize(w, n_iter=50):
    """W / sigma_max(W.reshape(out, -1)) — torch spectral_norm semantics."""
    mat = w.reshape(w.shape[0], -1).astype(jnp.float32)
    v = jnp.ones((mat.shape[1],), jnp.float32) / jnp.sqrt(float(mat.shape[1]))
    u = jnp.ones((mat.shape[0],), jnp.float32) / jnp.sqrt(float(mat.shape[0]))
    for _ in range(n_iter):
        u = mat @ v
        u = u / (jnp.linalg.norm(u) + 1e-12)
        v = mat.T @ u
        v = v / (jnp.linalg.norm(v) + 1e-12)
    sigma = u @ (mat @ v)
    return w / sigma
# TODO(synk): torch spectral_norm updates its power-iteration vector `u` as a
# stateful buffer once per training forward; here sigma is computed to
# convergence at setup (inference semantics), not re-estimated per call.


def init_discriminator_params(key, array_length, hidden_size):
    assert array_length % 8 == 0
    H = hidden_size
    F = H * array_length // 8

    def conv_p(idx, cout, cin, ksz):
        kw, kb = jax.random.split(jax.random.fold_in(key, idx))
        w = 0.2 * jax.random.normal(kw, (cout, cin, ksz), jnp.float32)
        b = 0.1 * jax.random.normal(kb, (cout,), jnp.float32)
        return spectral_normalize(w), b

    params = {
        "c0":    conv_p(0, H, 3, 7),    # Conv1d(3, H, 7, stride=2, pad=3)
        "r1_sc": conv_p(1, H, H, 1),    # ResBlock1 shortcut 1x1
        "r1_a":  conv_p(2, H, H, 11),   # ResBlock1 conv, k=11, pad=5
        "r1_b":  conv_p(3, H, H, 11),
        "c2":    conv_p(4, H, H, 7),    # Conv1d stride=2, pad=3
        "r2_sc": conv_p(5, H, H, 1),    # ResBlock2 shortcut 1x1
        "r2_a":  conv_p(6, H, H, 7),    # ResBlock2 conv, k=7, pad=3
        "r2_b":  conv_p(7, H, H, 7),
        "c4":    conv_p(8, H, H, 7),    # Conv1d stride=2, pad=3
    }
    kw, kb = jax.random.split(jax.random.fold_in(key, 9))
    wl = 0.2 * jax.random.normal(kw, (1, F), jnp.float32)   # torch Linear: (out, in)
    bl = 0.1 * jax.random.normal(kb, (1,), jnp.float32)
    params["lin"] = (spectral_normalize(wl), bl)
    return params


# ------------------------- Pure-JAX reference ------------------------------- #

def _ref_conv1d(x, w, b, stride, pad):
    y = jax.lax.conv_general_dilated(
        x, w, window_strides=(stride,), padding=[(pad, pad)],
        dimension_numbers=("NCH", "OIH", "NCH"))
    return y + b[None, :, None]


def ref_forward(params, X):
    x = jnp.squeeze(X, axis=1)
    y = _ref_conv1d(x, *params["c0"], 2, 3)
    s = _ref_conv1d(y, *params["r1_sc"], 1, 0)
    n = _ref_conv1d(_leaky(_ref_conv1d(_leaky(y), *params["r1_a"], 1, 5)),
                    *params["r1_b"], 1, 5)
    y = _leaky(s + n)
    y = _ref_conv1d(_leaky(y), *params["c2"], 2, 3)
    s = _ref_conv1d(y, *params["r2_sc"], 1, 0)
    n = _ref_conv1d(_leaky(_ref_conv1d(_leaky(y), *params["r2_a"], 1, 3)),
                    *params["r2_b"], 1, 3)
    y = _leaky(s + n)
    y = _ref_conv1d(_leaky(y), *params["c4"], 2, 3)
    flat = y.reshape(y.shape[0], -1)
    wl, bl = params["lin"]
    return _leaky(flat) @ wl.T + bl[None, :]


# --------------------------------- Main -------------------------------------- #

if __name__ == "__main__":
    array_length, hidden_size, batch = 16, 32, 2
    key = jax.random.PRNGKey(0)
    pkey, xkey = jax.random.split(key)

    params = init_discriminator_params(pkey, array_length, hidden_size)
    X = jax.random.normal(xkey, (batch, 1, 3, array_length), jnp.float32)

    out = jax.block_until_ready(discriminator_forward(params, X))
    ref = jax.block_until_ready(ref_forward(params, X))

    assert out.shape == (batch, 1)
    np.testing.assert_allclose(np.asarray(out), np.asarray(ref), rtol=1e-3, atol=1e-3)
    print("KERNEL_OK")
</pallas_src>

<mosaic_0001>
module attributes {stable_mosaic.version = 11 : i64} {
  func.func @kernel(%arg0: memref<3x32xf32, #tpu.memory_space<vmem>>, %arg1: memref<7x32x3xf32, #tpu.memory_space<vmem>>, %arg2: memref<32x1xf32, #tpu.memory_space<vmem>>, %arg3: memref<7x32x16xf32, #tpu.memory_space<vmem>>, %arg4: memref<1x32x32xf32, #tpu.memory_space<vmem>>, %arg5: memref<32x1xf32, #tpu.memory_space<vmem>>, %arg6: memref<11x32x32xf32, #tpu.memory_space<vmem>>, %arg7: memref<32x1xf32, #tpu.memory_space<vmem>>, %arg8: memref<11x16x16xf32, #tpu.memory_space<vmem>>, %arg9: memref<11x32x32xf32, #tpu.memory_space<vmem>>, %arg10: memref<32x1xf32, #tpu.memory_space<vmem>>, %arg11: memref<11x16x16xf32, #tpu.memory_space<vmem>>, %arg12: memref<7x32x32xf32, #tpu.memory_space<vmem>>, %arg13: memref<32x1xf32, #tpu.memory_space<vmem>>, %arg14: memref<7x16x8xf32, #tpu.memory_space<vmem>>, %arg15: memref<1x32x32xf32, #tpu.memory_space<vmem>>, %arg16: memref<32x1xf32, #tpu.memory_space<vmem>>, %arg17: memref<7x32x32xf32, #tpu.memory_space<vmem>>, %arg18: memref<32x1xf32, #tpu.memory_space<vmem>>, %arg19: memref<7x8x8xf32, #tpu.memory_space<vmem>>, %arg20: memref<7x32x32xf32, #tpu.memory_space<vmem>>, %arg21: memref<32x1xf32, #tpu.memory_space<vmem>>, %arg22: memref<7x8x8xf32, #tpu.memory_space<vmem>>, %arg23: memref<7x32x32xf32, #tpu.memory_space<vmem>>, %arg24: memref<32x1xf32, #tpu.memory_space<vmem>>, %arg25: memref<7x8x4xf32, #tpu.memory_space<vmem>>, %arg26: memref<32x4xf32, #tpu.memory_space<vmem>>, %arg27: memref<1x1xf32, #tpu.memory_space<vmem>>, %arg28: memref<4x2xf32, #tpu.memory_space<vmem>>, %arg29: memref<1x2xf32, #tpu.memory_space<vmem>>) attributes {dimension_semantics = [], scalar_prefetch = 0 : i64, scratch_operands = 0 : i64, tpu.core_type = #tpu.core_type<tc>} {
    %c0 = arith.constant 0 : index
    %c0_0 = arith.constant 0 : index
    %0 = vector.load %arg0[%c0, %c0_0] : memref<3x32xf32, #tpu.memory_space<vmem>>, vector<3x32xf32>
    %c0_1 = arith.constant 0 : index
    %c0_2 = arith.constant 0 : index
    %c0_3 = arith.constant 0 : index
    %1 = vector.load %arg3[%c0_1, %c0_2, %c0_3] : memref<7x32x16xf32, #tpu.memory_space<vmem>>, vector<1x32x16xf32>
    %2 = vector.shape_cast %1 : vector<1x32x16xf32> to vector<32x16xf32>
    %cst = arith.constant dense<0.000000e+00> : vector<3x16xf32>
    %3 = tpu.matmul %0, %2, %cst {dimension_numbers = #tpu.dot_dimension_numbers<[1], [0], [0], [1], [0, 0, 1, 1], [], []>} : vector<3x32xf32>, vector<32x16xf32>, vector<3x16xf32> -> vector<3x16xf32>
    %c0_4 = arith.constant 0 : index
    %c0_5 = arith.constant 0 : index
    %c0_6 = arith.constant 0 : index
    %4 = vector.load %arg1[%c0_4, %c0_5, %c0_6] : memref<7x32x3xf32, #tpu.memory_space<vmem>>, vector<1x32x3xf32>
    %5 = vector.shape_cast %4 : vector<1x32x3xf32> to vector<32x3xf32>
    %cst_7 = arith.constant dense<0.000000e+00> : vector<32x16xf32>
    %6 = tpu.matmul %5, %3, %cst_7 {dimension_numbers = #tpu.dot_dimension_numbers<[1], [0], [0], [1], [0, 0, 1, 1], [], []>} : vector<32x3xf32>, vector<3x16xf32>, vector<32x16xf32> -> vector<32x16xf32>
    %c1 = arith.constant 1 : index
    %c0_8 = arith.constant 0 : index
    %c0_9 = arith.constant 0 : index
    %7 = vector.load %arg3[%c1, %c0_8, %c0_9] : memref<7x32x16xf32, #tpu.memory_space<vmem>>, vector<1x32x16xf32>
    %8 = vector.shape_cast %7 : vector<1x32x16xf32> to vector<32x16xf32>
    %cst_10 = arith.constant dense<0.000000e+00> : vector<3x16xf32>
    %9 = tpu.matmul %0, %8, %cst_10 {dimension_numbers = #tpu.dot_dimension_numbers<[1], [0], [0], [1], [0, 0, 1, 1], [], []>} : vector<3x32xf32>, vector<32x16xf32>, vector<3x16xf32> -> vector<3x16xf32>
    %c1_11 = arith.constant 1 : index
    %c0_12 = arith.constant 0 : index
    %c0_13 = arith.constant 0 : index
    %10 = vector.load %arg1[%c1_11, %c0_12, %c0_13] : memref<7x32x3xf32, #tpu.memory_space<vmem>>, vector<1x32x3xf32>
    %11 = vector.shape_cast %10 : vector<1x32x3xf32> to vector<32x3xf32>
    %cst_14 = arith.constant dense<0.000000e+00> : vector<32x16xf32>
    %12 = tpu.matmul %11, %9, %cst_14 {dimension_numbers = #tpu.dot_dimension_numbers<[1], [0], [0], [1], [0, 0, 1, 1], [], []>} : vector<32x3xf32>, vector<3x16xf32>, vector<32x16xf32> -> vector<32x16xf32>
    %13 = arith.addf %6, %12 : vector<32x16xf32>
    %c2 = arith.constant 2 : index
    %c0_15 = arith.constant 0 : index
    %c0_16 = arith.constant 0 : index
    %14 = vector.load %arg3[%c2, %c0_15, %c0_16] : memref<7x32x16xf32, #tpu.memory_space<vmem>>, vector<1x32x16xf32>
    %15 = vector.shape_cast %14 : vector<1x32x16xf32> to vector<32x16xf32>
    %cst_17 = arith.constant dense<0.000000e+00> : vector<3x16xf32>
    %16 = tpu.matmul %0, %15, %cst_17 {dimension_numbers = #tpu.dot_dimension_numbers<[1], [0], [0], [1], [0, 0, 1, 1], [], []>} : vector<3x32xf32>, vector<32x16xf32>, vector<3x16xf32> -> vector<3x16xf32>
    %c2_18 = arith.constant 2 : index
    %c0_19 = arith.constant 0 : index
    %c0_20 = arith.constant 0 : index
    %17 = vector.load %arg1[%c2_18, %c0_19, %c0_20] : memref<7x32x3xf32, #tpu.memory_space<vmem>>, vector<1x32x3xf32>
    %18 = vector.shape_cast %17 : vector<1x32x3xf32> to vector<32x3xf32>
    %cst_21 = arith.constant dense<0.000000e+00> : vector<32x16xf32>
    %19 = tpu.matmul %18, %16, %cst_21 {dimension_numbers = #tpu.dot_dimension_numbers<[1], [0], [0], [1], [0, 0, 1, 1], [], []>} : vector<32x3xf32>, vector<3x16xf32>, vector<32x16xf32> -> vector<32x16xf32>
    %20 = arith.addf %13, %19 : vector<32x16xf32>
    %c3 = arith.constant 3 : index
    %c0_22 = arith.constant 0 : index
    %c0_23 = arith.constant 0 : index
    %21 = vector.load %arg3[%c3, %c0_22, %c0_23] : memref<7x32x16xf32, #tpu.memory_space<vmem>>, vector<1x32x16xf32>
    %22 = vector.shape_cast %21 : vector<1x32x16xf32> to vector<32x16xf32>
    %cst_24 = arith.constant dense<0.000000e+00> : vector<3x16xf32>
    %23 = tpu.matmul %0, %22, %cst_24 {dimension_numbers = #tpu.dot_dimension_numbers<[1], [0], [0], [1], [0, 0, 1, 1], [], []>} : vector<3x32xf32>, vector<32x16xf32>, vector<3x16xf32> -> vector<3x16xf32>
    %c3_25 = arith.constant 3 : index
    %c0_26 = arith.constant 0 : index
    %c0_27 = arith.constant 0 : index
    %24 = vector.load %arg1[%c3_25, %c0_26, %c0_27] : memref<7x32x3xf32, #tpu.memory_space<vmem>>, vector<1x32x3xf32>
    %25 = vector.shape_cast %24 : vector<1x32x3xf32> to vector<32x3xf32>
    %cst_28 = arith.constant dense<0.000000e+00> : vector<32x16xf32>
    %26 = tpu.matmul %25, %23, %cst_28 {dimension_numbers = #tpu.dot_dimension_numbers<[1], [0], [0], [1], [0, 0, 1, 1], [], []>} : vector<32x3xf32>, vector<3x16xf32>, vector<32x16xf32> -> vector<32x16xf32>
    %27 = arith.addf %20, %26 : vector<32x16xf32>
    %c4 = arith.constant 4 : index
    %c0_29 = arith.constant 0 : index
    %c0_30 = arith.constant 0 : index
    %28 = vector.load %arg3[%c4, %c0_29, %c0_30] : memref<7x32x16xf32, #tpu.memory_space<vmem>>, vector<1x32x16xf32>
    %29 = vector.shape_cast %28 : vector<1x32x16xf32> to vector<32x16xf32>
    %cst_31 = arith.constant dense<0.000000e+00> : vector<3x16xf32>
    %30 = tpu.matmul %0, %29, %cst_31 {dimension_numbers = #tpu.dot_dimension_numbers<[1], [0], [0], [1], [0, 0, 1, 1], [], []>} : vector<3x32xf32>, vector<32x16xf32>, vector<3x16xf32> -> vector<3x16xf32>
    %c4_32 = arith.constant 4 : index
    %c0_33 = arith.constant 0 : index
    %c0_34 = arith.constant 0 : index
    %31 = vector.load %arg1[%c4_32, %c0_33, %c0_34] : memref<7x32x3xf32, #tpu.memory_space<vmem>>, vector<1x32x3xf32>
    %32 = vector.shape_cast %31 : vector<1x32x3xf32> to vector<32x3xf32>
    %cst_35 = arith.constant dense<0.000000e+00> : vector<32x16xf32>
    %33 = tpu.matmul %32, %30, %cst_35 {dimension_numbers = #tpu.dot_dimension_numbers<[1], [0], [0], [1], [0, 0, 1, 1], [], []>} : vector<32x3xf32>, vector<3x16xf32>, vector<32x16xf32> -> vector<32x16xf32>
    %34 = arith.addf %27, %33 : vector<32x16xf32>
    %c5 = arith.constant 5 : index
    %c0_36 = arith.constant 0 : index
    %c0_37 = arith.constant 0 : index
    %35 = vector.load %arg3[%c5, %c0_36, %c0_37] : memref<7x32x16xf32, #tpu.memory_space<vmem>>, vector<1x32x16xf32>
    %36 = vector.shape_cast %35 : vector<1x32x16xf32> to vector<32x16xf32>
    %cst_38 = arith.constant dense<0.000000e+00> : vector<3x16xf32>
    %37 = tpu.matmul %0, %36, %cst_38 {dimension_numbers = #tpu.dot_dimension_numbers<[1], [0], [0], [1], [0, 0, 1, 1], [], []>} : vector<3x32xf32>, vector<32x16xf32>, vector<3x16xf32> -> vector<3x16xf32>
    %c5_39 = arith.constant 5 : index
    %c0_40 = arith.constant 0 : index
    %c0_41 = arith.constant 0 : index
    %38 = vector.load %arg1[%c5_39, %c0_40, %c0_41] : memref<7x32x3xf32, #tpu.memory_space<vmem>>, vector<1x32x3xf32>
    %39 = vector.shape_cast %38 : vector<1x32x3xf32> to vector<32x3xf32>
    %cst_42 = arith.constant dense<0.000000e+00> : vector<32x16xf32>
    %40 = tpu.matmul %39, %37, %cst_42 {dimension_numbers = #tpu.dot_dimension_numbers<[1], [0], [0], [1], [0, 0, 1, 1], [], []>} : vector<32x3xf32>, vector<3x16xf32>, vector<32x16xf32> -> vector<32x16xf32>
    %41 = arith.addf %34, %40 : vector<32x16xf32>
    %c6 = arith.constant 6 : index
    %c0_43 = arith.constant 0 : index
    %c0_44 = arith.constant 0 : index
    %42 = vector.load %arg3[%c6, %c0_43, %c0_44] : memref<7x32x16xf32, #tpu.memory_space<vmem>>, vector<1x32x16xf32>
    %43 = vector.shape_cast %42 : vector<1x32x16xf32> to vector<32x16xf32>
    %cst_45 = arith.constant dense<0.000000e+00> : vector<3x16xf32>
    %44 = tpu.matmul %0, %43, %cst_45 {dimension_numbers = #tpu.dot_dimension_numbers<[1], [0], [0], [1], [0, 0, 1, 1], [], []>} : vector<3x32xf32>, vector<32x16xf32>, vector<3x16xf32> -> vector<3x16xf32>
    %c6_46 = arith.constant 6 : index
    %c0_47 = arith.constant 0 : index
    %c0_48 = arith.constant 0 : index
    %45 = vector.load %arg1[%c6_46, %c0_47, %c0_48] : memref<7x32x3xf32, #tpu.memory_space<vmem>>, vector<1x32x3xf32>
    %46 = vector.shape_cast %45 : vector<1x32x3xf32> to vector<32x3xf32>
    %cst_49 = arith.constant dense<0.000000e+00> : vector<32x16xf32>
    %47 = tpu.matmul %46, %44, %cst_49 {dimension_numbers = #tpu.dot_dimension_numbers<[1], [0], [0], [1], [0, 0, 1, 1], [], []>} : vector<32x3xf32>, vector<3x16xf32>, vector<32x16xf32> -> vector<32x16xf32>
    %48 = arith.addf %41, %47 : vector<32x16xf32>
    %c0_50 = arith.constant 0 : index
    %c0_51 = arith.constant 0 : index
    %49 = vector.load %arg2[%c0_50, %c0_51] : memref<32x1xf32, #tpu.memory_space<vmem>>, vector<32x1xf32>
    %50 = vector.broadcast %49 : vector<32x1xf32> to vector<32x16xf32>
    %51 = arith.addf %48, %50 : vector<32x16xf32>
    %c0_52 = arith.constant 0 : index
    %c0_53 = arith.constant 0 : index
    %c0_54 = arith.constant 0 : index
    %52 = vector.load %arg4[%c0_52, %c0_53, %c0_54] : memref<1x32x32xf32, #tpu.memory_space<vmem>>, vector<1x32x32xf32>
    %53 = vector.shape_cast %52 : vector<1x32x32xf32> to vector<32x32xf32>
    %cst_55 = arith.constant dense<0.000000e+00> : vector<32x16xf32>
    %54 = tpu.matmul %53, %51, %cst_55 {dimension_numbers = #tpu.dot_dimension_numbers<[1], [0], [0], [1], [0, 0, 1, 1], [], []>} : vector<32x32xf32>, vector<32x16xf32>, vector<32x16xf32> -> vector<32x16xf32>
    %c0_56 = arith.constant 0 : index
    %c0_57 = arith.constant 0 : index
    %55 = vector.load %arg5[%c0_56, %c0_57] : memref<32x1xf32, #tpu.memory_space<vmem>>, vector<32x1xf32>
    %56 = vector.broadcast %55 : vector<32x1xf32> to vector<32x16xf32>
    %57 = arith.addf %54, %56 : vector<32x16xf32>
    %cst_58 = arith.constant 0.000000e+00 : f32
    %58 = vector.broadcast %cst_58 : f32 to vector<32x16xf32>
    %59 = arith.cmpf oge, %51, %58 : vector<32x16xf32>
    %cst_59 = arith.constant 0.00999999977 : f32
    %60 = vector.broadcast %cst_59 : f32 to vector<32x16xf32>
    %61 = arith.mulf %60, %51 : vector<32x16xf32>
    %62 = arith.select %59, %51, %61 : vector<32x16xi1>, vector<32x16xf32>
    %c0_60 = arith.constant 0 : index
    %c0_61 = arith.constant 0 : index
    %c0_62 = arith.constant 0 : index
    %63 = vector.load %arg8[%c0_60, %c0_61, %c0_62] : memref<11x16x16xf32, #tpu.memory_space<vmem>>, vector<1x16x16xf32>
    %64 = vector.shape_cast %63 : vector<1x16x16xf32> to vector<16x16xf32>
    %cst_63 = arith.constant dense<0.000000e+00> : vector<32x16xf32>
    %65 = tpu.matmul %62, %64, %cst_63 {dimension_numbers = #tpu.dot_dimension_numbers<[1], [0], [0], [1], [0, 0, 1, 1], [], []>} : vector<32x16xf32>, vector<16x16xf32>, vector<32x16xf32> -> vector<32x16xf32>
    %c0_64 = arith.constant 0 : index
    %c0_65 = arith.constant 0 : index
    %c0_66 = arith.constant 0 : index
    %66 = vector.load %arg6[%c0_64, %c0_65, %c0_66] : memref<11x32x32xf32, #tpu.memory_space<vmem>>, vector<1x32x32xf32>
    %67 = vector.shape_cast %66 : vector<1x32x32xf32> to vector<32x32xf32>
    %cst_67 = arith.constant dense<0.000000e+00> : vector<32x16xf32>
    %68 = tpu.matmul %67, %65, %cst_67 {dimension_numbers = #tpu.dot_dimension_numbers<[1], [0], [0], [1], [0, 0, 1, 1], [], []>} : vector<32x32xf32>, vector<32x16xf32>, vector<32x16xf32> -> vector<32x16xf32>
    %c1_68 = arith.constant 1 : index
    %c0_69 = arith.constant 0 : index
    %c0_70 = arith.constant 0 : index
    %69 = vector.load %arg8[%c1_68, %c0_69, %c0_70] : memref<11x16x16xf32, #tpu.memory_space<vmem>>, vector<1x16x16xf32>
    %70 = vector.shape_cast %69 : vector<1x16x16xf32> to vector<16x16xf32>
    %cst_71 = arith.constant dense<0.000000e+00> : vector<32x16xf32>
    %71 = tpu.matmul %62, %70, %cst_71 {dimension_numbers = #tpu.dot_dimension_numbers<[1], [0], [0], [1], [0, 0, 1, 1], [], []>} : vector<32x16xf32>, vector<16x16xf32>, vector<32x16xf32> -> vector<32x16xf32>
    %c1_72 = arith.constant 1 : index
    %c0_73 = arith.constant 0 : index
    %c0_74 = arith.constant 0 : index
    %72 = vector.load %arg6[%c1_72, %c0_73, %c0_74] : memref<11x32x32xf32, #tpu.memory_space<vmem>>, vector<1x32x32xf32>
    %73 = vector.shape_cast %72 : vector<1x32x32xf32> to vector<32x32xf32>
    %cst_75 = arith.constant dense<0.000000e+00> : vector<32x16xf32>
    %74 = tpu.matmul %73, %71, %cst_75 {dimension_numbers = #tpu.dot_dimension_numbers<[1], [0], [0], [1], [0, 0, 1, 1], [], []>} : vector<32x32xf32>, vector<32x16xf32>, vector<32x16xf32> -> vector<32x16xf32>
    %75 = arith.addf %68, %74 : vector<32x16xf32>
    %c2_76 = arith.constant 2 : index
    %c0_77 = arith.constant 0 : index
    %c0_78 = arith.constant 0 : index
    %76 = vector.load %arg8[%c2_76, %c0_77, %c0_78] : memref<11x16x16xf32, #tpu.memory_space<vmem>>, vector<1x16x16xf32>
    %77 = vector.shape_cast %76 : vector<1x16x16xf32> to vector<16x16xf32>
    %cst_79 = arith.constant dense<0.000000e+00> : vector<32x16xf32>
    %78 = tpu.matmul %62, %77, %cst_79 {dimension_numbers = #tpu.dot_dimension_numbers<[1], [0], [0], [1], [0, 0, 1, 1], [], []>} : vector<32x16xf32>, vector<16x16xf32>, vector<32x16xf32> -> vector<32x16xf32>
    %c2_80 = arith.constant 2 : index
    %c0_81 = arith.constant 0 : index
    %c0_82 = arith.constant 0 : index
    %79 = vector.load %arg6[%c2_80, %c0_81, %c0_82] : memref<11x32x32xf32, #tpu.memory_space<vmem>>, vector<1x32x32xf32>
    %80 = vector.shape_cast %79 : vector<1x32x32xf32> to vector<32x32xf32>
    %cst_83 = arith.constant dense<0.000000e+00> : vector<32x16xf32>
    %81 = tpu.matmul %80, %78, %cst_83 {dimension_numbers = #tpu.dot_dimension_numbers<[1], [0], [0], [1], [0, 0, 1, 1], [], []>} : vector<32x32xf32>, vector<32x16xf32>, vector<32x16xf32> -> vector<32x16xf32>
    %82 = arith.addf %75, %81 : vector<32x16xf32>
    %c3_84 = arith.constant 3 : index
    %c0_85 = arith.constant 0 : index
    %c0_86 = arith.constant 0 : index
    %83 = vector.load %arg8[%c3_84, %c0_85, %c0_86] : memref<11x16x16xf32, #tpu.memory_space<vmem>>, vector<1x16x16xf32>
    %84 = vector.shape_cast %83 : vector<1x16x16xf32> to vector<16x16xf32>
    %cst_87 = arith.constant dense<0.000000e+00> : vector<32x16xf32>
    %85 = tpu.matmul %62, %84, %cst_87 {dimension_numbers = #tpu.dot_dimension_numbers<[1], [0], [0], [1], [0, 0, 1, 1], [], []>} : vector<32x16xf32>, vector<16x16xf32>, vector<32x16xf32> -> vector<32x16xf32>
    %c3_88 = arith.constant 3 : index
    %c0_89 = arith.constant 0 : index
    %c0_90 = arith.constant 0 : index
    %86 = vector.load %arg6[%c3_88, %c0_89, %c0_90] : memref<11x32x32xf32, #tpu.memory_space<vmem>>, vector<1x32x32xf32>
    %87 = vector.shape_cast %86 : vector<1x32x32xf32> to vector<32x32xf32>
    %cst_91 = arith.constant dense<0.000000e+00> : vector<32x16xf32>
    %88 = tpu.matmul %87, %85, %cst_91 {dimension_numbers = #tpu.dot_dimension_numbers<[1], [0], [0], [1], [0, 0, 1, 1], [], []>} : vector<32x32xf32>, vector<32x16xf32>, vector<32x16xf32> -> vector<32x16xf32>
    %89 = arith.addf %82, %88 : vector<32x16xf32>
    %c4_92 = arith.constant 4 : index
    %c0_93 = arith.constant 0 : index
    %c0_94 = arith.constant 0 : index
    %90 = vector.load %arg8[%c4_92, %c0_93, %c0_94] : memref<11x16x16xf32, #tpu.memory_space<vmem>>, vector<1x16x16xf32>
    %91 = vector.shape_cast %90 : vector<1x16x16xf32> to vector<16x16xf32>
    %cst_95 = arith.constant dense<0.000000e+00> : vector<32x16xf32>
    %92 = tpu.matmul %62, %91, %cst_95 {dimension_numbers = #tpu.dot_dimension_numbers<[1], [0], [0], [1], [0, 0, 1, 1], [], []>} : vector<32x16xf32>, vector<16x16xf32>, vector<32x16xf32> -> vector<32x16xf32>
    %c4_96 = arith.constant 4 : index
    %c0_97 = arith.constant 0 : index
    %c0_98 = arith.constant 0 : index
    %93 = vector.load %arg6[%c4_96, %c0_97, %c0_98] : memref<11x32x32xf32, #tpu.memory_space<vmem>>, vector<1x32x32xf32>
    %94 = vector.shape_cast %93 : vector<1x32x32xf32> to vector<32x32xf32>
    %cst_99 = arith.constant dense<0.000000e+00> : vector<32x16xf32>
    %95 = tpu.matmul %94, %92, %cst_99 {dimension_numbers = #tpu.dot_dimension_numbers<[1], [0], [0], [1], [0, 0, 1, 1], [], []>} : vector<32x32xf32>, vector<32x16xf32>, vector<32x16xf32> -> vector<32x16xf32>
    %96 = arith.addf %89, %95 : vector<32x16xf32>
    %c5_100 = arith.constant 5 : index
    %c0_101 = arith.constant 0 : index
    %c0_102 = arith.constant 0 : index
    %97 = vector.load %arg8[%c5_100, %c0_101, %c0_102] : memref<11x16x16xf32, #tpu.memory_space<vmem>>, vector<1x16x16xf32>
    %98 = vector.shape_cast %97 : vector<1x16x16xf32> to vector<16x16xf32>
    %cst_103 = arith.constant dense<0.000000e+00> : vector<32x16xf32>
    %99 = tpu.matmul %62, %98, %cst_103 {dimension_numbers = #tpu.dot_dimension_numbers<[1], [0], [0], [1], [0, 0, 1, 1], [], []>} : vector<32x16xf32>, vector<16x16xf32>, vector<32x16xf32> -> vector<32x16xf32>
    %c5_104 = arith.constant 5 : index
    %c0_105 = arith.constant 0 : index
    %c0_106 = arith.constant 0 : index
    %100 = vector.load %arg6[%c5_104, %c0_105, %c0_106] : memref<11x32x32xf32, #tpu.memory_space<vmem>>, vector<1x32x32xf32>
    %101 = vector.shape_cast %100 : vector<1x32x32xf32> to vector<32x32xf32>
    %cst_107 = arith.constant dense<0.000000e+00> : vector<32x16xf32>
    %102 = tpu.matmul %101, %99, %cst_107 {dimension_numbers = #tpu.dot_dimension_numbers<[1], [0], [0], [1], [0, 0, 1, 1], [], []>} : vector<32x32xf32>, vector<32x16xf32>, vector<32x16xf32> -> vector<32x16xf32>
    %103 = arith.addf %96, %102 : vector<32x16xf32>
    %c6_108 = arith.constant 6 : index
    %c0_109 = arith.constant 0 : index
    %c0_110 = arith.constant 0 : index
    %104 = vector.load %arg8[%c6_108, %c0_109, %c0_110] : memref<11x16x16xf32, #tpu.memory_space<vmem>>, vector<1x16x16xf32>
    %105 = vector.shape_cast %104 : vector<1x16x16xf32> to vector<16x16xf32>
    %cst_111 = arith.constant dense<0.000000e+00> : vector<32x16xf32>
    %106 = tpu.matmul %62, %105, %cst_111 {dimension_numbers = #tpu.dot_dimension_numbers<[1], [0], [0], [1], [0, 0, 1, 1], [], []>} : vector<32x16xf32>, vector<16x16xf32>, vector<32x16xf32> -> vector<32x16xf32>
    %c6_112 = arith.constant 6 : index
    %c0_113 = arith.constant 0 : index
    %c0_114 = arith.constant 0 : index
    %107 = vector.load %arg6[%c6_112, %c0_113, %c0_114] : memref<11x32x32xf32, #tpu.memory_space<vmem>>, vector<1x32x32xf32>
    %108 = vector.shape_cast %107 : vector<1x32x32xf32> to vector<32x32xf32>
    %cst_115 = arith.constant dense<0.000000e+00> : vector<32x16xf32>
    %109 = tpu.matmul %108, %106, %cst_115 {dimension_numbers = #tpu.dot_dimension_numbers<[1], [0], [0], [1], [0, 0, 1, 1], [], []>} : vector<32x32xf32>, vector<32x16xf32>, vector<32x16xf32> -> vector<32x16xf32>
    %110 = arith.addf %103, %109 : vector<32x16xf32>
    %c7 = arith.constant 7 : index
    %c0_116 = arith.constant 0 : index
    %c0_117 = arith.constant 0 : index
    %111 = vector.load %arg8[%c7, %c0_116, %c0_117] : memref<11x16x16xf32, #tpu.memory_space<vmem>>, vector<1x16x16xf32>
    %112 = vector.shape_cast %111 : vector<1x16x16xf32> to vector<16x16xf32>
    %cst_118 = arith.constant dense<0.000000e+00> : vector<32x16xf32>
    %113 = tpu.matmul %62, %112, %cst_118 {dimension_numbers = #tpu.dot_dimension_numbers<[1], [0], [0], [1], [0, 0, 1, 1], [], []>} : vector<32x16xf32>, vector<16x16xf32>, vector<32x16xf32> -> vector<32x16xf32>
    %c7_119 = arith.constant 7 : index
    %c0_120 = arith.constant 0 : index
    %c0_121 = arith.constant 0 : index
    %114 = vector.load %arg6[%c7_119, %c0_120, %c0_121] : memref<11x32x32xf32, #tpu.memory_space<vmem>>, vector<1x32x32xf32>
    %115 = vector.shape_cast %114 : vector<1x32x32xf32> to vector<32x32xf32>
    %cst_122 = arith.constant dense<0.000000e+00> : vector<32x16xf32>
    %116 = tpu.matmul %115, %113, %cst_122 {dimension_numbers = #tpu.dot_dimension_numbers<[1], [0], [0], [1], [0, 0, 1, 1], [], []>} : vector<32x32xf32>, vector<32x16xf32>, vector<32x16xf32> -> vector<32x16xf32>
    %117 = arith.addf %110, %116 : vector<32x16xf32>
    %c8 = arith.constant 8 : index
    %c0_123 = arith.constant 0 : index
    %c0_124 = arith.constant 0 : index
    %118 = vector.load %arg8[%c8, %c0_123, %c0_124] : memref<11x16x16xf32, #tpu.memory_space<vmem>>, vector<1x16x16xf32>
    %119 = vector.shape_cast %118 : vector<1x16x16xf32> to vector<16x16xf32>
    %cst_125 = arith.constant dense<0.000000e+00> : vector<32x16xf32>
    %120 = tpu.matmul %62, %119, %cst_125 {dimension_numbers = #tpu.dot_dimension_numbers<[1], [0], [0], [1], [0, 0, 1, 1], [], []>} : vector<32x16xf32>, vector<16x16xf32>, vector<32x16xf32> -> vector<32x16xf32>
    %c8_126 = arith.constant 8 : index
    %c0_127 = arith.constant 0 : index
    %c0_128 = arith.constant 0 : index
    %121 = vector.load %arg6[%c8_126, %c0_127, %c0_128] : memref<11x32x32xf32, #tpu.memory_space<vmem>>, vector<1x32x32xf32>
    %122 = vector.shape_cast %121 : vector<1x32x32xf32> to vector<32x32xf32>
    %cst_129 = arith.constant dense<0.000000e+00> : vector<32x16xf32>
    %123 = tpu.matmul %122, %120, %cst_129 {dimension_numbers = #tpu.dot_dimension_numbers<[1], [0], [0], [1], [0, 0, 1, 1], [], []>} : vector<32x32xf32>, vector<32x16xf32>, vector<32x16xf32> -> vector<32x16xf32>
    %124 = arith.addf %117, %123 : vector<32x16xf32>
    %c9 = arith.constant 9 : index
    %c0_130 = arith.constant 0 : index
    %c0_131 = arith.constant 0 : index
    %125 = vector.load %arg8[%c9, %c0_130, %c0_131] : memref<11x16x16xf32, #tpu.memory_space<vmem>>, vector<1x16x16xf32>
    %126 = vector.shape_cast %125 : vector<1x16x16xf32> to vector<16x16xf32>
    %cst_132 = arith.constant dense<0.000000e+00> : vector<32x16xf32>
    %127 = tpu.matmul %62, %126, %cst_132 {dimension_numbers = #tpu.dot_dimension_numbers<[1], [0], [0], [1], [0, 0, 1, 1], [], []>} : vector<32x16xf32>, vector<16x16xf32>, vector<32x16xf32> -> vector<32x16xf32>
    %c9_133 = arith.constant 9 : index
    %c0_134 = arith.constant 0 : index
    %c0_135 = arith.constant 0 : index
    %128 = vector.load %arg6[%c9_133, %c0_134, %c0_135] : memref<11x32x32xf32, #tpu.memory_space<vmem>>, vector<1x32x32xf32>
    %129 = vector.shape_cast %128 : vector<1x32x32xf32> to vector<32x32xf32>
    %cst_136 = arith.constant dense<0.000000e+00> : vector<32x16xf32>
    %130 = tpu.matmul %129, %127, %cst_136 {dimension_numbers = #tpu.dot_dimension_numbers<[1], [0], [0], [1], [0, 0, 1, 1], [], []>} : vector<32x32xf32>, vector<32x16xf32>, vector<32x16xf32> -> vector<32x16xf32>
    %131 = arith.addf %124, %130 : vector<32x16xf32>
    %c10 = arith.constant 10 : index
    %c0_137 = arith.constant 0 : index
    %c0_138 = arith.constant 0 : index
    %132 = vector.load %arg8[%c10, %c0_137, %c0_138] : memref<11x16x16xf32, #tpu.memory_space<vmem>>, vector<1x16x16xf32>
    %133 = vector.shape_cast %132 : vector<1x16x16xf32> to vector<16x16xf32>
    %cst_139 = arith.constant dense<0.000000e+00> : vector<32x16xf32>
    %134 = tpu.matmul %62, %133, %cst_139 {dimension_numbers = #tpu.dot_dimension_numbers<[1], [0], [0], [1], [0, 0, 1, 1], [], []>} : vector<32x16xf32>, vector<16x16xf32>, vector<32x16xf32> -> vector<32x16xf32>
    %c10_140 = arith.constant 10 : index
    %c0_141 = arith.constant 0 : index
    %c0_142 = arith.constant 0 : index
    %135 = vector.load %arg6[%c10_140, %c0_141, %c0_142] : memref<11x32x32xf32, #tpu.memory_space<vmem>>, vector<1x32x32xf32>
    %136 = vector.shape_cast %135 : vector<1x32x32xf32> to vector<32x32xf32>
    %cst_143 = arith.constant dense<0.000000e+00> : vector<32x16xf32>
    %137 = tpu.matmul %136, %134, %cst_143 {dimension_numbers = #tpu.dot_dimension_numbers<[1], [0], [0], [1], [0, 0, 1, 1], [], []>} : vector<32x32xf32>, vector<32x16xf32>, vector<32x16xf32> -> vector<32x16xf32>
    %138 = arith.addf %131, %137 : vector<32x16xf32>
    %c0_144 = arith.constant 0 : index
    %c0_145 = arith.constant 0 : index
    %139 = vector.load %arg7[%c0_144, %c0_145] : memref<32x1xf32, #tpu.memory_space<vmem>>, vector<32x1xf32>
    %140 = vector.broadcast %139 : vector<32x1xf32> to vector<32x16xf32>
    %141 = arith.addf %138, %140 : vector<32x16xf32>
    %cst_146 = arith.constant 0.000000e+00 : f32
    %142 = vector.broadcast %cst_146 : f32 to vector<32x16xf32>
    %143 = arith.cmpf oge, %141, %142 : vector<32x16xf32>
    %cst_147 = arith.constant 0.00999999977 : f32
    %144 = vector.broadcast %cst_147 : f32 to vector<32x16xf32>
    %145 = arith.mulf %144, %141 : vector<32x16xf32>
    %146 = arith.select %143, %141, %145 : vector<32x16xi1>, vector<32x16xf32>
    %c0_148 = arith.constant 0 : index
    %c0_149 = arith.constant 0 : index
    %c0_150 = arith.constant 0 : index
    %147 = vector.load %arg11[%c0_148, %c0_149, %c0_150] : memref<11x16x16xf32, #tpu.memory_space<vmem>>, vector<1x16x16xf32>
    %148 = vector.shape_cast %147 : vector<1x16x16xf32> to vector<16x16xf32>
    %cst_151 = arith.constant dense<0.000000e+00> : vector<32x16xf32>
    %149 = tpu.matmul %146, %148, %cst_151 {dimension_numbers = #tpu.dot_dimension_numbers<[1], [0], [0], [1], [0, 0, 1, 1], [], []>} : vector<32x16xf32>, vector<16x16xf32>, vector<32x16xf32> -> vector<32x16xf32>
    %c0_152 = arith.constant 0 : index
    %c0_153 = arith.constant 0 : index
    %c0_154 = arith.constant 0 : index
    %150 = vector.load %arg9[%c0_152, %c0_153, %c0_154] : memref<11x32x32xf32, #tpu.memory_space<vmem>>, vector<1x32x32xf32>
    %151 = vector.shape_cast %150 : vector<1x32x32xf32> to vector<32x32xf32>
    %cst_155 = arith.constant dense<0.000000e+00> : vector<32x16xf32>
    %152 = tpu.matmul %151, %149, %cst_155 {dimension_numbers = #tpu.dot_dimension_numbers<[1], [0], [0], [1], [0, 0, 1, 1], [], []>} : vector<32x32xf32>, vector<32x16xf32>, vector<32x16xf32> -> vector<32x16xf32>
    %c1_156 = arith.constant 1 : index
    %c0_157 = arith.constant 0 : index
    %c0_158 = arith.constant 0 : index
    %153 = vector.load %arg11[%c1_156, %c0_157, %c0_158] : memref<11x16x16xf32, #tpu.memory_space<vmem>>, vector<1x16x16xf32>
    %154 = vector.shape_cast %153 : vector<1x16x16xf32> to vector<16x16xf32>
    %cst_159 = arith.constant dense<0.000000e+00> : vector<32x16xf32>
    %155 = tpu.matmul %146, %154, %cst_159 {dimension_numbers = #tpu.dot_dimension_numbers<[1], [0], [0], [1], [0, 0, 1, 1], [], []>} : vector<32x16xf32>, vector<16x16xf32>, vector<32x16xf32> -> vector<32x16xf32>
    %c1_160 = arith.constant 1 : index
    %c0_161 = arith.constant 0 : index
    %c0_162 = arith.constant 0 : index
    %156 = vector.load %arg9[%c1_160, %c0_161, %c0_162] : memref<11x32x32xf32, #tpu.memory_space<vmem>>, vector<1x32x32xf32>
    %157 = vector.shape_cast %156 : vector<1x32x32xf32> to vector<32x32xf32>
    %cst_163 = arith.constant dense<0.000000e+00> : vector<32x16xf32>
    %158 = tpu.matmul %157, %155, %cst_163 {dimension_numbers = #tpu.dot_dimension_numbers<[1], [0], [0], [1], [0, 0, 1, 1], [], []>} : vector<32x32xf32>, vector<32x16xf32>, vector<32x16xf32> -> vector<32x16xf32>
    %159 = arith.addf %152, %158 : vector<32x16xf32>
    %c2_164 = arith.constant 2 : index
    %c0_165 = arith.constant 0 : index
    %c0_166 = arith.constant 0 : index
    %160 = vector.load %arg11[%c2_164, %c0_165, %c0_166] : memref<11x16x16xf32, #tpu.memory_space<vmem>>, vector<1x16x16xf32>
    %161 = vector.shape_cast %160 : vector<1x16x16xf32> to vector<16x16xf32>
    %cst_167 = arith.constant dense<0.000000e+00> : vector<32x16xf32>
    %162 = tpu.matmul %146, %161, %cst_167 {dimension_numbers = #tpu.dot_dimension_numbers<[1], [0], [0], [1], [0, 0, 1, 1], [], []>} : vector<32x16xf32>, vector<16x16xf32>, vector<32x16xf32> -> vector<32x16xf32>
    %c2_168 = arith.constant 2 : index
    %c0_169 = arith.constant 0 : index
    %c0_170 = arith.constant 0 : index
    %163 = vector.load %arg9[%c2_168, %c0_169, %c0_170] : memref<11x32x32xf32, #tpu.memory_space<vmem>>, vector<1x32x32xf32>
    %164 = vector.shape_cast %163 : vector<1x32x32xf32> to vector<32x32xf32>
    %cst_171 = arith.constant dense<0.000000e+00> : vector<32x16xf32>
    %165 = tpu.matmul %164, %162, %cst_171 {dimension_numbers = #tpu.dot_dimension_numbers<[1], [0], [0], [1], [0, 0, 1, 1], [], []>} : vector<32x32xf32>, vector<32x16xf32>, vector<32x16xf32> -> vector<32x16xf32>
    %166 = arith.addf %159, %165 : vector<32x16xf32>
    %c3_172 = arith.constant 3 : index
    %c0_173 = arith.constant 0 : index
    %c0_174 = arith.constant 0 : index
    %167 = vector.load %arg11[%c3_172, %c0_173, %c0_174] : memref<11x16x16xf32, #tpu.memory_space<vmem>>, vector<1x16x16xf32>
    %168 = vector.shape_cast %167 : vector<1x16x16xf32> to vector<16x16xf32>
    %cst_175 = arith.constant dense<0.000000e+00> : vector<32x16xf32>
    %169 = tpu.matmul %146, %168, %cst_175 {dimension_numbers = #tpu.dot_dimension_numbers<[1], [0], [0], [1], [0, 0, 1, 1], [], []>} : vector<32x16xf32>, vector<16x16xf32>, vector<32x16xf32> -> vector<32x16xf32>
    %c3_176 = arith.constant 3 : index
    %c0_177 = arith.constant 0 : index
    %c0_178 = arith.constant 0 : index
    %170 = vector.load %arg9[%c3_176, %c0_177, %c0_178] : memref<11x32x32xf32, #tpu.memory_space<vmem>>, vector<1x32x32xf32>
    %171 = vector.shape_cast %170 : vector<1x32x32xf32> to vector<32x32xf32>
    %cst_179 = arith.constant dense<0.000000e+00> : vector<32x16xf32>
    %172 = tpu.matmul %171, %169, %cst_179 {dimension_numbers = #tpu.dot_dimension_numbers<[1], [0], [0], [1], [0, 0, 1, 1], [], []>} : vector<32x32xf32>, vector<32x16xf32>, vector<32x16xf32> -> vector<32x16xf32>
    %173 = arith.addf %166, %172 : vector<32x16xf32>
    %c4_180 = arith.constant 4 : index
    %c0_181 = arith.constant 0 : index
    %c0_182 = arith.constant 0 : index
    %174 = vector.load %arg11[%c4_180, %c0_181, %c0_182] : memref<11x16x16xf32, #tpu.memory_space<vmem>>, vector<1x16x16xf32>
    %175 = vector.shape_cast %174 : vector<1x16x16xf32> to vector<16x16xf32>
    %cst_183 = arith.constant dense<0.000000e+00> : vector<32x16xf32>
    %176 = tpu.matmul %146, %175, %cst_183 {dimension_numbers = #tpu.dot_dimension_numbers<[1], [0], [0], [1], [0, 0, 1, 1], [], []>} : vector<32x16xf32>, vector<16x16xf32>, vector<32x16xf32> -> vector<32x16xf32>
    %c4_184 = arith.constant 4 : index
    %c0_185 = arith.constant 0 : index
    %c0_186 = arith.constant 0 : index
    %177 = vector.load %arg9[%c4_184, %c0_185, %c0_186] : memref<11x32x32xf32, #tpu.memory_space<vmem>>, vector<1x32x32xf32>
    %178 = vector.shape_cast %177 : vector<1x32x32xf32> to vector<32x32xf32>
    %cst_187 = arith.constant dense<0.000000e+00> : vector<32x16xf32>
    %179 = tpu.matmul %178, %176, %cst_187 {dimension_numbers = #tpu.dot_dimension_numbers<[1], [0], [0], [1], [0, 0, 1, 1], [], []>} : vector<32x32xf32>, vector<32x16xf32>, vector<32x16xf32> -> vector<32x16xf32>
    %180 = arith.addf %173, %179 : vector<32x16xf32>
    %c5_188 = arith.constant 5 : index
    %c0_189 = arith.constant 0 : index
    %c0_190 = arith.constant 0 : index
    %181 = vector.load %arg11[%c5_188, %c0_189, %c0_190] : memref<11x16x16xf32, #tpu.memory_space<vmem>>, vector<1x16x16xf32>
    %182 = vector.shape_cast %181 : vector<1x16x16xf32> to vector<16x16xf32>
    %cst_191 = arith.constant dense<0.000000e+00> : vector<32x16xf32>
    %183 = tpu.matmul %146, %182, %cst_191 {dimension_numbers = #tpu.dot_dimension_numbers<[1], [0], [0], [1], [0, 0, 1, 1], [], []>} : vector<32x16xf32>, vector<16x16xf32>, vector<32x16xf32> -> vector<32x16xf32>
    %c5_192 = arith.constant 5 : index
    %c0_193 = arith.constant 0 : index
    %c0_194 = arith.constant 0 : index
    %184 = vector.load %arg9[%c5_192, %c0_193, %c0_194] : memref<11x32x32xf32, #tpu.memory_space<vmem>>, vector<1x32x32xf32>
    %185 = vector.shape_cast %184 : vector<1x32x32xf32> to vector<32x32xf32>
    %cst_195 = arith.constant dense<0.000000e+00> : vector<32x16xf32>
    %186 = tpu.matmul %185, %183, %cst_195 {dimension_numbers = #tpu.dot_dimension_numbers<[1], [0], [0], [1], [0, 0, 1, 1], [], []>} : vector<32x32xf32>, vector<32x16xf32>, vector<32x16xf32> -> vector<32x16xf32>
    %187 = arith.addf %180, %186 : vector<32x16xf32>
    %c6_196 = arith.constant 6 : index
    %c0_197 = arith.constant 0 : index
    %c0_198 = arith.constant 0 : index
    %188 = vector.load %arg11[%c6_196, %c0_197, %c0_198] : memref<11x16x16xf32, #tpu.memory_space<vmem>>, vector<1x16x16xf32>
    %189 = vector.shape_cast %188 : vector<1x16x16xf32> to vector<16x16xf32>
    %cst_199 = arith.constant dense<0.000000e+00> : vector<32x16xf32>
    %190 = tpu.matmul %146, %189, %cst_199 {dimension_numbers = #tpu.dot_dimension_numbers<[1], [0], [0], [1], [0, 0, 1, 1], [], []>} : vector<32x16xf32>, vector<16x16xf32>, vector<32x16xf32> -> vector<32x16xf32>
    %c6_200 = arith.constant 6 : index
    %c0_201 = arith.constant 0 : index
    %c0_202 = arith.constant 0 : index
    %191 = vector.load %arg9[%c6_200, %c0_201, %c0_202] : memref<11x32x32xf32, #tpu.memory_space<vmem>>, vector<1x32x32xf32>
    %192 = vector.shape_cast %191 : vector<1x32x32xf32> to vector<32x32xf32>
    %cst_203 = arith.constant dense<0.000000e+00> : vector<32x16xf32>
    %193 = tpu.matmul %192, %190, %cst_203 {dimension_numbers = #tpu.dot_dimension_numbers<[1], [0], [0], [1], [0, 0, 1, 1], [], []>} : vector<32x32xf32>, vector<32x16xf32>, vector<32x16xf32> -> vector<32x16xf32>
    %194 = arith.addf %187, %193 : vector<32x16xf32>
    %c7_204 = arith.constant 7 : index
    %c0_205 = arith.constant 0 : index
    %c0_206 = arith.constant 0 : index
    %195 = vector.load %arg11[%c7_204, %c0_205, %c0_206] : memref<11x16x16xf32, #tpu.memory_space<vmem>>, vector<1x16x16xf32>
    %196 = vector.shape_cast %195 : vector<1x16x16xf32> to vector<16x16xf32>
    %cst_207 = arith.constant dense<0.000000e+00> : vector<32x16xf32>
    %197 = tpu.matmul %146, %196, %cst_207 {dimension_numbers = #tpu.dot_dimension_numbers<[1], [0], [0], [1], [0, 0, 1, 1], [], []>} : vector<32x16xf32>, vector<16x16xf32>, vector<32x16xf32> -> vector<32x16xf32>
    %c7_208 = arith.constant 7 : index
    %c0_209 = arith.constant 0 : index
    %c0_210 = arith.constant 0 : index
    %198 = vector.load %arg9[%c7_208, %c0_209, %c0_210] : memref<11x32x32xf32, #tpu.memory_space<vmem>>, vector<1x32x32xf32>
    %199 = vector.shape_cast %198 : vector<1x32x32xf32> to vector<32x32xf32>
    %cst_211 = arith.constant dense<0.000000e+00> : vector<32x16xf32>
    %200 = tpu.matmul %199, %197, %cst_211 {dimension_numbers = #tpu.dot_dimension_numbers<[1], [0], [0], [1], [0, 0, 1, 1], [], []>} : vector<32x32xf32>, vector<32x16xf32>, vector<32x16xf32> -> vector<32x16xf32>
    %201 = arith.addf %194, %200 : vector<32x16xf32>
    %c8_212 = arith.constant 8 : index
    %c0_213 = arith.constant 0 : index
    %c0_214 = arith.constant 0 : index
    %202 = vector.load %arg11[%c8_212, %c0_213, %c0_214] : memref<11x16x16xf32, #tpu.memory_space<vmem>>, vector<1x16x16xf32>
    %203 = vector.shape_cast %202 : vector<1x16x16xf32> to vector<16x16xf32>
    %cst_215 = arith.constant dense<0.000000e+00> : vector<32x16xf32>
    %204 = tpu.matmul %146, %203, %cst_215 {dimension_numbers = #tpu.dot_dimension_numbers<[1], [0], [0], [1], [0, 0, 1, 1], [], []>} : vector<32x16xf32>, vector<16x16xf32>, vector<32x16xf32> -> vector<32x16xf32>
    %c8_216 = arith.constant 8 : index
    %c0_217 = arith.constant 0 : index
    %c0_218 = arith.constant 0 : index
    %205 = vector.load %arg9[%c8_216, %c0_217, %c0_218] : memref<11x32x32xf32, #tpu.memory_space<vmem>>, vector<1x32x32xf32>
    %206 = vector.shape_cast %205 : vector<1x32x32xf32> to vector<32x32xf32>
    %cst_219 = arith.constant dense<0.000000e+00> : vector<32x16xf32>
    %207 = tpu.matmul %206, %204, %cst_219 {dimension_numbers = #tpu.dot_dimension_numbers<[1], [0], [0], [1], [0, 0, 1, 1], [], []>} : vector<32x32xf32>, vector<32x16xf32>, vector<32x16xf32> -> vector<32x16xf32>
    %208 = arith.addf %201, %207 : vector<32x16xf32>
    %c9_220 = arith.constant 9 : index
    %c0_221 = arith.constant 0 : index
    %c0_222 = arith.constant 0 : index
    %209 = vector.load %arg11[%c9_220, %c0_221, %c0_222] : memref<11x16x16xf32, #tpu.memory_space<vmem>>, vector<1x16x16xf32>
    %210 = vector.shape_cast %209 : vector<1x16x16xf32> to vector<16x16xf32>
    %cst_223 = arith.constant dense<0.000000e+00> : vector<32x16xf32>
    %211 = tpu.matmul %146, %210, %cst_223 {dimension_numbers = #tpu.dot_dimension_numbers<[1], [0], [0], [1], [0, 0, 1, 1], [], []>} : vector<32x16xf32>, vector<16x16xf32>, vector<32x16xf32> -> vector<32x16xf32>
    %c9_224 = arith.constant 9 : index
    %c0_225 = arith.constant 0 : index
    %c0_226 = arith.constant 0 : index
    %212 = vector.load %arg9[%c9_224, %c0_225, %c0_226] : memref<11x32x32xf32, #tpu.memory_space<vmem>>, vector<1x32x32xf32>
    %213 = vector.shape_cast %212 : vector<1x32x32xf32> to vector<32x32xf32>
    %cst_227 = arith.constant dense<0.000000e+00> : vector<32x16xf32>
    %214 = tpu.matmul %213, %211, %cst_227 {dimension_numbers = #tpu.dot_dimension_numbers<[1], [0], [0], [1], [0, 0, 1, 1], [], []>} : vector<32x32xf32>, vector<32x16xf32>, vector<32x16xf32> -> vector<32x16xf32>
    %215 = arith.addf %208, %214 : vector<32x16xf32>
    %c10_228 = arith.constant 10 : index
    %c0_229 = arith.constant 0 : index
    %c0_230 = arith.constant 0 : index
    %216 = vector.load %arg11[%c10_228, %c0_229, %c0_230] : memref<11x16x16xf32, #tpu.memory_space<vmem>>, vector<1x16x16xf32>
    %217 = vector.shape_cast %216 : vector<1x16x16xf32> to vector<16x16xf32>
    %cst_231 = arith.constant dense<0.000000e+00> : vector<32x16xf32>
    %218 = tpu.matmul %146, %217, %cst_231 {dimension_numbers = #tpu.dot_dimension_numbers<[1], [0], [0], [1], [0, 0, 1, 1], [], []>} : vector<32x16xf32>, vector<16x16xf32>, vector<32x16xf32> -> vector<32x16xf32>
    %c10_232 = arith.constant 10 : index
    %c0_233 = arith.constant 0 : index
    %c0_234 = arith.constant 0 : index
    %219 = vector.load %arg9[%c10_232, %c0_233, %c0_234] : memref<11x32x32xf32, #tpu.memory_space<vmem>>, vector<1x32x32xf32>
    %220 = vector.shape_cast %219 : vector<1x32x32xf32> to vector<32x32xf32>
    %cst_235 = arith.constant dense<0.000000e+00> : vector<32x16xf32>
    %221 = tpu.matmul %220, %218, %cst_235 {dimension_numbers = #tpu.dot_dimension_numbers<[1], [0], [0], [1], [0, 0, 1, 1], [], []>} : vector<32x32xf32>, vector<32x16xf32>, vector<32x16xf32> -> vector<32x16xf32>
    %222 = arith.addf %215, %221 : vector<32x16xf32>
    %c0_236 = arith.constant 0 : index
    %c0_237 = arith.constant 0 : index
    %223 = vector.load %arg10[%c0_236, %c0_237] : memref<32x1xf32, #tpu.memory_space<vmem>>, vector<32x1xf32>
    %224 = vector.broadcast %223 : vector<32x1xf32> to vector<32x16xf32>
    %225 = arith.addf %222, %224 : vector<32x16xf32>
    %226 = arith.addf %57, %225 : vector<32x16xf32>
    %cst_238 = arith.constant 0.000000e+00 : f32
    %227 = vector.broadcast %cst_238 : f32 to vector<32x16xf32>
    %228 = arith.cmpf oge, %226, %227 : vector<32x16xf32>
    %cst_239 = arith.constant 0.00999999977 : f32
    %229 = vector.broadcast %cst_239 : f32 to vector<32x16xf32>
    %230 = arith.mulf %229, %226 : vector<32x16xf32>
    %231 = arith.select %228, %226, %230 : vector<32x16xi1>, vector<32x16xf32>
    %cst_240 = arith.constant 0.000000e+00 : f32
    %232 = vector.broadcast %cst_240 : f32 to vector<32x16xf32>
    %233 = arith.cmpf oge, %231, %232 : vector<32x16xf32>
    %cst_241 = arith.constant 0.00999999977 : f32
    %234 = vector.broadcast %cst_241 : f32 to vector<32x16xf32>
    %235 = arith.mulf %234, %231 : vector<32x16xf32>
    %236 = arith.select %233, %231, %235 : vector<32x16xi1>, vector<32x16xf32>
    %c0_242 = arith.constant 0 : index
    %c0_243 = arith.constant 0 : index
    %c0_244 = arith.constant 0 : index
    %237 = vector.load %arg14[%c0_242, %c0_243, %c0_244] : memref<7x16x8xf32, #tpu.memory_space<vmem>>, vector<1x16x8xf32>
    %238 = vector.shape_cast %237 : vector<1x16x8xf32> to vector<16x8xf32>
    %cst_245 = arith.constant dense<0.000000e+00> : vector<32x8xf32>
    %239 = tpu.matmul %236, %238, %cst_245 {dimension_numbers = #tpu.dot_dimension_numbers<[1], [0], [0], [1], [0, 0, 1, 1], [], []>} : vector<32x16xf32>, vector<16x8xf32>, vector<32x8xf32> -> vector<32x8xf32>
    %c0_246 = arith.constant 0 : index
    %c0_247 = arith.constant 0 : index
    %c0_248 = arith.constant 0 : index
    %240 = vector.load %arg12[%c0_246, %c0_247, %c0_248] : memref<7x32x32xf32, #tpu.memory_space<vmem>>, vector<1x32x32xf32>
    %241 = vector.shape_cast %240 : vector<1x32x32xf32> to vector<32x32xf32>
    %cst_249 = arith.constant dense<0.000000e+00> : vector<32x8xf32>
    %242 = tpu.matmul %241, %239, %cst_249 {dimension_numbers = #tpu.dot_dimension_numbers<[1], [0], [0], [1], [0, 0, 1, 1], [], []>} : vector<32x32xf32>, vector<32x8xf32>, vector<32x8xf32> -> vector<32x8xf32>
    %c1_250 = arith.constant 1 : index
    %c0_251 = arith.constant 0 : index
    %c0_252 = arith.constant 0 : index
    %243 = vector.load %arg14[%c1_250, %c0_251, %c0_252] : memref<7x16x8xf32, #tpu.memory_space<vmem>>, vector<1x16x8xf32>
    %244 = vector.shape_cast %243 : vector<1x16x8xf32> to vector<16x8xf32>
    %cst_253 = arith.constant dense<0.000000e+00> : vector<32x8xf32>
    %245 = tpu.matmul %236, %244, %cst_253 {dimension_numbers = #tpu.dot_dimension_numbers<[1], [0], [0], [1], [0, 0, 1, 1], [], []>} : vector<32x16xf32>, vector<16x8xf32>, vector<32x8xf32> -> vector<32x8xf32>
    %c1_254 = arith.constant 1 : index
    %c0_255 = arith.constant 0 : index
    %c0_256 = arith.constant 0 : index
    %246 = vector.load %arg12[%c1_254, %c0_255, %c0_256] : memref<7x32x32xf32, #tpu.memory_space<vmem>>, vector<1x32x32xf32>
    %247 = vector.shape_cast %246 : vector<1x32x32xf32> to vector<32x32xf32>
    %cst_257 = arith.constant dense<0.000000e+00> : vector<32x8xf32>
    %248 = tpu.matmul %247, %245, %cst_257 {dimension_numbers = #tpu.dot_dimension_numbers<[1], [0], [0], [1], [0, 0, 1, 1], [], []>} : vector<32x32xf32>, vector<32x8xf32>, vector<32x8xf32> -> vector<32x8xf32>
    %249 = arith.addf %242, %248 : vector<32x8xf32>
    %c2_258 = arith.constant 2 : index
    %c0_259 = arith.constant 0 : index
    %c0_260 = arith.constant 0 : index
    %250 = vector.load %arg14[%c2_258, %c0_259, %c0_260] : memref<7x16x8xf32, #tpu.memory_space<vmem>>, vector<1x16x8xf32>
    %251 = vector.shape_cast %250 : vector<1x16x8xf32> to vector<16x8xf32>
    %cst_261 = arith.constant dense<0.000000e+00> : vector<32x8xf32>
    %252 = tpu.matmul %236, %251, %cst_261 {dimension_numbers = #tpu.dot_dimension_numbers<[1], [0], [0], [1], [0, 0, 1, 1], [], []>} : vector<32x16xf32>, vector<16x8xf32>, vector<32x8xf32> -> vector<32x8xf32>
    %c2_262 = arith.constant 2 : index
    %c0_263 = arith.constant 0 : index
    %c0_264 = arith.constant 0 : index
    %253 = vector.load %arg12[%c2_262, %c0_263, %c0_264] : memref<7x32x32xf32, #tpu.memory_space<vmem>>, vector<1x32x32xf32>
    %254 = vector.shape_cast %253 : vector<1x32x32xf32> to vector<32x32xf32>
    %cst_265 = arith.constant dense<0.000000e+00> : vector<32x8xf32>
    %255 = tpu.matmul %254, %252, %cst_265 {dimension_numbers = #tpu.dot_dimension_numbers<[1], [0], [0], [1], [0, 0, 1, 1], [], []>} : vector<32x32xf32>, vector<32x8xf32>, vector<32x8xf32> -> vector<32x8xf32>
    %256 = arith.addf %249, %255 : vector<32x8xf32>
    %c3_266 = arith.constant 3 : index
    %c0_267 = arith.constant 0 : index
    %c0_268 = arith.constant 0 : index
    %257 = vector.load %arg14[%c3_266, %c0_267, %c0_268] : memref<7x16x8xf32, #tpu.memory_space<vmem>>, vector<1x16x8xf32>
    %258 = vector.shape_cast %257 : vector<1x16x8xf32> to vector<16x8xf32>
    %cst_269 = arith.constant dense<0.000000e+00> : vector<32x8xf32>
    %259 = tpu.matmul %236, %258, %cst_269 {dimension_numbers = #tpu.dot_dimension_numbers<[1], [0], [0], [1], [0, 0, 1, 1], [], []>} : vector<32x16xf32>, vector<16x8xf32>, vector<32x8xf32> -> vector<32x8xf32>
    %c3_270 = arith.constant 3 : index
    %c0_271 = arith.constant 0 : index
    %c0_272 = arith.constant 0 : index
    %260 = vector.load %arg12[%c3_270, %c0_271, %c0_272] : memref<7x32x32xf32, #tpu.memory_space<vmem>>, vector<1x32x32xf32>
    %261 = vector.shape_cast %260 : vector<1x32x32xf32> to vector<32x32xf32>
    %cst_273 = arith.constant dense<0.000000e+00> : vector<32x8xf32>
    %262 = tpu.matmul %261, %259, %cst_273 {dimension_numbers = #tpu.dot_dimension_numbers<[1], [0], [0], [1], [0, 0, 1, 1], [], []>} : vector<32x32xf32>, vector<32x8xf32>, vector<32x8xf32> -> vector<32x8xf32>
    %263 = arith.addf %256, %262 : vector<32x8xf32>
    %c4_274 = arith.constant 4 : index
    %c0_275 = arith.constant 0 : index
    %c0_276 = arith.constant 0 : index
    %264 = vector.load %arg14[%c4_274, %c0_275, %c0_276] : memref<7x16x8xf32, #tpu.memory_space<vmem>>, vector<1x16x8xf32>
    %265 = vector.shape_cast %264 : vector<1x16x8xf32> to vector<16x8xf32>
    %cst_277 = arith.constant dense<0.000000e+00> : vector<32x8xf32>
    %266 = tpu.matmul %236, %265, %cst_277 {dimension_numbers = #tpu.dot_dimension_numbers<[1], [0], [0], [1], [0, 0, 1, 1], [], []>} : vector<32x16xf32>, vector<16x8xf32>, vector<32x8xf32> -> vector<32x8xf32>
    %c4_278 = arith.constant 4 : index
    %c0_279 = arith.constant 0 : index
    %c0_280 = arith.constant 0 : index
    %267 = vector.load %arg12[%c4_278, %c0_279, %c0_280] : memref<7x32x32xf32, #tpu.memory_space<vmem>>, vector<1x32x32xf32>
    %268 = vector.shape_cast %267 : vector<1x32x32xf32> to vector<32x32xf32>
    %cst_281 = arith.constant dense<0.000000e+00> : vector<32x8xf32>
    %269 = tpu.matmul %268, %266, %cst_281 {dimension_numbers = #tpu.dot_dimension_numbers<[1], [0], [0], [1], [0, 0, 1, 1], [], []>} : vector<32x32xf32>, vector<32x8xf32>, vector<32x8xf32> -> vector<32x8xf32>
    %270 = arith.addf %263, %269 : vector<32x8xf32>
    %c5_282 = arith.constant 5 : index
    %c0_283 = arith.constant 0 : index
    %c0_284 = arith.constant 0 : index
    %271 = vector.load %arg14[%c5_282, %c0_283, %c0_284] : memref<7x16x8xf32, #tpu.memory_space<vmem>>, vector<1x16x8xf32>
    %272 = vector.shape_cast %271 : vector<1x16x8xf32> to vector<16x8xf32>
    %cst_285 = arith.constant dense<0.000000e+00> : vector<32x8xf32>
    %273 = tpu.matmul %236, %272, %cst_285 {dimension_numbers = #tpu.dot_dimension_numbers<[1], [0], [0], [1], [0, 0, 1, 1], [], []>} : vector<32x16xf32>, vector<16x8xf32>, vector<32x8xf32> -> vector<32x8xf32>
    %c5_286 = arith.constant 5 : index
    %c0_287 = arith.constant 0 : index
    %c0_288 = arith.constant 0 : index
    %274 = vector.load %arg12[%c5_286, %c0_287, %c0_288] : memref<7x32x32xf32, #tpu.memory_space<vmem>>, vector<1x32x32xf32>
    %275 = vector.shape_cast %274 : vector<1x32x32xf32> to vector<32x32xf32>
    %cst_289 = arith.constant dense<0.000000e+00> : vector<32x8xf32>
    %276 = tpu.matmul %275, %273, %cst_289 {dimension_numbers = #tpu.dot_dimension_numbers<[1], [0], [0], [1], [0, 0, 1, 1], [], []>} : vector<32x32xf32>, vector<32x8xf32>, vector<32x8xf32> -> vector<32x8xf32>
    %277 = arith.addf %270, %276 : vector<32x8xf32>
    %c6_290 = arith.constant 6 : index
    %c0_291 = arith.constant 0 : index
    %c0_292 = arith.constant 0 : index
    %278 = vector.load %arg14[%c6_290, %c0_291, %c0_292] : memref<7x16x8xf32, #tpu.memory_space<vmem>>, vector<1x16x8xf32>
    %279 = vector.shape_cast %278 : vector<1x16x8xf32> to vector<16x8xf32>
    %cst_293 = arith.constant dense<0.000000e+00> : vector<32x8xf32>
    %280 = tpu.matmul %236, %279, %cst_293 {dimension_numbers = #tpu.dot_dimension_numbers<[1], [0], [0], [1], [0, 0, 1, 1], [], []>} : vector<32x16xf32>, vector<16x8xf32>, vector<32x8xf32> -> vector<32x8xf32>
    %c6_294 = arith.constant 6 : index
    %c0_295 = arith.constant 0 : index
    %c0_296 = arith.constant 0 : index
    %281 = vector.load %arg12[%c6_294, %c0_295, %c0_296] : memref<7x32x32xf32, #tpu.memory_space<vmem>>, vector<1x32x32xf32>
    %282 = vector.shape_cast %281 : vector<1x32x32xf32> to vector<32x32xf32>
    %cst_297 = arith.constant dense<0.000000e+00> : vector<32x8xf32>
    %283 = tpu.matmul %282, %280, %cst_297 {dimension_numbers = #tpu.dot_dimension_numbers<[1], [0], [0], [1], [0, 0, 1, 1], [], []>} : vector<32x32xf32>, vector<32x8xf32>, vector<32x8xf32> -> vector<32x8xf32>
    %284 = arith.addf %277, %283 : vector<32x8xf32>
    %c0_298 = arith.constant 0 : index
    %c0_299 = arith.constant 0 : index
    %285 = vector.load %arg13[%c0_298, %c0_299] : memref<32x1xf32, #tpu.memory_space<vmem>>, vector<32x1xf32>
    %286 = vector.broadcast %285 : vector<32x1xf32> to vector<32x8xf32>
    %287 = arith.addf %284, %286 : vector<32x8xf32>
    %c0_300 = arith.constant 0 : index
    %c0_301 = arith.constant 0 : index
    %c0_302 = arith.constant 0 : index
    %288 = vector.load %arg15[%c0_300, %c0_301, %c0_302] : memref<1x32x32xf32, #tpu.memory_space<vmem>>, vector<1x32x32xf32>
    %289 = vector.shape_cast %288 : vector<1x32x32xf32> to vector<32x32xf32>
    %cst_303 = arith.constant dense<0.000000e+00> : vector<32x8xf32>
    %290 = tpu.matmul %289, %287, %cst_303 {dimension_numbers = #tpu.dot_dimension_numbers<[1], [0], [0], [1], [0, 0, 1, 1], [], []>} : vector<32x32xf32>, vector<32x8xf32>, vector<32x8xf32> -> vector<32x8xf32>
    %c0_304 = arith.constant 0 : index
    %c0_305 = arith.constant 0 : index
    %291 = vector.load %arg16[%c0_304, %c0_305] : memref<32x1xf32, #tpu.memory_space<vmem>>, vector<32x1xf32>
    %292 = vector.broadcast %291 : vector<32x1xf32> to vector<32x8xf32>
    %293 = arith.addf %290, %292 : vector<32x8xf32>
    %cst_306 = arith.constant 0.000000e+00 : f32
    %294 = vector.broadcast %cst_306 : f32 to vector<32x8xf32>
    %295 = arith.cmpf oge, %287, %294 : vector<32x8xf32>
    %cst_307 = arith.constant 0.00999999977 : f32
    %296 = vector.broadcast %cst_307 : f32 to vector<32x8xf32>
    %297 = arith.mulf %296, %287 : vector<32x8xf32>
    %298 = arith.select %295, %287, %297 : vector<32x8xi1>, vector<32x8xf32>
    %c0_308 = arith.constant 0 : index
    %c0_309 = arith.constant 0 : index
    %c0_310 = arith.constant 0 : index
    %299 = vector.load %arg19[%c0_308, %c0_309, %c0_310] : memref<7x8x8xf32, #tpu.memory_space<vmem>>, vector<1x8x8xf32>
    %300 = vector.shape_cast %299 : vector<1x8x8xf32> to vector<8x8xf32>
    %cst_311 = arith.constant dense<0.000000e+00> : vector<32x8xf32>
    %301 = tpu.matmul %298, %300, %cst_311 {dimension_numbers = #tpu.dot_dimension_numbers<[1], [0], [0], [1], [0, 0, 1, 1], [], []>} : vector<32x8xf32>, vector<8x8xf32>, vector<32x8xf32> -> vector<32x8xf32>
    %c0_312 = arith.constant 0 : index
    %c0_313 = arith.constant 0 : index
    %c0_314 = arith.constant 0 : index
    %302 = vector.load %arg17[%c0_312, %c0_313, %c0_314] : memref<7x32x32xf32, #tpu.memory_space<vmem>>, vector<1x32x32xf32>
    %303 = vector.shape_cast %302 : vector<1x32x32xf32> to vector<32x32xf32>
    %cst_315 = arith.constant dense<0.000000e+00> : vector<32x8xf32>
    %304 = tpu.matmul %303, %301, %cst_315 {dimension_numbers = #tpu.dot_dimension_numbers<[1], [0], [0], [1], [0, 0, 1, 1], [], []>} : vector<32x32xf32>, vector<32x8xf32>, vector<32x8xf32> -> vector<32x8xf32>
    %c1_316 = arith.constant 1 : index
    %c0_317 = arith.constant 0 : index
    %c0_318 = arith.constant 0 : index
    %305 = vector.load %arg19[%c1_316, %c0_317, %c0_318] : memref<7x8x8xf32, #tpu.memory_space<vmem>>, vector<1x8x8xf32>
    %306 = vector.shape_cast %305 : vector<1x8x8xf32> to vector<8x8xf32>
    %cst_319 = arith.constant dense<0.000000e+00> : vector<32x8xf32>
    %307 = tpu.matmul %298, %306, %cst_319 {dimension_numbers = #tpu.dot_dimension_numbers<[1], [0], [0], [1], [0, 0, 1, 1], [], []>} : vector<32x8xf32>, vector<8x8xf32>, vector<32x8xf32> -> vector<32x8xf32>
    %c1_320 = arith.constant 1 : index
    %c0_321 = arith.constant 0 : index
    %c0_322 = arith.constant 0 : index
    %308 = vector.load %arg17[%c1_320, %c0_321, %c0_322] : memref<7x32x32xf32, #tpu.memory_space<vmem>>, vector<1x32x32xf32>
    %309 = vector.shape_cast %308 : vector<1x32x32xf32> to vector<32x32xf32>
    %cst_323 = arith.constant dense<0.000000e+00> : vector<32x8xf32>
    %310 = tpu.matmul %309, %307, %cst_323 {dimension_numbers = #tpu.dot_dimension_numbers<[1], [0], [0], [1], [0, 0, 1, 1], [], []>} : vector<32x32xf32>, vector<32x8xf32>, vector<32x8xf32> -> vector<32x8xf32>
    %311 = arith.addf %304, %310 : vector<32x8xf32>
    %c2_324 = arith.constant 2 : index
    %c0_325 = arith.constant 0 : index
    %c0_326 = arith.constant 0 : index
    %312 = vector.load %arg19[%c2_324, %c0_325, %c0_326] : memref<7x8x8xf32, #tpu.memory_space<vmem>>, vector<1x8x8xf32>
    %313 = vector.shape_cast %312 : vector<1x8x8xf32> to vector<8x8xf32>
    %cst_327 = arith.constant dense<0.000000e+00> : vector<32x8xf32>
    %314 = tpu.matmul %298, %313, %cst_327 {dimension_numbers = #tpu.dot_dimension_numbers<[1], [0], [0], [1], [0, 0, 1, 1], [], []>} : vector<32x8xf32>, vector<8x8xf32>, vector<32x8xf32> -> vector<32x8xf32>
    %c2_328 = arith.constant 2 : index
    %c0_329 = arith.constant 0 : index
    %c0_330 = arith.constant 0 : index
    %315 = vector.load %arg17[%c2_328, %c0_329, %c0_330] : memref<7x32x32xf32, #tpu.memory_space<vmem>>, vector<1x32x32xf32>
    %316 = vector.shape_cast %315 : vector<1x32x32xf32> to vector<32x32xf32>
    %cst_331 = arith.constant dense<0.000000e+00> : vector<32x8xf32>
    %317 = tpu.matmul %316, %314, %cst_331 {dimension_numbers = #tpu.dot_dimension_numbers<[1], [0], [0], [1], [0, 0, 1, 1], [], []>} : vector<32x32xf32>, vector<32x8xf32>, vector<32x8xf32> -> vector<32x8xf32>
    %318 = arith.addf %311, %317 : vector<32x8xf32>
    %c3_332 = arith.constant 3 : index
    %c0_333 = arith.constant 0 : index
    %c0_334 = arith.constant 0 : index
    %319 = vector.load %arg19[%c3_332, %c0_333, %c0_334] : memref<7x8x8xf32, #tpu.memory_space<vmem>>, vector<1x8x8xf32>
    %320 = vector.shape_cast %319 : vector<1x8x8xf32> to vector<8x8xf32>
    %cst_335 = arith.constant dense<0.000000e+00> : vector<32x8xf32>
    %321 = tpu.matmul %298, %320, %cst_335 {dimension_numbers = #tpu.dot_dimension_numbers<[1], [0], [0], [1], [0, 0, 1, 1], [], []>} : vector<32x8xf32>, vector<8x8xf32>, vector<32x8xf32> -> vector<32x8xf32>
    %c3_336 = arith.constant 3 : index
    %c0_337 = arith.constant 0 : index
    %c0_338 = arith.constant 0 : index
    %322 = vector.load %arg17[%c3_336, %c0_337, %c0_338] : memref<7x32x32xf32, #tpu.memory_space<vmem>>, vector<1x32x32xf32>
    %323 = vector.shape_cast %322 : vector<1x32x32xf32> to vector<32x32xf32>
    %cst_339 = arith.constant dense<0.000000e+00> : vector<32x8xf32>
    %324 = tpu.matmul %323, %321, %cst_339 {dimension_numbers = #tpu.dot_dimension_numbers<[1], [0], [0], [1], [0, 0, 1, 1], [], []>} : vector<32x32xf32>, vector<32x8xf32>, vector<32x8xf32> -> vector<32x8xf32>
    %325 = arith.addf %318, %324 : vector<32x8xf32>
    %c4_340 = arith.constant 4 : index
    %c0_341 = arith.constant 0 : index
    %c0_342 = arith.constant 0 : index
    %326 = vector.load %arg19[%c4_340, %c0_341, %c0_342] : memref<7x8x8xf32, #tpu.memory_space<vmem>>, vector<1x8x8xf32>
    %327 = vector.shape_cast %326 : vector<1x8x8xf32> to vector<8x8xf32>
    %cst_343 = arith.constant dense<0.000000e+00> : vector<32x8xf32>
    %328 = tpu.matmul %298, %327, %cst_343 {dimension_numbers = #tpu.dot_dimension_numbers<[1], [0], [0], [1], [0, 0, 1, 1], [], []>} : vector<32x8xf32>, vector<8x8xf32>, vector<32x8xf32> -> vector<32x8xf32>
    %c4_344 = arith.constant 4 : index
    %c0_345 = arith.constant 0 : index
    %c0_346 = arith.constant 0 : index
    %329 = vector.load %arg17[%c4_344, %c0_345, %c0_346] : memref<7x32x32xf32, #tpu.memory_space<vmem>>, vector<1x32x32xf32>
    %330 = vector.shape_cast %329 : vector<1x32x32xf32> to vector<32x32xf32>
    %cst_347 = arith.constant dense<0.000000e+00> : vector<32x8xf32>
    %331 = tpu.matmul %330, %328, %cst_347 {dimension_numbers = #tpu.dot_dimension_numbers<[1], [0], [0], [1], [0, 0, 1, 1], [], []>} : vector<32x32xf32>, vector<32x8xf32>, vector<32x8xf32> -> vector<32x8xf32>
    %332 = arith.addf %325, %331 : vector<32x8xf32>
    %c5_348 = arith.constant 5 : index
    %c0_349 = arith.constant 0 : index
    %c0_350 = arith.constant 0 : index
    %333 = vector.load %arg19[%c5_348, %c0_349, %c0_350] : memref<7x8x8xf32, #tpu.memory_space<vmem>>, vector<1x8x8xf32>
    %334 = vector.shape_cast %333 : vector<1x8x8xf32> to vector<8x8xf32>
    %cst_351 = arith.constant dense<0.000000e+00> : vector<32x8xf32>
    %335 = tpu.matmul %298, %334, %cst_351 {dimension_numbers = #tpu.dot_dimension_numbers<[1], [0], [0], [1], [0, 0, 1, 1], [], []>} : vector<32x8xf32>, vector<8x8xf32>, vector<32x8xf32> -> vector<32x8xf32>
    %c5_352 = arith.constant 5 : index
    %c0_353 = arith.constant 0 : index
    %c0_354 = arith.constant 0 : index
    %336 = vector.load %arg17[%c5_352, %c0_353, %c0_354] : memref<7x32x32xf32, #tpu.memory_space<vmem>>, vector<1x32x32xf32>
    %337 = vector.shape_cast %336 : vector<1x32x32xf32> to vector<32x32xf32>
    %cst_355 = arith.constant dense<0.000000e+00> : vector<32x8xf32>
    %338 = tpu.matmul %337, %335, %cst_355 {dimension_numbers = #tpu.dot_dimension_numbers<[1], [0], [0], [1], [0, 0, 1, 1], [], []>} : vector<32x32xf32>, vector<32x8xf32>, vector<32x8xf32> -> vector<32x8xf32>
    %339 = arith.addf %332, %338 : vector<32x8xf32>
    %c6_356 = arith.constant 6 : index
    %c0_357 = arith.constant 0 : index
    %c0_358 = arith.constant 0 : index
    %340 = vector.load %arg19[%c6_356, %c0_357, %c0_358] : memref<7x8x8xf32, #tpu.memory_space<vmem>>, vector<1x8x8xf32>
    %341 = vector.shape_cast %340 : vector<1x8x8xf32> to vector<8x8xf32>
    %cst_359 = arith.constant dense<0.000000e+00> : vector<32x8xf32>
    %342 = tpu.matmul %298, %341, %cst_359 {dimension_numbers = #tpu.dot_dimension_numbers<[1], [0], [0], [1], [0, 0, 1, 1], [], []>} : vector<32x8xf32>, vector<8x8xf32>, vector<32x8xf32> -> vector<32x8xf32>
    %c6_360 = arith.constant 6 : index
    %c0_361 = arith.constant 0 : index
    %c0_362 = arith.constant 0 : index
    %343 = vector.load %arg17[%c6_360, %c0_361, %c0_362] : memref<7x32x32xf32, #tpu.memory_space<vmem>>, vector<1x32x32xf32>
    %344 = vector.shape_cast %343 : vector<1x32x32xf32> to vector<32x32xf32>
    %cst_363 = arith.constant dense<0.000000e+00> : vector<32x8xf32>
    %345 = tpu.matmul %344, %342, %cst_363 {dimension_numbers = #tpu.dot_dimension_numbers<[1], [0], [0], [1], [0, 0, 1, 1], [], []>} : vector<32x32xf32>, vector<32x8xf32>, vector<32x8xf32> -> vector<32x8xf32>
    %346 = arith.addf %339, %345 : vector<32x8xf32>
    %c0_364 = arith.constant 0 : index
    %c0_365 = arith.constant 0 : index
    %347 = vector.load %arg18[%c0_364, %c0_365] : memref<32x1xf32, #tpu.memory_space<vmem>>, vector<32x1xf32>
    %348 = vector.broadcast %347 : vector<32x1xf32> to vector<32x8xf32>
    %349 = arith.addf %346, %348 : vector<32x8xf32>
    %cst_366 = arith.constant 0.000000e+00 : f32
    %350 = vector.broadcast %cst_366 : f32 to vector<32x8xf32>
    %351 = arith.cmpf oge, %349, %350 : vector<32x8xf32>
    %cst_367 = arith.constant 0.00999999977 : f32
    %352 = vector.broadcast %cst_367 : f32 to vector<32x8xf32>
    %353 = arith.mulf %352, %349 : vector<32x8xf32>
    %354 = arith.select %351, %349, %353 : vector<32x8xi1>, vector<32x8xf32>
    %c0_368 = arith.constant 0 : index
    %c0_369 = arith.constant 0 : index
    %c0_370 = arith.constant 0 : index
    %355 = vector.load %arg22[%c0_368, %c0_369, %c0_370] : memref<7x8x8xf32, #tpu.memory_space<vmem>>, vector<1x8x8xf32>
    %356 = vector.shape_cast %355 : vector<1x8x8xf32> to vector<8x8xf32>
    %cst_371 = arith.constant dense<0.000000e+00> : vector<32x8xf32>
    %357 = tpu.matmul %354, %356, %cst_371 {dimension_numbers = #tpu.dot_dimension_numbers<[1], [0], [0], [1], [0, 0, 1, 1], [], []>} : vector<32x8xf32>, vector<8x8xf32>, vector<32x8xf32> -> vector<32x8xf32>
    %c0_372 = arith.constant 0 : index
    %c0_373 = arith.constant 0 : index
    %c0_374 = arith.constant 0 : index
    %358 = vector.load %arg20[%c0_372, %c0_373, %c0_374] : memref<7x32x32xf32, #tpu.memory_space<vmem>>, vector<1x32x32xf32>
    %359 = vector.shape_cast %358 : vector<1x32x32xf32> to vector<32x32xf32>
    %cst_375 = arith.constant dense<0.000000e+00> : vector<32x8xf32>
    %360 = tpu.matmul %359, %357, %cst_375 {dimension_numbers = #tpu.dot_dimension_numbers<[1], [0], [0], [1], [0, 0, 1, 1], [], []>} : vector<32x32xf32>, vector<32x8xf32>, vector<32x8xf32> -> vector<32x8xf32>
    %c1_376 = arith.constant 1 : index
    %c0_377 = arith.constant 0 : index
    %c0_378 = arith.constant 0 : index
    %361 = vector.load %arg22[%c1_376, %c0_377, %c0_378] : memref<7x8x8xf32, #tpu.memory_space<vmem>>, vector<1x8x8xf32>
    %362 = vector.shape_cast %361 : vector<1x8x8xf32> to vector<8x8xf32>
    %cst_379 = arith.constant dense<0.000000e+00> : vector<32x8xf32>
    %363 = tpu.matmul %354, %362, %cst_379 {dimension_numbers = #tpu.dot_dimension_numbers<[1], [0], [0], [1], [0, 0, 1, 1], [], []>} : vector<32x8xf32>, vector<8x8xf32>, vector<32x8xf32> -> vector<32x8xf32>
    %c1_380 = arith.constant 1 : index
    %c0_381 = arith.constant 0 : index
    %c0_382 = arith.constant 0 : index
    %364 = vector.load %arg20[%c1_380, %c0_381, %c0_382] : memref<7x32x32xf32, #tpu.memory_space<vmem>>, vector<1x32x32xf32>
    %365 = vector.shape_cast %364 : vector<1x32x32xf32> to vector<32x32xf32>
    %cst_383 = arith.constant dense<0.000000e+00> : vector<32x8xf32>
    %366 = tpu.matmul %365, %363, %cst_383 {dimension_numbers = #tpu.dot_dimension_numbers<[1], [0], [0], [1], [0, 0, 1, 1], [], []>} : vector<32x32xf32>, vector<32x8xf32>, vector<32x8xf32> -> vector<32x8xf32>
    %367 = arith.addf %360, %366 : vector<32x8xf32>
    %c2_384 = arith.constant 2 : index
    %c0_385 = arith.constant 0 : index
    %c0_386 = arith.constant 0 : index
    %368 = vector.load %arg22[%c2_384, %c0_385, %c0_386] : memref<7x8x8xf32, #tpu.memory_space<vmem>>, vector<1x8x8xf32>
    %369 = vector.shape_cast %368 : vector<1x8x8xf32> to vector<8x8xf32>
    %cst_387 = arith.constant dense<0.000000e+00> : vector<32x8xf32>
    %370 = tpu.matmul %354, %369, %cst_387 {dimension_numbers = #tpu.dot_dimension_numbers<[1], [0], [0], [1], [0, 0, 1, 1], [], []>} : vector<32x8xf32>, vector<8x8xf32>, vector<32x8xf32> -> vector<32x8xf32>
    %c2_388 = arith.constant 2 : index
    %c0_389 = arith.constant 0 : index
    %c0_390 = arith.constant 0 : index
    %371 = vector.load %arg20[%c2_388, %c0_389, %c0_390] : memref<7x32x32xf32, #tpu.memory_space<vmem>>, vector<1x32x32xf32>
    %372 = vector.shape_cast %371 : vector<1x32x32xf32> to vector<32x32xf32>
    %cst_391 = arith.constant dense<0.000000e+00> : vector<32x8xf32>
    %373 = tpu.matmul %372, %370, %cst_391 {dimension_numbers = #tpu.dot_dimension_numbers<[1], [0], [0], [1], [0, 0, 1, 1], [], []>} : vector<32x32xf32>, vector<32x8xf32>, vector<32x8xf32> -> vector<32x8xf32>
    %374 = arith.addf %367, %373 : vector<32x8xf32>
    %c3_392 = arith.constant 3 : index
    %c0_393 = arith.constant 0 : index
    %c0_394 = arith.constant 0 : index
    %375 = vector.load %arg22[%c3_392, %c0_393, %c0_394] : memref<7x8x8xf32, #tpu.memory_space<vmem>>, vector<1x8x8xf32>
    %376 = vector.shape_cast %375 : vector<1x8x8xf32> to vector<8x8xf32>
    %cst_395 = arith.constant dense<0.000000e+00> : vector<32x8xf32>
    %377 = tpu.matmul %354, %376, %cst_395 {dimension_numbers = #tpu.dot_dimension_numbers<[1], [0], [0], [1], [0, 0, 1, 1], [], []>} : vector<32x8xf32>, vector<8x8xf32>, vector<32x8xf32> -> vector<32x8xf32>
    %c3_396 = arith.constant 3 : index
    %c0_397 = arith.constant 0 : index
    %c0_398 = arith.constant 0 : index
    %378 = vector.load %arg20[%c3_396, %c0_397, %c0_398] : memref<7x32x32xf32, #tpu.memory_space<vmem>>, vector<1x32x32xf32>
    %379 = vector.shape_cast %378 : vector<1x32x32xf32> to vector<32x32xf32>
    %cst_399 = arith.constant dense<0.000000e+00> : vector<32x8xf32>
    %380 = tpu.matmul %379, %377, %cst_399 {dimension_numbers = #tpu.dot_dimension_numbers<[1], [0], [0], [1], [0, 0, 1, 1], [], []>} : vector<32x32xf32>, vector<32x8xf32>, vector<32x8xf32> -> vector<32x8xf32>
    %381 = arith.addf %374, %380 : vector<32x8xf32>
    %c4_400 = arith.constant 4 : index
    %c0_401 = arith.constant 0 : index
    %c0_402 = arith.constant 0 : index
    %382 = vector.load %arg22[%c4_400, %c0_401, %c0_402] : memref<7x8x8xf32, #tpu.memory_space<vmem>>, vector<1x8x8xf32>
    %383 = vector.shape_cast %382 : vector<1x8x8xf32> to vector<8x8xf32>
    %cst_403 = arith.constant dense<0.000000e+00> : vector<32x8xf32>
    %384 = tpu.matmul %354, %383, %cst_403 {dimension_numbers = #tpu.dot_dimension_numbers<[1], [0], [0], [1], [0, 0, 1, 1], [], []>} : vector<32x8xf32>, vector<8x8xf32>, vector<32x8xf32> -> vector<32x8xf32>
    %c4_404 = arith.constant 4 : index
    %c0_405 = arith.constant 0 : index
    %c0_406 = arith.constant 0 : index
    %385 = vector.load %arg20[%c4_404, %c0_405, %c0_406] : memref<7x32x32xf32, #tpu.memory_space<vmem>>, vector<1x32x32xf32>
    %386 = vector.shape_cast %385 : vector<1x32x32xf32> to vector<32x32xf32>
    %cst_407 = arith.constant dense<0.000000e+00> : vector<32x8xf32>
    %387 = tpu.matmul %386, %384, %cst_407 {dimension_numbers = #tpu.dot_dimension_numbers<[1], [0], [0], [1], [0, 0, 1, 1], [], []>} : vector<32x32xf32>, vector<32x8xf32>, vector<32x8xf32> -> vector<32x8xf32>
    %388 = arith.addf %381, %387 : vector<32x8xf32>
    %c5_408 = arith.constant 5 : index
    %c0_409 = arith.constant 0 : index
    %c0_410 = arith.constant 0 : index
    %389 = vector.load %arg22[%c5_408, %c0_409, %c0_410] : memref<7x8x8xf32, #tpu.memory_space<vmem>>, vector<1x8x8xf32>
    %390 = vector.shape_cast %389 : vector<1x8x8xf32> to vector<8x8xf32>
    %cst_411 = arith.constant dense<0.000000e+00> : vector<32x8xf32>
    %391 = tpu.matmul %354, %390, %cst_411 {dimension_numbers = #tpu.dot_dimension_numbers<[1], [0], [0], [1], [0, 0, 1, 1], [], []>} : vector<32x8xf32>, vector<8x8xf32>, vector<32x8xf32> -> vector<32x8xf32>
    %c5_412 = arith.constant 5 : index
    %c0_413 = arith.constant 0 : index
    %c0_414 = arith.constant 0 : index
    %392 = vector.load %arg20[%c5_412, %c0_413, %c0_414] : memref<7x32x32xf32, #tpu.memory_space<vmem>>, vector<1x32x32xf32>
    %393 = vector.shape_cast %392 : vector<1x32x32xf32> to vector<32x32xf32>
    %cst_415 = arith.constant dense<0.000000e+00> : vector<32x8xf32>
    %394 = tpu.matmul %393, %391, %cst_415 {dimension_numbers = #tpu.dot_dimension_numbers<[1], [0], [0], [1], [0, 0, 1, 1], [], []>} : vector<32x32xf32>, vector<32x8xf32>, vector<32x8xf32> -> vector<32x8xf32>
    %395 = arith.addf %388, %394 : vector<32x8xf32>
    %c6_416 = arith.constant 6 : index
    %c0_417 = arith.constant 0 : index
    %c0_418 = arith.constant 0 : index
    %396 = vector.load %arg22[%c6_416, %c0_417, %c0_418] : memref<7x8x8xf32, #tpu.memory_space<vmem>>, vector<1x8x8xf32>
    %397 = vector.shape_cast %396 : vector<1x8x8xf32> to vector<8x8xf32>
    %cst_419 = arith.constant dense<0.000000e+00> : vector<32x8xf32>
    %398 = tpu.matmul %354, %397, %cst_419 {dimension_numbers = #tpu.dot_dimension_numbers<[1], [0], [0], [1], [0, 0, 1, 1], [], []>} : vector<32x8xf32>, vector<8x8xf32>, vector<32x8xf32> -> vector<32x8xf32>
    %c6_420 = arith.constant 6 : index
    %c0_421 = arith.constant 0 : index
    %c0_422 = arith.constant 0 : index
    %399 = vector.load %arg20[%c6_420, %c0_421, %c0_422] : memref<7x32x32xf32, #tpu.memory_space<vmem>>, vector<1x32x32xf32>
    %400 = vector.shape_cast %399 : vector<1x32x32xf32> to vector<32x32xf32>
    %cst_423 = arith.constant dense<0.000000e+00> : vector<32x8xf32>
    %401 = tpu.matmul %400, %398, %cst_423 {dimension_numbers = #tpu.dot_dimension_numbers<[1], [0], [0], [1], [0, 0, 1, 1], [], []>} : vector<32x32xf32>, vector<32x8xf32>, vector<32x8xf32> -> vector<32x8xf32>
    %402 = arith.addf %395, %401 : vector<32x8xf32>
    %c0_424 = arith.constant 0 : index
    %c0_425 = arith.constant 0 : index
    %403 = vector.load %arg21[%c0_424, %c0_425] : memref<32x1xf32, #tpu.memory_space<vmem>>, vector<32x1xf32>
    %404 = vector.broadcast %403 : vector<32x1xf32> to vector<32x8xf32>
    %405 = arith.addf %402, %404 : vector<32x8xf32>
    %406 = arith.addf %293, %405 : vector<32x8xf32>
    %cst_426 = arith.constant 0.000000e+00 : f32
    %407 = vector.broadcast %cst_426 : f32 to vector<32x8xf32>
    %408 = arith.cmpf oge, %406, %407 : vector<32x8xf32>
    %cst_427 = arith.constant 0.00999999977 : f32
    %409 = vector.broadcast %cst_427 : f32 to vector<32x8xf32>
    %410 = arith.mulf %409, %406 : vector<32x8xf32>
    %411 = arith.select %408, %406, %410 : vector<32x8xi1>, vector<32x8xf32>
    %cst_428 = arith.constant 0.000000e+00 : f32
    %412 = vector.broadcast %cst_428 : f32 to vector<32x8xf32>
    %413 = arith.cmpf oge, %411, %412 : vector<32x8xf32>
    %cst_429 = arith.constant 0.00999999977 : f32
    %414 = vector.broadcast %cst_429 : f32 to vector<32x8xf32>
    %415 = arith.mulf %414, %411 : vector<32x8xf32>
    %416 = arith.select %413, %411, %415 : vector<32x8xi1>, vector<32x8xf32>
    %c0_430 = arith.constant 0 : index
    %c0_431 = arith.constant 0 : index
    %c0_432 = arith.constant 0 : index
    %417 = vector.load %arg25[%c0_430, %c0_431, %c0_432] : memref<7x8x4xf32, #tpu.memory_space<vmem>>, vector<1x8x4xf32>
    %418 = vector.shape_cast %417 : vector<1x8x4xf32> to vector<8x4xf32>
    %cst_433 = arith.constant dense<0.000000e+00> : vector<32x4xf32>
    %419 = tpu.matmul %416, %418, %cst_433 {dimension_numbers = #tpu.dot_dimension_numbers<[1], [0], [0], [1], [0, 0, 1, 1], [], []>} : vector<32x8xf32>, vector<8x4xf32>, vector<32x4xf32> -> vector<32x4xf32>
    %c0_434 = arith.constant 0 : index
    %c0_435 = arith.constant 0 : index
    %c0_436 = arith.constant 0 : index
    %420 = vector.load %arg23[%c0_434, %c0_435, %c0_436] : memref<7x32x32xf32, #tpu.memory_space<vmem>>, vector<1x32x32xf32>
    %421 = vector.shape_cast %420 : vector<1x32x32xf32> to vector<32x32xf32>
    %cst_437 = arith.constant dense<0.000000e+00> : vector<32x4xf32>
    %422 = tpu.matmul %421, %419, %cst_437 {dimension_numbers = #tpu.dot_dimension_numbers<[1], [0], [0], [1], [0, 0, 1, 1], [], []>} : vector<32x32xf32>, vector<32x4xf32>, vector<32x4xf32> -> vector<32x4xf32>
    %c1_438 = arith.constant 1 : index
    %c0_439 = arith.constant 0 : index
    %c0_440 = arith.constant 0 : index
    %423 = vector.load %arg25[%c1_438, %c0_439, %c0_440] : memref<7x8x4xf32, #tpu.memory_space<vmem>>, vector<1x8x4xf32>
    %424 = vector.shape_cast %423 : vector<1x8x4xf32> to vector<8x4xf32>
    %cst_441 = arith.constant dense<0.000000e+00> : vector<32x4xf32>
    %425 = tpu.matmul %416, %424, %cst_441 {dimension_numbers = #tpu.dot_dimension_numbers<[1], [0], [0], [1], [0, 0, 1, 1], [], []>} : vector<32x8xf32>, vector<8x4xf32>, vector<32x4xf32> -> vector<32x4xf32>
    %c1_442 = arith.constant 1 : index
    %c0_443 = arith.constant 0 : index
    %c0_444 = arith.constant 0 : index
    %426 = vector.load %arg23[%c1_442, %c0_443, %c0_444] : memref<7x32x32xf32, #tpu.memory_space<vmem>>, vector<1x32x32xf32>
    %427 = vector.shape_cast %426 : vector<1x32x32xf32> to vector<32x32xf32>
    %cst_445 = arith.constant dense<0.000000e+00> : vector<32x4xf32>
    %428 = tpu.matmul %427, %425, %cst_445 {dimension_numbers = #tpu.dot_dimension_numbers<[1], [0], [0], [1], [0, 0, 1, 1], [], []>} : vector<32x32xf32>, vector<32x4xf32>, vector<32x4xf32> -> vector<32x4xf32>
    %429 = arith.addf %422, %428 : vector<32x4xf32>
    %c2_446 = arith.constant 2 : index
    %c0_447 = arith.constant 0 : index
    %c0_448 = arith.constant 0 : index
    %430 = vector.load %arg25[%c2_446, %c0_447, %c0_448] : memref<7x8x4xf32, #tpu.memory_space<vmem>>, vector<1x8x4xf32>
    %431 = vector.shape_cast %430 : vector<1x8x4xf32> to vector<8x4xf32>
    %cst_449 = arith.constant dense<0.000000e+00> : vector<32x4xf32>
    %432 = tpu.matmul %416, %431, %cst_449 {dimension_numbers = #tpu.dot_dimension_numbers<[1], [0], [0], [1], [0, 0, 1, 1], [], []>} : vector<32x8xf32>, vector<8x4xf32>, vector<32x4xf32> -> vector<32x4xf32>
    %c2_450 = arith.constant 2 : index
    %c0_451 = arith.constant 0 : index
    %c0_452 = arith.constant 0 : index
    %433 = vector.load %arg23[%c2_450, %c0_451, %c0_452] : memref<7x32x32xf32, #tpu.memory_space<vmem>>, vector<1x32x32xf32>
    %434 = vector.shape_cast %433 : vector<1x32x32xf32> to vector<32x32xf32>
    %cst_453 = arith.constant dense<0.000000e+00> : vector<32x4xf32>
    %435 = tpu.matmul %434, %432, %cst_453 {dimension_numbers = #tpu.dot_dimension_numbers<[1], [0], [0], [1], [0, 0, 1, 1], [], []>} : vector<32x32xf32>, vector<32x4xf32>, vector<32x4xf32> -> vector<32x4xf32>
    %436 = arith.addf %429, %435 : vector<32x4xf32>
    %c3_454 = arith.constant 3 : index
    %c0_455 = arith.constant 0 : index
    %c0_456 = arith.constant 0 : index
    %437 = vector.load %arg25[%c3_454, %c0_455, %c0_456] : memref<7x8x4xf32, #tpu.memory_space<vmem>>, vector<1x8x4xf32>
    %438 = vector.shape_cast %437 : vector<1x8x4xf32> to vector<8x4xf32>
    %cst_457 = arith.constant dense<0.000000e+00> : vector<32x4xf32>
    %439 = tpu.matmul %416, %438, %cst_457 {dimension_numbers = #tpu.dot_dimension_numbers<[1], [0], [0], [1], [0, 0, 1, 1], [], []>} : vector<32x8xf32>, vector<8x4xf32>, vector<32x4xf32> -> vector<32x4xf32>
    %c3_458 = arith.constant 3 : index
    %c0_459 = arith.constant 0 : index
    %c0_460 = arith.constant 0 : index
    %440 = vector.load %arg23[%c3_458, %c0_459, %c0_460] : memref<7x32x32xf32, #tpu.memory_space<vmem>>, vector<1x32x32xf32>
    %441 = vector.shape_cast %440 : vector<1x32x32xf32> to vector<32x32xf32>
    %cst_461 = arith.constant dense<0.000000e+00> : vector<32x4xf32>
    %442 = tpu.matmul %441, %439, %cst_461 {dimension_numbers = #tpu.dot_dimension_numbers<[1], [0], [0], [1], [0, 0, 1, 1], [], []>} : vector<32x32xf32>, vector<32x4xf32>, vector<32x4xf32> -> vector<32x4xf32>
    %443 = arith.addf %436, %442 : vector<32x4xf32>
    %c4_462 = arith.constant 4 : index
    %c0_463 = arith.constant 0 : index
    %c0_464 = arith.constant 0 : index
    %444 = vector.load %arg25[%c4_462, %c0_463, %c0_464] : memref<7x8x4xf32, #tpu.memory_space<vmem>>, vector<1x8x4xf32>
    %445 = vector.shape_cast %444 : vector<1x8x4xf32> to vector<8x4xf32>
    %cst_465 = arith.constant dense<0.000000e+00> : vector<32x4xf32>
    %446 = tpu.matmul %416, %445, %cst_465 {dimension_numbers = #tpu.dot_dimension_numbers<[1], [0], [0], [1], [0, 0, 1, 1], [], []>} : vector<32x8xf32>, vector<8x4xf32>, vector<32x4xf32> -> vector<32x4xf32>
    %c4_466 = arith.constant 4 : index
    %c0_467 = arith.constant 0 : index
    %c0_468 = arith.constant 0 : index
    %447 = vector.load %arg23[%c4_466, %c0_467, %c0_468] : memref<7x32x32xf32, #tpu.memory_space<vmem>>, vector<1x32x32xf32>
    %448 = vector.shape_cast %447 : vector<1x32x32xf32> to vector<32x32xf32>
    %cst_469 = arith.constant dense<0.000000e+00> : vector<32x4xf32>
    %449 = tpu.matmul %448, %446, %cst_469 {dimension_numbers = #tpu.dot_dimension_numbers<[1], [0], [0], [1], [0, 0, 1, 1], [], []>} : vector<32x32xf32>, vector<32x4xf32>, vector<32x4xf32> -> vector<32x4xf32>
    %450 = arith.addf %443, %449 : vector<32x4xf32>
    %c5_470 = arith.constant 5 : index
    %c0_471 = arith.constant 0 : index
    %c0_472 = arith.constant 0 : index
    %451 = vector.load %arg25[%c5_470, %c0_471, %c0_472] : memref<7x8x4xf32, #tpu.memory_space<vmem>>, vector<1x8x4xf32>
    %452 = vector.shape_cast %451 : vector<1x8x4xf32> to vector<8x4xf32>
    %cst_473 = arith.constant dense<0.000000e+00> : vector<32x4xf32>
    %453 = tpu.matmul %416, %452, %cst_473 {dimension_numbers = #tpu.dot_dimension_numbers<[1], [0], [0], [1], [0, 0, 1, 1], [], []>} : vector<32x8xf32>, vector<8x4xf32>, vector<32x4xf32> -> vector<32x4xf32>
    %c5_474 = arith.constant 5 : index
    %c0_475 = arith.constant 0 : index
    %c0_476 = arith.constant 0 : index
    %454 = vector.load %arg23[%c5_474, %c0_475, %c0_476] : memref<7x32x32xf32, #tpu.memory_space<vmem>>, vector<1x32x32xf32>
    %455 = vector.shape_cast %454 : vector<1x32x32xf32> to vector<32x32xf32>
    %cst_477 = arith.constant dense<0.000000e+00> : vector<32x4xf32>
    %456 = tpu.matmul %455, %453, %cst_477 {dimension_numbers = #tpu.dot_dimension_numbers<[1], [0], [0], [1], [0, 0, 1, 1], [], []>} : vector<32x32xf32>, vector<32x4xf32>, vector<32x4xf32> -> vector<32x4xf32>
    %457 = arith.addf %450, %456 : vector<32x4xf32>
    %c6_478 = arith.constant 6 : index
    %c0_479 = arith.constant 0 : index
    %c0_480 = arith.constant 0 : index
    %458 = vector.load %arg25[%c6_478, %c0_479, %c0_480] : memref<7x8x4xf32, #tpu.memory_space<vmem>>, vector<1x8x4xf32>
    %459 = vector.shape_cast %458 : vector<1x8x4xf32> to vector<8x4xf32>
    %cst_481 = arith.constant dense<0.000000e+00> : vector<32x4xf32>
    %460 = tpu.matmul %416, %459, %cst_481 {dimension_numbers = #tpu.dot_dimension_numbers<[1], [0], [0], [1], [0, 0, 1, 1], [], []>} : vector<32x8xf32>, vector<8x4xf32>, vector<32x4xf32> -> vector<32x4xf32>
    %c6_482 = arith.constant 6 : index
    %c0_483 = arith.constant 0 : index
    %c0_484 = arith.constant 0 : index
    %461 = vector.load %arg23[%c6_482, %c0_483, %c0_484] : memref<7x32x32xf32, #tpu.memory_space<vmem>>, vector<1x32x32xf32>
    %462 = vector.shape_cast %461 : vector<1x32x32xf32> to vector<32x32xf32>
    %cst_485 = arith.constant dense<0.000000e+00> : vector<32x4xf32>
    %463 = tpu.matmul %462, %460, %cst_485 {dimension_numbers = #tpu.dot_dimension_numbers<[1], [0], [0], [1], [0, 0, 1, 1], [], []>} : vector<32x32xf32>, vector<32x4xf32>, vector<32x4xf32> -> vector<32x4xf32>
    %464 = arith.addf %457, %463 : vector<32x4xf32>
    %c0_486 = arith.constant 0 : index
    %c0_487 = arith.constant 0 : index
    %465 = vector.load %arg24[%c0_486, %c0_487] : memref<32x1xf32, #tpu.memory_space<vmem>>, vector<32x1xf32>
    %466 = vector.broadcast %465 : vector<32x1xf32> to vector<32x4xf32>
    %467 = arith.addf %464, %466 : vector<32x4xf32>
    %cst_488 = arith.constant 0.000000e+00 : f32
    %468 = vector.broadcast %cst_488 : f32 to vector<32x4xf32>
    %469 = arith.cmpf oge, %467, %468 : vector<32x4xf32>
    %cst_489 = arith.constant 0.00999999977 : f32
    %470 = vector.broadcast %cst_489 : f32 to vector<32x4xf32>
    %471 = arith.mulf %470, %467 : vector<32x4xf32>
    %472 = arith.select %469, %467, %471 : vector<32x4xi1>, vector<32x4xf32>
    %c0_490 = arith.constant 0 : index
    %c0_491 = arith.constant 0 : index
    %473 = vector.load %arg26[%c0_490, %c0_491] : memref<32x4xf32, #tpu.memory_space<vmem>>, vector<32x4xf32>
    %474 = arith.mulf %472, %473 : vector<32x4xf32>
    %cst_492 = arith.constant dense<0.000000e+00> : vector<4xf32>
    %475 = vector.multi_reduction <add>, %474, %cst_492 [0] : vector<32x4xf32> to vector<4xf32>
    %476 = vector.shape_cast %475 : vector<4xf32> to vector<1x4xf32>
    %c0_493 = arith.constant 0 : index
    %c0_494 = arith.constant 0 : index
    %477 = vector.load %arg28[%c0_493, %c0_494] : memref<4x2xf32, #tpu.memory_space<vmem>>, vector<4x2xf32>
    %cst_495 = arith.constant dense<0.000000e+00> : vector<1x2xf32>
    %478 = tpu.matmul %476, %477, %cst_495 {dimension_numbers = #tpu.dot_dimension_numbers<[1], [0], [0], [1], [0, 0, 1, 1], [], []>} : vector<1x4xf32>, vector<4x2xf32>, vector<1x2xf32> -> vector<1x2xf32>
    %c0_496 = arith.constant 0 : index
    %c0_497 = arith.constant 0 : index
    %479 = vector.load %arg27[%c0_496, %c0_497] : memref<1x1xf32, #tpu.memory_space<vmem>>, vector<1x1xf32>
    %480 = vector.broadcast %479 : vector<1x1xf32> to vector<1x2xf32>
    %481 = arith.addf %478, %480 : vector<1x2xf32>
    %c0_498 = arith.constant 0 : index
    %c0_499 = arith.constant 0 : index
    %482 = vector.load %arg29[%c0_498, %c0_499] : memref<1x2xf32, #tpu.memory_space<vmem>>, vector<1x2xf32>
    tpu.vector_store %arg29[%c0_498, %c0_499], %481 {strides = array<i32>} : memref<1x2xf32, #tpu.memory_space<vmem>>, vector<1x2xf32>,
    return
  }
}

</mosaic_0001>

<bundles_post_ra>
// kernel: discriminator_forward.1
= control target key start
LH: loop header
LB: loop body
LE: loop exit
PB: predicated region body
PF: predicated region fallthrough
CT: control target
= control target key end

     0   :  { %s14948_s6 = smov 1   ;;  %s14949_s10 = smov 2   ;;  %s16250_s0 = inlined_call_operand.smem [shape: u32[30], index: -1, kind: input, shape index: {}] }
   0x1   :  { %s15002_s5 = sld [smem:[%s16250_s0]]   ;;  %s14950_s14 = smov 3  }
   0x2   :  { %s15007_s9 = sld [smem:[%s16250_s0 + %s14948_s6]]   ;;  %s14951_s18 = smov 4  }
   0x3   :  { %s15012_s13 = sld [smem:[%s16250_s0 + %s14949_s10]]   ;;  %s14952_s22 = smov 5  }
   0x4   :  { %s15017_s17 = sld [smem:[%s16250_s0 + %s14950_s14]]   ;;  %s14953_s26 = smov 6  }
   0x5   :  { %s15022_s21 = sld [smem:[%s16250_s0 + %s14951_s18]]   ;;  %s14954_s30 = smov 7  }
   0x6   :  { %s15027_s25 = sld [smem:[%s16250_s0 + %s14952_s22]]   ;;  %s14955_s4 = smov 8  }
   0x7   :  { %s15032_s29 = sld [smem:[%s16250_s0 + %s14953_s26]]   ;;  %s14956_s10 = smov 9  }
   0x8   :  { %s15037_s3 = sld [smem:[%s16250_s0 + %s14954_s30]]   ;;  %s14957_s15 = smov 10  }
   0x9   :  { %16263 = sst [smem:[#allocation29_spill]] %s15012_s13  ;;  %s14958_s20 = smov 11  }
   0xa   :  { %s15042_s8 = sld [smem:[%s16250_s0 + %s14955_s4]]   ;;  %s14959_s26 = smov 12  }
   0xb   :  { %s15047_s14 = sld [smem:[%s16250_s0 + %s14956_s10]]   ;;  %s14960_s1 = smov 13  }
   0xc   :  { %16264 = sst [smem:[#allocation30_spill]] %s15027_s25  ;;  %s14961_s7 = smov 14  }
   0xd   :  { %16265 = sst [smem:[#allocation31_spill]] %s15032_s29  ;;  %s14963_s22 = smov 16  }
   0xe   :  { %16266 = sst [smem:[#allocation32_spill]] %s15037_s3  ;;  %s14964_s28 = smov 17  }
   0xf   :  { %s15052_s19 = sld [smem:[%s16250_s0 + %s14957_s15]]   ;;  %s14962_s15 = smov 15  }
  0x10   :  { %16267 = sst [smem:[#allocation33_spill]] %s15042_s8  ;;  %s14975_s23 = smov 28  }
  0x11   :  { %s15057_s24 = sld [smem:[%s16250_s0 + %s14958_s20]]  }
  0x12   :  { %s15062_s30 = sld [smem:[%s16250_s0 + %s14959_s26]]  }
  0x13   :  { %s15067_s6 = sld [smem:[%s16250_s0 + %s14960_s1]]   ;;  %s14976_s1 = smov 29  }
  0x14   :  { %s15072_s12 = sld [smem:[%s16250_s0 + %s14961_s7]]   ;;  %s14965_s7 = smov 18  }
  0x15   :  { %16268 = sst [smem:[#allocation34_spill]] %s15052_s19 }
  0x16   :  { %s15077_s20 = sld [smem:[%s16250_s0 + %s14962_s15]]   ;;  %s14966_s15 = smov 19  }
  0x17   :  { %16269 = sst [smem:[#allocation35_spill]] %s15057_s24 }
  0x18   :  { %s15082_s27 = sld [smem:[%s16250_s0 + %s14963_s22]]   ;;  %s14967_s22 = smov 20  }
  0x19   :  { %16270 = sst [smem:[#allocation36_spill]] %s15067_s6 }
  0x1a   :  { %s15087_s4 = sld [smem:[%s16250_s0 + %s14964_s28]]   ;;  %s14968_s28 = smov 21  }
  0x1b   :  { %s15092_s24 = sld [smem:[%s16250_s0 + %s14965_s7]]   ;;  %s14969_s7 = smov 22  }
  0x1c   :  { %s15097_s29 = sld [smem:[%s16250_s0 + %s14966_s15]]   ;;  %s14970_s15 = smov 23  }
  0x1d   :  { %s15102_s8 = sld [smem:[%s16250_s0 + %s14967_s22]]   ;;  %s14971_s22 = smov 24  }
  0x1e   :  { %16271 = sst [smem:[#allocation37_spill]] %s15082_s27 }
  0x1f   :  { %s15107_s27 = sld [smem:[%s16250_s0 + %s14968_s28]]   ;;  %s14972_s28 = smov 25  }
  0x20   :  { %s15117_s6 = sld [smem:[%s16250_s0 + %s14970_s15]]   ;;  %s14974_s15 = smov 27  }
  0x21   :  { %16272 = sst [smem:[#allocation38_spill]] %s15092_s24 }
  0x22   :  { %s15112_s24 = sld [smem:[%s16250_s0 + %s14969_s7]]   ;;  %s14973_s7 = smov 26  }
  0x23   :  { %s15122_s19 = sld [smem:[%s16250_s0 + %s14971_s22]]  }
  0x24   :  { %s15132_s25 = sld [smem:[%s16250_s0 + %s14973_s7]]  }
  0x25   :  { %16273 = sst [smem:[#allocation39_spill]] %s15107_s27 }
  0x26   :  { %s15127_s27 = sld [smem:[%s16250_s0 + %s14972_s28]]  }
  0x27   :  { %s11972_s3 = sld [smem:[%s16250_s0 + %s14974_s15]]  }
  0x28   :  { %s15145_s13 = sld [smem:[%s16250_s0 + %s14976_s1]]  }
  0x29   :  { %16274 = sst [smem:[#allocation40_spill]] %s15122_s19 }
  0x2a   :  { %s15140_s19 = sld [smem:[%s16250_s0 + %s14975_s23]]  }
  0x2d   :  { %v64_v0 = vstv %s11972_s3 }
  0x2e   :  { %65 = vst [vmem:[#allocation2] sm:$0x1] %v64_v0 }
  0x2f   :  { %66 = vsyncpa [#allocation4], 0 }
  0x30   :  { %67 = vsyncpa [#allocation7], 0 }
  0x31   :  { %68 = vsyncpa [#allocation10], 0 }
  0x32   :  { %69 = vsyncpa [#allocation13], 0 }
  0x33   :  { %70 = vsyncpa [#allocation16], 0 }
  0x34   :  { %71 = vsyncpa [#allocation19], 0 }
  0x35   :  { %72 = vsyncpa [#allocation5], 0  ;;  %s14977_s7 = smov [#allocation6]   ;;  %s14978_s11 = smov [#allocation9]  }
  0x36   :  { %s106_s10 = sshll.u32 %s14977_s7, 4  ;;  %s136_s15 = sshll.u32 %s14978_s11, 4  ;;  %s107_s10 = int_to_ptr.vmem [resolvable:$true] %s106_s10  ;;  %s137_s15 = int_to_ptr.vmem [resolvable:$true] %s136_s15 }
  0x37   :  { %s14702_s16 = scalar_lea.vmem %s107_s10, 5632  ;;  %p14707_p1 = scmp.lt.s32.totalorder %s107_s10, %s107_s10 }
  0x38   :  { %p14703_p0 = scmp.ne.s32.totalorder %s107_s10, %s14702_s16  ;;  %p14708_p2 = scmp.lt.s32.totalorder %s14702_s16, %s14702_s16 }
  0x3a   :  { %p14709_p3 = por %p14708_p2, %p14707_p1 }
  0x3c   :  { %p14710_p4 = pnand %p14709_p3, %p14703_p0 }
  0x3e   :  { %14713 = shalt.err (!%p14710_p4)
}
  0x3f   :  { %s14979_s0 = smov 128   ;;  %s14980_s3 = smov 8  }
  0x40   :  { %112 = dma.hbm_to_vmem [thread:$0]  %s15047_s14, 5632, %s107_s10, [#allocation7], %s14979_s0, %s14979_s0, %s14980_s3  }
  0x41   :  { %s14722_s18 = scalar_lea.vmem %s137_s15, 1792  ;;  %p14727_p6 = scmp.lt.s32.totalorder %s137_s15, %s137_s15 }
  0x42   :  { %p14723_p5 = scmp.ne.s32.totalorder %s137_s15, %s14722_s18  ;;  %p14728_p7 = scmp.lt.s32.totalorder %s14722_s18, %s14722_s18 }
  0x44   :  { %p14729_p8 = por %p14728_p7, %p14727_p6 }
  0x46   :  { %p14730_p9 = pnand %p14729_p8, %p14723_p5 }
  0x48   :  { %14733 = shalt.err (!%p14730_p9)
}
  0x49   :  { %142 = dma.hbm_to_vmem [thread:$0]  %s15072_s12, 1792, %s137_s15, [#allocation10], %s14979_s0, %s14979_s0, %s14980_s3  }
  0x4a   :  { %s14981_s23 = smov [#allocation12]   ;;  %s14982_s26 = smov [#allocation15]  }
  0x4b   :  { %s162_s22 = sshll.u32 %s14981_s23, 4  ;;  %s188_s1 = sshll.u32 %s14982_s26, 4  ;;  %s163_s22 = int_to_ptr.vmem [resolvable:$true] %s162_s22  ;;  %s189_s1 = int_to_ptr.vmem [resolvable:$true] %s188_s1 }
  0x4c   :  { %s14742_s28 = scalar_lea.vmem %s163_s22, 3584  ;;  %p14747_p11 = scmp.lt.s32.totalorder %s163_s22, %s163_s22 }
  0x4d   :  { %p14743_p10 = scmp.ne.s32.totalorder %s163_s22, %s14742_s28  ;;  %p14748_p12 = scmp.lt.s32.totalorder %s14742_s28, %s14742_s28 }
  0x4f   :  { %p14749_p13 = por %p14748_p12, %p14747_p11 }
  0x51   :  { %p14750_p0 = pnand %p14749_p13, %p14743_p10 }
  0x53   :  { %14753 = shalt.err (!%p14750_p0)
}
  0x54   :  { %168 = dma.hbm_to_vmem [thread:$0]  %s15087_s4, 3584, %s163_s22, [#allocation13], %s14979_s0, %s14979_s0, %s14980_s3  }
  0x55   :  { %s14762_s14 = scalar_lea.vmem %s189_s1, 3584  ;;  %p14767_p2 = scmp.lt.s32.totalorder %s189_s1, %s189_s1 }
  0x56   :  { %p14763_p1 = scmp.ne.s32.totalorder %s189_s1, %s14762_s14  ;;  %p14768_p3 = scmp.lt.s32.totalorder %s14762_s14, %s14762_s14 }
  0x58   :  { %p14769_p4 = por %p14768_p3, %p14767_p2 }
  0x5a   :  { %p14770_p5 = pnand %p14769_p4, %p14763_p1 }
  0x5c   :  { %14773 = shalt.err (!%p14770_p5)
}
  0x5d   :  { %194 = dma.hbm_to_vmem [thread:$0]  %s15102_s8, 3584, %s189_s1, [#allocation16], %s14979_s0, %s14979_s0, %s14980_s3  }
  0x5e   :  { %s14983_s12 = smov [#allocation18]   ;;  %s14984_s7 = smov [#allocation3]  }
  0x5f   :  { %s214_s2 = sshll.u32 %s14983_s12, 4  ;;  %s86_s10 = sshll.u32 %s14984_s7, 4  ;;  %s215_s2 = int_to_ptr.vmem [resolvable:$true] %s214_s2  ;;  %s87_s10 = int_to_ptr.vmem [resolvable:$true] %s86_s10 }
  0x60   :  { %s14782_s11 = scalar_lea.vmem %s215_s2, 3584  ;;  %p14787_p7 = scmp.lt.s32.totalorder %s215_s2, %s215_s2 }
  0x61   :  { %p14783_p6 = scmp.ne.s32.totalorder %s215_s2, %s14782_s11  ;;  %p14788_p8 = scmp.lt.s32.totalorder %s14782_s11, %s14782_s11 }
  0x63   :  { %p14789_p9 = por %p14788_p8, %p14787_p7 }
  0x65   :  { %p14790_p10 = pnand %p14789_p9, %p14783_p6 }
  0x67   :  { %14793 = shalt.err (!%p14790_p10)
}
  0x68   :  { %220 = dma.hbm_to_vmem [thread:$0]  %s15117_s6, 3584, %s215_s2, [#allocation19], %s14979_s0, %s14979_s0, %s14980_s3  }
  0x69   :  { %s14802_s4 = scalar_lea.vmem %s87_s10, 512  ;;  %p14807_p12 = scmp.lt.s32.totalorder %s87_s10, %s87_s10 }
  0x6a   :  { %p14803_p11 = scmp.ne.s32.totalorder %s87_s10, %s14802_s4  ;;  %p14808_p13 = scmp.lt.s32.totalorder %s14802_s4, %s14802_s4 }
  0x6c   :  { %p14809_p0 = por %p14808_p13, %p14807_p12 }
  0x6e   :  { %p14810_p1 = pnand %p14809_p0, %p14803_p11 }
  0x70   :  { %14813 = shalt.err (!%p14810_p1)
}
  0x71   :  { %92 = dma.hbm_to_vmem [thread:$0]  %s15022_s21, 512, %s87_s10, [#allocation4], %s14979_s0, %s14979_s0, %s14980_s3  }
  0x72   :  { %s14985_s8 = smov [#allocation8]   ;;  %s14986_s16 = smov [#allocation11]  }
  0x73   :  { %s122_s15 = sshll.u32 %s14985_s8, 4  ;;  %s148_s18 = sshll.u32 %s14986_s16, 4  ;;  %s123_s15 = int_to_ptr.vmem [resolvable:$true] %s122_s15  ;;  %s149_s18 = int_to_ptr.vmem [resolvable:$true] %s148_s18 }
  0x74   :  { %s14822_s23 = scalar_lea.vmem %s123_s15, 3584  ;;  %p14827_p3 = scmp.lt.s32.totalorder %s123_s15, %s123_s15 }
  0x75   :  { %p14823_p2 = scmp.ne.s32.totalorder %s123_s15, %s14822_s23  ;;  %p14828_p4 = scmp.lt.s32.totalorder %s14822_s23, %s14822_s23 }
  0x77   :  { %p14829_p5 = por %p14828_p4, %p14827_p3 }
  0x79   :  { %p14830_p6 = pnand %p14829_p5, %p14823_p2 }
  0x7b   :  { %14833 = shalt.err (!%p14830_p6)
}
  0x7c   :  { %128 = dma.hbm_to_vmem [thread:$0]  %s15062_s30, 3584, %s123_s15, [#allocation7], %s14979_s0, %s14979_s0, %s14980_s3  }
  0x7d   :  { %s14842_s6 = scalar_lea.vmem %s149_s18, 512  ;;  %p14847_p8 = scmp.lt.s32.totalorder %s149_s18, %s149_s18 }
  0x7e   :  { %p14843_p7 = scmp.ne.s32.totalorder %s149_s18, %s14842_s6  ;;  %p14848_p9 = scmp.lt.s32.totalorder %s14842_s6, %s14842_s6 }
  0x80   :  { %p14849_p10 = por %p14848_p9, %p14847_p8 }
  0x82   :  { %p14850_p11 = pnand %p14849_p10, %p14843_p7 }
  0x84   :  { %14853 = shalt.err (!%p14850_p11)
}
  0x85   :  { %154 = dma.hbm_to_vmem [thread:$0]  %s15077_s20, 512, %s149_s18, [#allocation10], %s14979_s0, %s14979_s0, %s14980_s3  }
  0x86   :  { %s14987_s21 = smov [#allocation14]   ;;  %s14988_s26 = smov [#allocation17]  }
  0x87   :  { %s176_s22 = sshll.u32 %s14987_s21, 4  ;;  %s202_s1 = sshll.u32 %s14988_s26, 4  ;;  %s177_s22 = int_to_ptr.vmem [resolvable:$true] %s176_s22  ;;  %s203_s1 = int_to_ptr.vmem [resolvable:$true] %s202_s1 }
  0x88   :  { %s14862_s28 = scalar_lea.vmem %s177_s22, 896  ;;  %p14867_p13 = scmp.lt.s32.totalorder %s177_s22, %s177_s22 }
  0x89   :  { %p14863_p12 = scmp.ne.s32.totalorder %s177_s22, %s14862_s28  ;;  %p14868_p0 = scmp.lt.s32.totalorder %s14862_s28, %s14862_s28 }
  0x8b   :  { %p14869_p1 = por %p14868_p0, %p14867_p13 }
  0x8d   :  { %p14870_p2 = pnand %p14869_p1, %p14863_p12 }
  0x8f   :  { %14873 = shalt.err (!%p14870_p2)
}
  0x90   :  { %182 = dma.hbm_to_vmem [thread:$0]  %s15097_s29, 896, %s177_s22, [#allocation13], %s14979_s0, %s14979_s0, %s14980_s3  }
  0x91   :  { %s14882_s30 = scalar_lea.vmem %s203_s1, 896  ;;  %p14887_p4 = scmp.lt.s32.totalorder %s203_s1, %s203_s1 }
  0x92   :  { %p14883_p3 = scmp.ne.s32.totalorder %s203_s1, %s14882_s30  ;;  %p14888_p5 = scmp.lt.s32.totalorder %s14882_s30, %s14882_s30 }
  0x94   :  { %p14889_p6 = por %p14888_p5, %p14887_p4 }
  0x96   :  { %p14890_p7 = pnand %p14889_p6, %p14883_p3 }
  0x98   :  { %14893 = shalt.err (!%p14890_p7)
}
  0x99   :  { %208 = dma.hbm_to_vmem [thread:$0]  %s15112_s24, 896, %s203_s1, [#allocation16], %s14979_s0, %s14979_s0, %s14980_s3  }
  0x9a   :  { %s14989_s20 = smov [#allocation20]  }
  0x9b   :  { %s228_s14 = sshll.u32 %s14989_s20, 4  ;;  %s229_s14 = int_to_ptr.vmem [resolvable:$true] %s228_s14 }
  0x9c   :  { %s14902_s12 = scalar_lea.vmem %s229_s14, 896  ;;  %p14907_p9 = scmp.lt.s32.totalorder %s229_s14, %s229_s14 }
  0x9d   :  { %p14903_p8 = scmp.ne.s32.totalorder %s229_s14, %s14902_s12  ;;  %p14908_p10 = scmp.lt.s32.totalorder %s14902_s12, %s14902_s12 }
  0x9f   :  { %p14909_p11 = por %p14908_p10, %p14907_p9 }
  0xa1   :  { %p14910_p12 = pnand %p14909_p11, %p14903_p8 }
  0xa3   :  { %14913 = shalt.err (!%p14910_p12)
}
  0xa4   :  { %234 = dma.hbm_to_vmem [thread:$0]  %s15127_s27, 896, %s229_s14, [#allocation19], %s14979_s0, %s14979_s0, %s14980_s3  }
  0xa5   :  { %14934 = dma.done.wait [#allocation4], 512  }
  0xa6   :  { %14935 = vsyncadd [#allocation4], 4294966784 }
  0xa7   :  { %14936 = dma.done.wait [#allocation7], 9216  }
  0xa8   :  { %14937 = vsyncadd [#allocation7], 4294958080 }
  0xa9   :  { %14938 = dma.done.wait [#allocation10], 2304  }
  0xaa   :  { %14939 = vsyncadd [#allocation10], 4294964992 }
  0xab   :  { %14940 = dma.done.wait [#allocation13], 4480  }
  0xac   :  { %14941 = vsyncadd [#allocation13], 4294962816 }
  0xad   :  { %14942 = dma.done.wait [#allocation16], 4480  }
  0xae   :  { %14943 = vsyncadd [#allocation16], 4294962816 }
  0xaf   :  { %14944 = dma.done.wait [#allocation19], 4480  }
  0xb0   :  { %14945 = vsyncadd [#allocation19], 4294962816  ;;  %v14990_v1 = vmov 0.0   ;;  %vm14991_vm0 = vmmov 0   ;;  %v278_v2 = vld [vmem:[%s15017_s17 + $0x18] sm:$0xff]  ;;  %v277_v4 = vld [vmem:[%s15017_s17 + $0x10] sm:$0xff] }
  0xb1   :  { %13322 = vmatprep.subr.mxu0 %v14990_v1  ;;  %13333 = vmatprep.subr.mxu1 %v14990_v1  ;;  %v11979_v3 = vld [vmem:[%s15017_s17 + $0x38] sm:$0xff]  ;;  %v11978_v5 = vld [vmem:[%s15017_s17 + $0x30] sm:$0xff]  ;;  %v276_v6 = vld [vmem:[%s15017_s17 + $0x8] sm:$0xff]  ;;  %vm279_vm1 = vcmask 261120   ;;  %vm437_vm2 = vcmask 23552   ;;  %vm450_vm3 = vcmask 1042432  }
  0xb2   :  { %13330 = vmatprep.mubr.msk.f32.mxu0 %vm14991_vm0, %v14990_v1  ;;  %13341 = vmatprep.mubr.msk.f32.mxu1 %vm14991_vm0, %v14990_v1  ;;  %v11977_v7 = vld [vmem:[%s15017_s17 + $0x28] sm:$0xff]  ;;  %v275_v8 = vld [vmem:[%s15017_s17] sm:$0xff]  ;;  %v11983_v17 = vld [vmem:[%s15007_s9 + $0x30] sm:$0xff]  ;;  %s16276_s29 = sld [smem:[#allocation32_spill]]  ;;  %v14992_v44 = vmov 0   ;;  %vm1726_vm4 = vcmask 130048  }
  0xb3   :  { %13323 = vmatpush3.msra.mxu0 %v278_v2  ;;  %13334 = vmatpush3.msra.mxu1 %v11979_v3  ;;  %v11976_v9 = vld [vmem:[%s15017_s17 + $0x20] sm:$0xff]  ;;  %v11982_v15 = vld [vmem:[%s15007_s9 + $0x28] sm:$0xff]  ;;  %v11998_v19 = vld [vmem:[%s15017_s17 + $0x58] sm:$0xff]  ;;  %s16277_s24 = sld [smem:[#allocation30_spill]] }
  0xb4   :  { %13324 = vmatprep.subr.mxu0 %v14990_v1  ;;  %13335 = vmatprep.subr.mxu1 %v14990_v1  ;;  %v15210_v10 = vld [vmem:[%s15002_s5] sm:$0x7]  ;;  %v354_v16 = vld [vmem:[%s15007_s9 + $0x8] sm:$0xff]  ;;  %v355_v20 = vld [vmem:[%s15007_s9 + $0x10] sm:$0xff]  ;;  %s16275_s5 = sld [smem:[#allocation29_spill]] }
  0xb5   :  { %13325 = vmatpush3.msra.mxu0 %v277_v4  ;;  %13336 = vmatpush3.msra.mxu1 %v11978_v5  ;;  %v11981_v11 = vld [vmem:[%s15007_s9 + $0x20] sm:$0xff]  ;;  %v11997_v22 = vld [vmem:[%s15017_s17 + $0x50] sm:$0xff]  ;;  %v356_v23 = vld [vmem:[%s15007_s9 + $0x18] sm:$0xff]  ;;  %s16279_s27 = sld [smem:[#allocation36_spill]] }
  0xb6   :  { %13326 = vmatprep.subr.mxu0 %v14990_v1  ;;  %13337 = vmatprep.subr.mxu1 %v14990_v1  ;;  %v353_v12 = vld [vmem:[%s15007_s9] sm:$0xff]  ;;  %v11984_v24 = vld [vmem:[%s15007_s9 + $0x38] sm:$0xff]  ;;  %v11996_v25 = vld [vmem:[%s15017_s17 + $0x48] sm:$0xff]  ;;  %s16280_s0 = sld [smem:[#allocation38_spill]] }
  0xb7   :  { %13327 = vmatpush3.msra.mxu0 %v276_v6  ;;  %13338 = vmatpush3.msra.mxu1 %v11977_v7  ;;  %v11995_v26 = vld [vmem:[%s15017_s17 + $0x40] sm:$0xff]  ;;  %v12012_v27 = vld [vmem:[%s15017_s17 + $0x78] sm:$0xff]  ;;  %v12011_v28 = vld [vmem:[%s15017_s17 + $0x70] sm:$0xff]  ;;  %s16281_s3 = sld [smem:[#allocation37_spill]] }
  0xb8   :  { %13328 = vmatprep.subr.mxu0 %v14990_v1  ;;  %13339 = vmatprep.subr.mxu1 %v14990_v1  ;;  %v12010_v29 = vld [vmem:[%s15017_s17 + $0x68] sm:$0xff]  ;;  %v12009_v30 = vld [vmem:[%s15017_s17 + $0x60] sm:$0xff]  ;;  %v12026_v31 = vld [vmem:[%s15017_s17 + $0x98] sm:$0xff]  ;;  %s16282_s2 = sld [smem:[#allocation39_spill]] }
  0xb9   :  { %13329 = vmatpush3.msra.mxu0 %v275_v8  ;;  %13340 = vmatpush3.msra.mxu1 %v11976_v9  ;;  %v12025_v32 = vld [vmem:[%s15017_s17 + $0x90] sm:$0xff]  ;;  %v12024_v33 = vld [vmem:[%s15017_s17 + $0x88] sm:$0xff]  ;;  %v12023_v34 = vld [vmem:[%s15017_s17 + $0x80] sm:$0xff]  ;;  %s16283_s7 = sld [smem:[#allocation40_spill]] }
  0xba   :  { %13331 = vmatmul.mubr.msk.f32.vlgmr.msra.gmra.mxu0 %vm279_vm1, %v15210_v10  ;;  %13342 = vmatmul.mubr.msk.f32.vlgmr.msra.gmra.mxu1 %vm279_vm1, %v15210_v10  ;;  %v12040_v35 = vld [vmem:[%s15017_s17 + $0xb8] sm:$0xff]  ;;  %v12039_v36 = vld [vmem:[%s15017_s17 + $0xb0] sm:$0xff]  ;;  %v12038_v37 = vld [vmem:[%s15017_s17 + $0xa8] sm:$0xff]  ;;  %s16284_s10 = sld [smem:[#allocation33_spill]] }
  0xbb   :  { %13346 = vmatprep.mubr.msk.f32.mxu0 %vm437_vm2, %v11981_v11  ;;  %13354 = vmatprep.mubr.msk.f32.mxu1 %vm437_vm2, %v353_v12  ;;  %v12037_v38 = vld [vmem:[%s15017_s17 + $0xa0] sm:$0xff]  ;;  %v12054_v39 = vld [vmem:[%s15017_s17 + $0xd8] sm:$0xff]  ;;  %v12053_v40 = vld [vmem:[%s15017_s17 + $0xd0] sm:$0xff]  ;;  %s16286_s11 = sld [smem:[#allocation35_spill]] }
  0xbc   :  { %v12052_v41 = vld [vmem:[%s15017_s17 + $0xc8] sm:$0xff]  ;;  %v12051_v42 = vld [vmem:[%s15017_s17 + $0xc0] sm:$0xff]  ;;  %14692 = vset.pattern.permute.xlu0 %v14992_v44  ;;  %v1562_v45 = vld [vmem:[%s16275_s5 + $0x18] sm:$0xff]  ;;  %14693 = vset.pattern.permute.xlu1 %v14992_v44  ;;  %s16278_s17 = sld [smem:[#allocation34_spill]] }
  0xbd   :  { %v12000_v43 = vld [vmem:[%s15007_s9 + $0x40] sm:$0xff]  ;;  %1580 = vperm.xlu0 %14692, %v1562_v45   ;;  %v1561_v46 = vld [vmem:[%s16275_s5 + $0x10] sm:$0xff]  ;;  %v1560_v47 = vld [vmem:[%s16275_s5 + $0x8] sm:$0xff] }
  0xbe   :  { %1570 = vperm.xlu1 %14693, %v1560_v47   ;;  %v3861_v48 = vld [vmem:[%s16276_s29] sm:$0xff]  ;;  %v3863_v50 = vld [vmem:[%s16276_s29 + $0x10] sm:$0xff]  ;;  %v3862_v51 = vld [vmem:[%s16276_s29 + $0x8] sm:$0xff] }
  0xbf   :  { %v1559_v49 = vld [vmem:[%s16275_s5] sm:$0xff]  ;;  %v3864_v53 = vld [vmem:[%s16276_s29 + $0x18] sm:$0xff]  ;;  %v1592_v54 = vld [vmem:[%s16277_s24 + $0x8] sm:$0xff] }
  0xc0   :  { %v1591_v52 = vld [vmem:[%s16277_s24] sm:$0xff]  ;;  %v1593_v56 = vld [vmem:[%s16277_s24 + $0x10] sm:$0xff]  ;;  %v1594_v58 = vld [vmem:[%s16277_s24 + $0x18] sm:$0xff] }
  0xc1   :  { %1575 = vperm.xlu0 %14692, %v1561_v46   ;;  %v7456_v60 = vld [vmem:[%s16279_s27 + $0x18] sm:$0xff]  ;;  %v7454_v62 = vld [vmem:[%s16279_s27 + $0x8] sm:$0xff]  ;;  %v7455_v63 = vld [vmem:[%s16279_s27 + $0x10] sm:$0xff] }
  0xc2   :  { %1565 = vperm.xlu1 %14693, %v1559_v49   ;;  %v6037_v55 = vld [vmem:[%s16278_s17] sm:$0xff]  ;;  %v6038_v57 = vld [vmem:[%s16278_s17 + $0x8] sm:$0xff]  ;;  %v6039_v59 = vld [vmem:[%s16278_s17 + $0x10] sm:$0xff] }
  0xc3   :  { %v6040_v61 = vld [vmem:[%s16278_s17 + $0x18] sm:$0xff]  ;;  %v8972_v0 = vld [vmem:[%s16280_s0] sm:$0xff]  ;;  %v8974_v3 = vld [vmem:[%s16280_s0 + $0x10] sm:$0xff] }
  0xc4   :  { %v7453_v2 = vld [vmem:[%s16279_s27] sm:$0xff]  ;;  %v8973_v4 = vld [vmem:[%s16280_s0 + $0x8] sm:$0xff]  ;;  %v8975_v6 = vld [vmem:[%s16280_s0 + $0x18] sm:$0xff] }
  0xc5   :  { %3867 = vperm.xlu0 %14692, %v3861_v48   ;;  %v7485_v5 = vld [vmem:[%s16281_s3] sm:$0xff]  ;;  %v7486_v7 = vld [vmem:[%s16281_s3 + $0x8] sm:$0xff]  ;;  %v7487_v9 = vld [vmem:[%s16281_s3 + $0x10] sm:$0xff] }
  0xc6   :  { %3872 = vperm.xlu1 %14693, %v3862_v51   ;;  %v10365_v8 = vld [vmem:[%s16282_s2] sm:$0xff]  ;;  %v7488_v11 = vld [vmem:[%s16281_s3 + $0x18] sm:$0xff]  ;;  %v10367_v12 = vld [vmem:[%s16282_s2 + $0x10] sm:$0xff] }
  0xc7   :  { %v12045_v45 = vld [vmem:[%s15007_s9 + $0xb8] sm:$0xff]  ;;  %v12056_v46 = vld [vmem:[%s15007_s9 + $0xc0] sm:$0xff]  ;;  %v12057_v48 = vld [vmem:[%s15007_s9 + $0xc8] sm:$0xff] }
  0xc8   :  { %v12058_v49 = vld [vmem:[%s15007_s9 + $0xd0] sm:$0xff]  ;;  %v12059_v51 = vld [vmem:[%s15007_s9 + $0xd8] sm:$0xff] }
  0xc9   :  { %3877 = vperm.xlu0 %14692, %v3863_v50  }
  0xca   :  { %3882 = vperm.xlu1 %14693, %v3864_v53   ;;  %v1724_v53 = vld [vmem:[%s16284_s10] sm:$0xff] }
  0xcd   :  { %1597 = vperm.xlu0 %14692, %v1591_v52   ;;  %v1725_v52 = vld [vmem:[%s16284_s10 + $0x8] sm:$0xff] }
  0xce   :  { %6043 = vperm.xlu1 %14693, %v6037_v55  }
  0xd1   :  { %1602 = vperm.xlu0 %14692, %v1592_v54   ;;  %v1587_v54 = vld [vmem:[#allocation3] sm:$0xff] }
  0xd2   :  { %6048 = vperm.xlu1 %14693, %v6038_v57  }
  0xd5   :  { %1607 = vperm.xlu0 %14692, %v1593_v56  }
  0xd6   :  { %6053 = vperm.xlu1 %14693, %v6039_v59  }
  0xd9   :  { %1612 = vperm.xlu0 %14692, %v1594_v58  }
  0xda   :  { %6058 = vperm.xlu1 %14693, %v6040_v61  }
  0xdd   :  { %7474 = vperm.xlu0 %14692, %v7456_v60  }
  0xde   :  { %7469 = vperm.xlu1 %14693, %v7455_v63  }
  0xe1   :  { %7464 = vperm.xlu0 %14692, %v7454_v62  }
  0xe2   :  { %7459 = vperm.xlu1 %14693, %v7453_v2  }
  0xe5   :  { %8978 = vperm.xlu0 %14692, %v8972_v0  }
  0xe6   :  { %8983 = vperm.xlu1 %14693, %v8973_v4  }
  0xe9   :  { %8988 = vperm.xlu0 %14692, %v8974_v3  }
  0xea   :  { %8993 = vperm.xlu1 %14693, %v8975_v6  }
  0xed   :  { %7491 = vperm.xlu0 %14692, %v7485_v5  }
  0xee   :  { %10371 = vperm.xlu1 %14693, %v10365_v8  }
  0xf1   :  { %7496 = vperm.xlu0 %14692, %v7486_v7  }
  0xf5   :  { %7501 = vperm.xlu0 %14692, %v7487_v9  }
  0xf9   :  { %7506 = vperm.xlu0 %14692, %v7488_v11  }
 0x17a   :  { %v349_v13 = vpop.f32.mrf.mxu0  ;;  %v428_v14 = vpop.f32.mrf.mxu1 }
 0x17b   :  { %13344 = vmatprep.subr.msk.mxu0 %vm450_vm3, %v428_v14  ;;  %13352 = vmatprep.subr.msk.mxu1 %vm450_vm3, %v349_v13 }
 0x17c   :  { %v13343_v18 = vpop.f32.mrf.mxu1  ;;  %13345 = vmatpush3.msk.msra.mxu0 %vm450_vm3, %v428_v14  ;;  %13353 = vmatpush3.msk.msra.mxu1 %vm450_vm3, %v349_v13  ;;  %v13332_v21 = vpop.f32.mrf.mxu0  ;;  %v11774_v13 = vld [vmem:[%s16283_s7] sm:$0xff]  ;;  %v10368_v14 = vld [vmem:[%s16282_s2 + $0x18] sm:$0xff] }
 0x17d   :  { %13347 = vmatmul.mubr.msk.f32.vlgmr.msra.gmra.mxu0 %vm437_vm2, %v11982_v15  ;;  %13355 = vmatmul.mubr.msk.f32.vlgmr.msra.gmra.mxu1 %vm437_vm2, %v354_v16  ;;  %v11776_v15 = vld [vmem:[%s16283_s7 + $0x10] sm:$0xff]  ;;  %v11775_v16 = vld [vmem:[%s16283_s7 + $0x8] sm:$0xff]  ;;  %v11777_v18 = vld [vmem:[%s16283_s7 + $0x18] sm:$0xff] }
 0x17e   :  { %13360 = vmatprep.subr.mxu0 %v14990_v1  ;;  %13349 = vmatprep.mubr.msk.f32.mxu0 %vm437_vm2, %v11983_v17  ;;  %v11837_v17 = vld [vmem:[#allocation2] sm:$0x1] }
 0x17f   :  { %13361 = vmatpush3.msra.mxu0 %v11998_v19  ;;  %13357 = vmatprep.mubr.msk.f32.mxu1 %vm437_vm2, %v355_v20 }
 0x180   :  { %13362 = vmatprep.subr.mxu0 %v14990_v1  ;;  %11780 = vperm.xlu0 %14692, %v11774_v13  }
 0x181   :  { %13363 = vmatpush3.msra.mxu0 %v11997_v22  ;;  %13358 = vmatmul.mubr.msk.f32.gmra.mxu1 %vm437_vm2, %v356_v23 }
 0x182   :  { %13350 = vmatmul.mubr.msk.f32.gmra.mxu0 %vm437_vm2, %v11984_v24  ;;  %13364 = vmatprep.subr.mxu0 %v14990_v1  ;;  %v12001_v24 = vld [vmem:[%s15007_s9 + $0x48] sm:$0xff] }
 0x183   :  { %13365 = vmatpush3.msra.mxu0 %v11996_v25  ;;  %13368 = vmatprep.mubr.msk.f32.mxu0 %vm14991_vm0, %v14990_v1  ;;  %v12002_v25 = vld [vmem:[%s15007_s9 + $0x50] sm:$0xff] }
 0x184   :  { %13366 = vmatprep.subr.mxu0 %v14990_v1  ;;  %13373 = vmatprep.mubr.msk.f32.mxu1 %vm437_vm2, %v12000_v43  ;;  %v12044_v43 = vld [vmem:[%s15007_s9 + $0xb0] sm:$0xff] }
 0x185   :  { %13367 = vmatpush3.msra.mxu0 %v11995_v26  ;;  %11790 = vperm.xlu0 %14692, %v11776_v15  }
 0x186   :  { %13369 = vmatmul.mubr.msk.f32.vlgmr.msra.gmra.mxu0 %vm279_vm1, %v15210_v10  ;;  %13379 = vmatprep.subr.mxu0 %v14990_v1 }
 0x187   :  { %13380 = vmatpush3.msra.mxu0 %v12012_v27  ;;  %13387 = vmatprep.mubr.msk.f32.mxu0 %vm14991_vm0, %v14990_v1  ;;  %v12003_v27 = vld [vmem:[%s15007_s9 + $0x58] sm:$0xff] }
 0x188   :  { %13381 = vmatprep.subr.mxu0 %v14990_v1 }
 0x189   :  { %13382 = vmatpush3.msra.mxu0 %v12011_v28  ;;  %11840 = vperm.xlu0 %14692, %v11837_v17   ;;  %v12014_v28 = vld [vmem:[%s15007_s9 + $0x60] sm:$0xff] }
 0x18a   :  { %13383 = vmatprep.subr.mxu0 %v14990_v1 }
 0x18b   :  { %13384 = vmatpush3.msra.mxu0 %v12010_v29 }
 0x18c   :  { %13385 = vmatprep.subr.mxu0 %v14990_v1 }
 0x18d   :  { %13386 = vmatpush3.msra.mxu0 %v12009_v30  ;;  %v12015_v30 = vld [vmem:[%s15007_s9 + $0x68] sm:$0xff] }
 0x18e   :  { %13388 = vmatmul.mubr.msk.f32.vlgmr.msra.gmra.mxu0 %vm279_vm1, %v15210_v10  ;;  %13398 = vmatprep.subr.mxu0 %v14990_v1 }
 0x18f   :  { %13399 = vmatpush3.msra.mxu0 %v12026_v31  ;;  %13406 = vmatprep.mubr.msk.f32.mxu0 %vm14991_vm0, %v14990_v1  ;;  %v12016_v31 = vld [vmem:[%s15007_s9 + $0x70] sm:$0xff] }
 0x190   :  { %13400 = vmatprep.subr.mxu0 %v14990_v1 }
 0x191   :  { %13401 = vmatpush3.msra.mxu0 %v12025_v32 }
 0x192   :  { %13402 = vmatprep.subr.mxu0 %v14990_v1 }
 0x193   :  { %13403 = vmatpush3.msra.mxu0 %v12024_v33  ;;  %v12017_v33 = vld [vmem:[%s15007_s9 + $0x78] sm:$0xff] }
 0x194   :  { %13404 = vmatprep.subr.mxu0 %v14990_v1 }
 0x195   :  { %13405 = vmatpush3.msra.mxu0 %v12023_v34  ;;  %v12028_v34 = vld [vmem:[%s15007_s9 + $0x80] sm:$0xff] }
 0x196   :  { %13407 = vmatmul.mubr.msk.f32.vlgmr.msra.gmra.mxu0 %vm279_vm1, %v15210_v10  ;;  %13417 = vmatprep.subr.mxu0 %v14990_v1 }
 0x197   :  { %13418 = vmatpush3.msra.mxu0 %v12040_v35  ;;  %13425 = vmatprep.mubr.msk.f32.mxu0 %vm14991_vm0, %v14990_v1 }
 0x198   :  { %13419 = vmatprep.subr.mxu0 %v14990_v1 }
 0x199   :  { %13420 = vmatpush3.msra.mxu0 %v12039_v36  ;;  %v12029_v36 = vld [vmem:[%s15007_s9 + $0x88] sm:$0xff] }
 0x19a   :  { %13421 = vmatprep.subr.mxu0 %v14990_v1 }
 0x19b   :  { %13422 = vmatpush3.msra.mxu0 %v12038_v37  ;;  %v12030_v37 = vld [vmem:[%s15007_s9 + $0x90] sm:$0xff] }
 0x19c   :  { %13423 = vmatprep.subr.mxu0 %v14990_v1 }
 0x19d   :  { %13424 = vmatpush3.msra.mxu0 %v12037_v38 }
 0x19e   :  { %13426 = vmatmul.mubr.msk.f32.vlgmr.msra.gmra.mxu0 %vm279_vm1, %v15210_v10  ;;  %13436 = vmatprep.subr.mxu0 %v14990_v1 }
 0x19f   :  { %13437 = vmatpush3.msra.mxu0 %v12054_v39  ;;  %13444 = vmatprep.mubr.msk.f32.mxu0 %vm14991_vm0, %v14990_v1  ;;  %v12031_v39 = vld [vmem:[%s15007_s9 + $0x98] sm:$0xff] }
 0x1a0   :  { %13438 = vmatprep.subr.mxu0 %v14990_v1 }
 0x1a1   :  { %13439 = vmatpush3.msra.mxu0 %v12053_v40  ;;  %v12042_v40 = vld [vmem:[%s15007_s9 + $0xa0] sm:$0xff] }
 0x1a2   :  { %13440 = vmatprep.subr.mxu0 %v14990_v1 }
 0x1a3   :  { %13441 = vmatpush3.msra.mxu0 %v12052_v41 }
 0x1a4   :  { %13442 = vmatprep.subr.mxu0 %v14990_v1 }
 0x1a5   :  { %13443 = vmatpush3.msra.mxu0 %v12051_v42  ;;  %v12043_v42 = vld [vmem:[%s15007_s9 + $0xa8] sm:$0xff]  ;;  %s16285_s9 = sld [smem:[#allocation31_spill]] }
 0x1a6   :  { %13445 = vmatmul.mubr.msk.f32.vlgmr.msra.gmra.mxu0 %vm279_vm1, %v15210_v10  ;;  %v10366_v10 = vld [vmem:[%s16282_s2 + $0x8] sm:$0xff] }
 0x1a7   :  { %10376 = vperm.xlu1 %14693, %v10366_v10   ;;  %13463 = vmatprep.mubr.msk.f32.mxu0 %vm279_vm1, %v1587_v54 }
 0x1ab   :  { %10381 = vperm.xlu1 %14693, %v10367_v12  }
 0x1af   :  { %10386 = vperm.xlu1 %14693, %v10368_v14  }
 0x1b3   :  { %11785 = vperm.xlu1 %14693, %v11775_v16  }
 0x1b7   :  { %11795 = vperm.xlu1 %14693, %v11777_v18  }
 0x23d   :  { %v15336_v19 = vpop.f32.mrf.mxu0  ;;  %v13356_v55 = vpop.f32.mrf.mxu1 }
 0x23e   :  { %v626_v8 = vadd.f32 %v13356_v55, %v15336_v19 }
 0x23f   :  { %v15338_v20 = vpop.f32.mrf.mxu0  ;;  %v620_v56 = vpop.f32.mrf.mxu1 }
 0x240   :  { %v621_v10 = vadd.f32 %v620_v56, %v15338_v20  ;;  %v1588_v56 = vld [vmem:[#allocation3 + $0x8] sm:$0xff] }
 0x241   :  { %v13359_v57 = vpop.f32.mrf.mxu1 }
 0x242   :  { %v15340_v21 = vpop.f32.mrf.mxu0 }
 0x243   :  { %v630_v58 = vpop.f32.mrf.mxu1  ;;  %v636_v13 = vadd.f32 %v13359_v57, %v15340_v21  ;;  %v12074_v57 = vld [vmem:[%s16284_s10 + $0x18] sm:$0xff] }
 0x244   :  { %v15342_v22 = vpop.f32.mrf.mxu0 }
 0x246   :  { %v710_v23 = vpop.f32.mrf.mxu0 }
 0x247   :  { %13371 = vmatprep.subr.msk.mxu1 %vm450_vm3, %v710_v23 }
 0x248   :  { %v13370_v26 = vpop.f32.mrf.mxu0  ;;  %13372 = vmatpush3.msk.msra.mxu1 %vm450_vm3, %v710_v23 }
 0x249   :  { %13374 = vmatmul.mubr.msk.f32.vlgmr.msra.gmra.mxu1 %vm437_vm2, %v12001_v24  ;;  %v631_v24 = vadd.f32 %v630_v58, %v15342_v22  ;;  %v1589_v58 = vld [vmem:[#allocation3 + $0x10] sm:$0xff] }
 0x24a   :  { %13376 = vmatprep.mubr.msk.f32.mxu1 %vm437_vm2, %v12002_v25  ;;  %v1571_v25 = vpop.permute.xlu1 %1570 }
 0x24d   :  { %13377 = vmatmul.mubr.msk.f32.gmra.mxu1 %vm437_vm2, %v12003_v27 }
 0x24e   :  { %v894_v29 = vpop.f32.mrf.mxu0  ;;  %13392 = vmatprep.mubr.msk.f32.mxu1 %vm437_vm2, %v12014_v28 }
 0x24f   :  { %13390 = vmatprep.subr.msk.mxu1 %vm450_vm3, %v894_v29 }
 0x250   :  { %v13389_v32 = vpop.f32.mrf.mxu0  ;;  %13391 = vmatpush3.msk.msra.mxu1 %vm450_vm3, %v894_v29 }
 0x251   :  { %13393 = vmatmul.mubr.msk.f32.vlgmr.msra.gmra.mxu1 %vm437_vm2, %v12015_v30 }
 0x252   :  { %13395 = vmatprep.mubr.msk.f32.mxu1 %vm437_vm2, %v12016_v31 }
 0x255   :  { %13396 = vmatmul.mubr.msk.f32.gmra.mxu1 %vm437_vm2, %v12017_v33 }
 0x256   :  { %v1078_v35 = vpop.f32.mrf.mxu0  ;;  %13411 = vmatprep.mubr.msk.f32.mxu1 %vm437_vm2, %v12028_v34  ;;  %v1581_v34 = vpop.permute.xlu0 %1580 }
 0x257   :  { %13409 = vmatprep.subr.msk.mxu1 %vm450_vm3, %v1078_v35 }
 0x258   :  { %v13408_v38 = vpop.f32.mrf.mxu0  ;;  %13410 = vmatpush3.msk.msra.mxu1 %vm450_vm3, %v1078_v35 }
 0x259   :  { %13412 = vmatmul.mubr.msk.f32.vlgmr.msra.gmra.mxu1 %vm437_vm2, %v12029_v36  ;;  %v1566_v38 = vpop.permute.xlu1 %1565 }
 0x25a   :  { %13414 = vmatprep.mubr.msk.f32.mxu1 %vm437_vm2, %v12030_v37 }
 0x25d   :  { %13415 = vmatmul.mubr.msk.f32.gmra.mxu1 %vm437_vm2, %v12031_v39 }
 0x25e   :  { %v1262_v41 = vpop.f32.mrf.mxu0  ;;  %13430 = vmatprep.mubr.msk.f32.mxu1 %vm437_vm2, %v12042_v40 }
 0x25f   :  { %13428 = vmatprep.subr.msk.mxu1 %vm450_vm3, %v1262_v41 }
 0x260   :  { %v13427_v44 = vpop.f32.mrf.mxu0  ;;  %13429 = vmatpush3.msk.msra.mxu1 %vm450_vm3, %v1262_v41 }
 0x261   :  { %13431 = vmatmul.mubr.msk.f32.vlgmr.msra.gmra.mxu1 %vm437_vm2, %v12043_v42 }
 0x262   :  { %13433 = vmatprep.mubr.msk.f32.mxu1 %vm437_vm2, %v12044_v43 }
 0x265   :  { %13434 = vmatmul.mubr.msk.f32.gmra.mxu1 %vm437_vm2, %v12045_v45 }
 0x266   :  { %v1446_v47 = vpop.f32.mrf.mxu0  ;;  %13449 = vmatprep.mubr.msk.f32.mxu1 %vm437_vm2, %v12056_v46 }
 0x267   :  { %13447 = vmatprep.subr.msk.mxu1 %vm450_vm3, %v1446_v47 }
 0x268   :  { %v13446_v50 = vpop.f32.mrf.mxu0  ;;  %13448 = vmatpush3.msk.msra.mxu1 %vm450_vm3, %v1446_v47 }
 0x269   :  { %13450 = vmatmul.mubr.msk.f32.vlgmr.msra.gmra.mxu1 %vm437_vm2, %v12057_v48  ;;  %13469 = vmatprep.subr.mxu1 %v1725_v52  ;;  %v1576_v48 = vpop.permute.xlu0 %1575 }
 0x26a   :  { %13452 = vmatprep.mubr.msk.f32.mxu1 %vm437_vm2, %v12058_v49  ;;  %13470 = vmatpush3.msra.mxu1 %v1725_v52 }
 0x26b   :  { %13471 = vmatprep.subr.mxu1 %v1724_v53 }
 0x26c   :  { %13472 = vmatpush3.msra.mxu1 %v1724_v53 }
 0x26d   :  { %13453 = vmatmul.mubr.msk.f32.gmra.mxu1 %vm437_vm2, %v12059_v51 }
 0x309   :  { %v13375_v59 = vpop.f32.mrf.mxu1 }
 0x30a   :  { %v820_v11 = vadd.f32 %v13375_v59, %v626_v8  ;;  %v12073_v59 = vld [vmem:[%s16284_s10 + $0x10] sm:$0xff] }
 0x30b   :  { %v800_v60 = vpop.f32.mrf.mxu1  ;;  %v1826_v8 = vld [vmem:[%s16285_s9 + $0x10] sm:$0xff] }
 0x30c   :  { %v819_v14 = vadd.f32 %v800_v60, %v621_v10  ;;  %v1590_v60 = vld [vmem:[#allocation3 + $0x18] sm:$0xff] }
 0x30d   :  { %v13378_v61 = vpop.f32.mrf.mxu1 }
 0x30e   :  { %v822_v17 = vadd.f32 %v13378_v61, %v636_v13  ;;  %v12079_v61 = vld [vmem:[%s16285_s9 + $0x20] sm:$0xff] }
 0x30f   :  { %v810_v62 = vpop.f32.mrf.mxu1 }
 0x310   :  { %v821_v29 = vadd.f32 %v810_v62, %v631_v24  ;;  %v1824_v62 = vld [vmem:[%s16285_s9] sm:$0xff]  ;;  %v12106_v24 = vld [vmem:[%s16284_s10 + $0x38] sm:$0xff] }
 0x311   :  { %v13394_v63 = vpop.f32.mrf.mxu1 }
 0x312   :  { %v1004_v15 = vadd.f32 %v13394_v63, %v820_v11  ;;  %v1827_v11 = vld [vmem:[%s16285_s9 + $0x18] sm:$0xff] }
 0x313   :  { %v984_v0 = vpop.f32.mrf.mxu1 }
 0x314   :  { %v1003_v18 = vadd.f32 %v984_v0, %v819_v14 }
 0x315   :  { %v13397_v2 = vpop.f32.mrf.mxu1 }
 0x316   :  { %v1006_v27 = vadd.f32 %v13397_v2, %v822_v17  ;;  %v12081_v17 = vld [vmem:[%s16285_s9 + $0x30] sm:$0xff] }
 0x317   :  { %v994_v3 = vpop.f32.mrf.mxu1 }
 0x318   :  { %v1005_v33 = vadd.f32 %v994_v3, %v821_v29  ;;  %v12148_v29 = vld [vmem:[%s16284_s10 + $0x68] sm:$0xff] }
 0x319   :  { %v13413_v4 = vpop.f32.mrf.mxu1 }
 0x31a   :  { %v1188_v23 = vadd.f32 %v13413_v4, %v1004_v15  ;;  %v12080_v15 = vld [vmem:[%s16285_s9 + $0x28] sm:$0xff] }
 0x31b   :  { %v1168_v5 = vpop.f32.mrf.mxu1 }
 0x31c   :  { %v1187_v28 = vadd.f32 %v1168_v5, %v1003_v18  ;;  %v12091_v18 = vld [vmem:[%s16284_s10 + $0x20] sm:$0xff] }
 0x31d   :  { %v13416_v6 = vpop.f32.mrf.mxu1 }
 0x31e   :  { %v1190_v20 = vadd.f32 %v13416_v6, %v1006_v27  ;;  %v12119_v27 = vld [vmem:[%s16284_s10 + $0x40] sm:$0xff] }
 0x31f   :  { %v1178_v7 = vpop.f32.mrf.mxu1 }
 0x320   :  { %v1189_v39 = vadd.f32 %v1178_v7, %v1005_v33  ;;  %v1825_v7 = vld [vmem:[%s16285_s9 + $0x8] sm:$0xff]  ;;  %v12175_v33 = vld [vmem:[%s16284_s10 + $0x80] sm:$0xff] }
 0x321   :  { %v13432_v9 = vpop.f32.mrf.mxu1 }
 0x322   :  { %v1372_v19 = vadd.f32 %v13432_v9, %v1188_v23  ;;  %v12082_v23 = vld [vmem:[%s16285_s9 + $0x38] sm:$0xff] }
 0x323   :  { %v1352_v12 = vpop.f32.mrf.mxu1 }
 0x324   :  { %v1371_v31 = vadd.f32 %v1352_v12, %v1187_v28  ;;  %v12134_v28 = vld [vmem:[%s16284_s10 + $0x58] sm:$0xff] }
 0x325   :  { %v13435_v16 = vpop.f32.mrf.mxu1 }
 0x326   :  { %v1374_v35 = vadd.f32 %v13435_v16, %v1190_v20  ;;  %v12092_v16 = vld [vmem:[%s16284_s10 + $0x28] sm:$0xff]  ;;  %v12162_v20 = vld [vmem:[%s16284_s10 + $0x78] sm:$0xff] }
 0x327   :  { %v1362_v26 = vpop.f32.mrf.mxu1 }
 0x328   :  { %v1373_v42 = vadd.f32 %v1362_v26, %v1189_v39  ;;  %v12120_v26 = vld [vmem:[%s16284_s10 + $0x48] sm:$0xff] }
 0x329   :  { %v13451_v30 = vpop.f32.mrf.mxu1 }
 0x32a   :  { %v1556_v32 = vadd.f32 %v13451_v30, %v1372_v19  ;;  %v12133_v19 = vld [vmem:[%s16284_s10 + $0x50] sm:$0xff]  ;;  %v12147_v30 = vld [vmem:[%s16284_s10 + $0x60] sm:$0xff] }
 0x32b   :  { %v1536_v21 = vpop.f32.mrf.mxu1 }
 0x32c   :  { %v1584_v36 = vadd.f32 %v1571_v25, %v1556_v32  ;;  %v1555_v37 = vadd.f32 %v1536_v21, %v1371_v31  ;;  %v12105_v25 = vld [vmem:[%s16284_s10 + $0x30] sm:$0xff]  ;;  %v12176_v32 = vld [vmem:[%s16284_s10 + $0x88] sm:$0xff]  ;;  %v12190_v21 = vld [vmem:[%s16284_s10 + $0x98] sm:$0xff] }
 0x32d   :  { %v13454_v40 = vpop.f32.mrf.mxu1  ;;  %v12161_v31 = vld [vmem:[%s16284_s10 + $0x70] sm:$0xff] }
 0x32e   :  { %v1583_v22 = vadd.f32 %v1566_v38, %v1555_v37  ;;  %v1558_v41 = vadd.f32 %v13454_v40, %v1374_v35  ;;  %v1717_v43 = vmul.f32 0.01, %v1584_v36  ;;  %vm1713_vm5 = vcmp.ge.f32.partialorder %v1584_v36, 0.0  ;;  %v12204_v35 = vld [vmem:[%s16284_s10 + $0xa8] sm:$0xff]  ;;  %v12097_v37 = vld [vmem:[%s16285_s9 + $0x40] sm:$0xff] }
 0x32f   :  { %v1546_v44 = vpop.f32.mrf.mxu1 }
 0x330   :  { %vm1712_vm6 = vcmp.ge.f32.partialorder %v1583_v22, 0.0  ;;  %v1716_v45 = vmul.f32 0.01, %v1583_v22  ;;  %v1586_v46 = vadd.f32 %v1581_v34, %v1558_v41  ;;  %v1557_v47 = vadd.f32 %v1546_v44, %v1373_v42  ;;  %v12189_v34 = vld [vmem:[%s16284_s10 + $0x90] sm:$0xff] }
 0x331   :  { %v15401_v50 = vsel %vm1713_vm5, %v1584_v36, %v1717_v43 }
 0x332   :  { %v15399_v49 = vsel %vm1712_vm6, %v1583_v22, %v1716_v45  ;;  %13455 = vmatprep.subr.mxu0 %v1586_v46  ;;  %v1585_v51 = vadd.f32 %v1576_v48, %v1557_v47  ;;  %v1719_v52 = vmul.f32 0.01, %v1586_v46  ;;  %vm1715_vm7 = vcmp.ge.f32.partialorder %v1586_v46, 0.0  ;;  %v12098_v47 = vld [vmem:[%s16285_s9 + $0x48] sm:$0xff]  ;;  %v12099_v48 = vld [vmem:[%s16285_s9 + $0x50] sm:$0xff] }
 0x333   :  { %13456 = vmatpush3.msra.mxu0 %v1586_v46  ;;  %13473 = vmatprep.mubr.msk.f32.mxu1 %vm1726_vm4, %v15399_v49 }
 0x334   :  { %13474 = vmatmul.mubr.msk.f32.vlgmr.msra.gmra.mxu1 %vm1726_vm4, %v15401_v50  ;;  %vm1714_vm8 = vcmp.ge.f32.partialorder %v1585_v51, 0.0  ;;  %v1718_v53 = vmul.f32 0.01, %v1585_v51  ;;  %13457 = vmatprep.subr.mxu0 %v1585_v51  ;;  %v15409_v55 = vsel %vm1715_vm7, %v1586_v46, %v1719_v52  ;;  %v12111_v52 = vld [vmem:[%s16285_s9 + $0x60] sm:$0xff] }
 0x335   :  { %13458 = vmatpush3.msra.mxu0 %v1585_v51 }
 0x336   :  { %v15407_v54 = vsel %vm1714_vm8, %v1585_v51, %v1718_v53  ;;  %13459 = vmatprep.subr.mxu0 %v1584_v36  ;;  %v12100_v51 = vld [vmem:[%s16285_s9 + $0x58] sm:$0xff] }
 0x337   :  { %13460 = vmatpush3.msra.mxu0 %v1584_v36  ;;  %13476 = vmatprep.mubr.msk.f32.mxu1 %vm1726_vm4, %v15407_v54  ;;  %v12203_v36 = vld [vmem:[%s16284_s10 + $0xa0] sm:$0xff] }
 0x338   :  { %13461 = vmatprep.subr.mxu0 %v1583_v22  ;;  %13477 = vmatmul.mubr.msk.f32.gmra.mxu1 %vm1726_vm4, %v15409_v55 }
 0x339   :  { %13462 = vmatpush3.msra.mxu0 %v1583_v22  ;;  %13497 = vmatprep.mubr.msk.f32.mxu1 %vm279_vm1, %v12079_v61 }
 0x33a   :  { %13464 = vmatmul.mubr.msk.f32.vlgmr.msra.gmra.mxu0 %vm279_vm1, %v1588_v56  ;;  %13479 = vmatprep.subr.mxu0 %v12074_v57  ;;  %v12113_v56 = vld [vmem:[%s16285_s9 + $0x70] sm:$0xff] }
 0x33b   :  { %13466 = vmatprep.mubr.msk.f32.mxu0 %vm279_vm1, %v1589_v58  ;;  %13480 = vmatpush3.msra.mxu0 %v12074_v57 }
 0x33c   :  { %13481 = vmatprep.subr.mxu0 %v12073_v59 }
 0x33d   :  { %13482 = vmatpush3.msra.mxu0 %v12073_v59  ;;  %v12114_v59 = vld [vmem:[%s16285_s9 + $0x78] sm:$0xff] }
 0x33e   :  { %13467 = vmatmul.mubr.msk.f32.gmra.mxu0 %vm279_vm1, %v1590_v60  ;;  %v12125_v60 = vld [vmem:[%s16285_s9 + $0x80] sm:$0xff] }
 0x33f   :  { %13483 = vmatprep.mubr.msk.f32.mxu0 %vm1726_vm4, %v15399_v49 }
 0x342   :  { %13484 = vmatmul.mubr.msk.f32.vlgmr.msra.gmra.mxu0 %vm1726_vm4, %v15401_v50 }
 0x343   :  { %13486 = vmatprep.mubr.msk.f32.mxu0 %vm1726_vm4, %v15407_v54 }
 0x346   :  { %13487 = vmatmul.mubr.msk.f32.gmra.mxu0 %vm1726_vm4, %v15409_v55 }
 0x347   :  { %13511 = vmatprep.mubr.msk.f32.mxu0 %vm279_vm1, %v1824_v62 }
 0x3f4   :  { %v13475_v63 = vpop.f32.mrf.mxu1 }
 0x3f6   :  { %v1805_v0 = vpop.f32.mrf.mxu1 }
 0x3f8   :  { %v13478_v2 = vpop.f32.mrf.mxu1 }
 0x3f9   :  { %13503 = vmatprep.subr.mxu0 %v13478_v2 }
 0x3fa   :  { %v15432_v3 = vpop.f32.mrf.mxu0  ;;  %v1815_v4 = vpop.f32.mrf.mxu1  ;;  %13504 = vmatpush3.msra.mxu0 %v13478_v2 }
 0x3fb   :  { %13505 = vmatprep.subr.mxu0 %v1815_v4 }
 0x3fc   :  { %v15434_v5 = vpop.f32.mrf.mxu0  ;;  %13506 = vmatpush3.msra.mxu0 %v1815_v4 }
 0x3fd   :  { %13507 = vmatprep.subr.mxu0 %v13475_v63 }
 0x3fe   :  { %v15436_v6 = vpop.f32.mrf.mxu0  ;;  %13508 = vmatpush3.msra.mxu0 %v13475_v63  ;;  %v12126_v63 = vld [vmem:[%s16285_s9 + $0x88] sm:$0xff] }
 0x3ff   :  { %13509 = vmatprep.subr.mxu0 %v1805_v0 }
 0x400   :  { %v15440_v9 = vpop.f32.mrf.mxu0  ;;  %13510 = vmatpush3.msra.mxu0 %v1805_v0  ;;  %v12127_v0 = vld [vmem:[%s16285_s9 + $0x90] sm:$0xff] }
 0x401   :  { %13512 = vmatmul.mubr.msk.f32.vlgmr.msra.gmra.mxu0 %vm279_vm1, %v1825_v7  ;;  %v12128_v7 = vld [vmem:[%s16285_s9 + $0x98] sm:$0xff] }
 0x402   :  { %v13485_v10 = vpop.f32.mrf.mxu0  ;;  %13514 = vmatprep.mubr.msk.f32.mxu0 %vm279_vm1, %v1826_v8  ;;  %v12139_v8 = vld [vmem:[%s16285_s9 + $0xa0] sm:$0xff] }
 0x404   :  { %v1897_v12 = vpop.f32.mrf.mxu0 }
 0x405   :  { %13515 = vmatmul.mubr.msk.f32.gmra.mxu0 %vm279_vm1, %v1827_v11 }
 0x406   :  { %v13488_v13 = vpop.f32.mrf.mxu0  ;;  %13535 = vmatprep.mubr.msk.f32.mxu0 %vm279_vm1, %v12097_v37  ;;  %v12182_v37 = vld [vmem:[%s16285_s9 + $0x108] sm:$0xff] }
 0x407   :  { %13489 = vmatprep.subr.mxu1 %v13488_v13 }
 0x408   :  { %v1907_v14 = vpop.f32.mrf.mxu0  ;;  %13490 = vmatpush3.msra.mxu1 %v13488_v13  ;;  %v12141_v13 = vld [vmem:[%s16285_s9 + $0xb0] sm:$0xff] }
 0x409   :  { %13491 = vmatprep.subr.mxu1 %v1907_v14 }
 0x40a   :  { %13492 = vmatpush3.msra.mxu1 %v1907_v14 }
 0x40b   :  { %13493 = vmatprep.subr.mxu1 %v13485_v10 }
 0x40c   :  { %13494 = vmatpush3.msra.mxu1 %v13485_v10 }
 0x40d   :  { %13495 = vmatprep.subr.mxu1 %v1897_v12 }
 0x40e   :  { %13496 = vmatpush3.msra.mxu1 %v1897_v12  ;;  %v12140_v12 = vld [vmem:[%s16285_s9 + $0xa8] sm:$0xff] }
 0x40f   :  { %13498 = vmatmul.mubr.msk.f32.vlgmr.msra.gmra.mxu1 %vm279_vm1, %v12080_v15  ;;  %13517 = vmatprep.subr.mxu1 %v12092_v16 }
 0x410   :  { %13500 = vmatprep.mubr.msk.f32.mxu1 %vm279_vm1, %v12081_v17  ;;  %13518 = vmatpush3.msra.mxu1 %v12092_v16  ;;  %v12142_v16 = vld [vmem:[%s16285_s9 + $0xb8] sm:$0xff]  ;;  %v12153_v17 = vld [vmem:[%s16285_s9 + $0xc0] sm:$0xff] }
 0x411   :  { %13519 = vmatprep.subr.mxu1 %v12091_v18 }
 0x412   :  { %13520 = vmatpush3.msra.mxu1 %v12091_v18 }
 0x413   :  { %13501 = vmatmul.mubr.msk.f32.gmra.mxu1 %vm279_vm1, %v12082_v23  ;;  %13541 = vmatprep.subr.mxu1 %v12106_v24 }
 0x414   :  { %13521 = vmatprep.mubr.msk.f32.mxu1 %vm1726_vm4, %v15399_v49 }
 0x417   :  { %13522 = vmatmul.mubr.msk.f32.vlgmr.msra.gmra.mxu1 %vm1726_vm4, %v15401_v50 }
 0x418   :  { %13524 = vmatprep.mubr.msk.f32.mxu1 %vm1726_vm4, %v15407_v54  ;;  %13542 = vmatpush3.msra.mxu1 %v12106_v24  ;;  %v12154_v24 = vld [vmem:[%s16285_s9 + $0xc8] sm:$0xff] }
 0x419   :  { %13543 = vmatprep.subr.mxu1 %v12105_v25 }
 0x41a   :  { %13544 = vmatpush3.msra.mxu1 %v12105_v25  ;;  %v12155_v25 = vld [vmem:[%s16285_s9 + $0xd0] sm:$0xff] }
 0x41b   :  { %13525 = vmatmul.mubr.msk.f32.gmra.mxu1 %vm1726_vm4, %v15409_v55  ;;  %13565 = vmatprep.subr.mxu1 %v12120_v26 }
 0x41c   :  { %13545 = vmatprep.mubr.msk.f32.mxu1 %vm1726_vm4, %v15399_v49 }
 0x41f   :  { %13546 = vmatmul.mubr.msk.f32.vlgmr.msra.gmra.mxu1 %vm1726_vm4, %v15401_v50 }
 0x420   :  { %13548 = vmatprep.mubr.msk.f32.mxu1 %vm1726_vm4, %v15407_v54  ;;  %13566 = vmatpush3.msra.mxu1 %v12120_v26 }
 0x421   :  { %13567 = vmatprep.subr.mxu1 %v12119_v27 }
 0x422   :  { %13568 = vmatpush3.msra.mxu1 %v12119_v27 }
 0x423   :  { %13549 = vmatmul.mubr.msk.f32.gmra.mxu1 %vm1726_vm4, %v15409_v55  ;;  %13589 = vmatprep.subr.mxu1 %v12134_v28 }
 0x424   :  { %13569 = vmatprep.mubr.msk.f32.mxu1 %vm1726_vm4, %v15399_v49 }
 0x427   :  { %13570 = vmatmul.mubr.msk.f32.vlgmr.msra.gmra.mxu1 %vm1726_vm4, %v15401_v50 }
 0x428   :  { %13572 = vmatprep.mubr.msk.f32.mxu1 %vm1726_vm4, %v15407_v54  ;;  %13590 = vmatpush3.msra.mxu1 %v12134_v28  ;;  %v12156_v28 = vld [vmem:[%s16285_s9 + $0xd8] sm:$0xff] }
 0x429   :  { %13591 = vmatprep.subr.mxu1 %v12133_v19 }
 0x42a   :  { %13592 = vmatpush3.msra.mxu1 %v12133_v19  ;;  %v12167_v19 = vld [vmem:[%s16285_s9 + $0xe0] sm:$0xff] }
 0x42b   :  { %13573 = vmatmul.mubr.msk.f32.gmra.mxu1 %vm1726_vm4, %v15409_v55  ;;  %13613 = vmatprep.subr.mxu1 %v12148_v29 }
 0x42c   :  { %13593 = vmatprep.mubr.msk.f32.mxu1 %vm1726_vm4, %v15399_v49 }
 0x42f   :  { %13594 = vmatmul.mubr.msk.f32.vlgmr.msra.gmra.mxu1 %vm1726_vm4, %v15401_v50 }
 0x430   :  { %13596 = vmatprep.mubr.msk.f32.mxu1 %vm1726_vm4, %v15407_v54  ;;  %13614 = vmatpush3.msra.mxu1 %v12148_v29 }
 0x431   :  { %13615 = vmatprep.subr.mxu1 %v12147_v30 }
 0x432   :  { %13616 = vmatpush3.msra.mxu1 %v12147_v30 }
 0x433   :  { %13597 = vmatmul.mubr.msk.f32.gmra.mxu1 %vm1726_vm4, %v15409_v55  ;;  %13637 = vmatprep.subr.mxu1 %v12162_v20 }
 0x434   :  { %13617 = vmatprep.mubr.msk.f32.mxu1 %vm1726_vm4, %v15399_v49 }
 0x437   :  { %13618 = vmatmul.mubr.msk.f32.vlgmr.msra.gmra.mxu1 %vm1726_vm4, %v15401_v50 }
 0x438   :  { %13620 = vmatprep.mubr.msk.f32.mxu1 %vm1726_vm4, %v15407_v54  ;;  %13638 = vmatpush3.msra.mxu1 %v12162_v20  ;;  %v12168_v20 = vld [vmem:[%s16285_s9 + $0xe8] sm:$0xff] }
 0x439   :  { %13639 = vmatprep.subr.mxu1 %v12161_v31 }
 0x43a   :  { %13640 = vmatpush3.msra.mxu1 %v12161_v31  ;;  %v12169_v31 = vld [vmem:[%s16285_s9 + $0xf0] sm:$0xff] }
 0x43b   :  { %13621 = vmatmul.mubr.msk.f32.gmra.mxu1 %vm1726_vm4, %v15409_v55  ;;  %13661 = vmatprep.subr.mxu1 %v12176_v32 }
 0x43c   :  { %13641 = vmatprep.mubr.msk.f32.mxu1 %vm1726_vm4, %v15399_v49 }
 0x43f   :  { %13642 = vmatmul.mubr.msk.f32.vlgmr.msra.gmra.mxu1 %vm1726_vm4, %v15401_v50 }
 0x440   :  { %13644 = vmatprep.mubr.msk.f32.mxu1 %vm1726_vm4, %v15407_v54  ;;  %13662 = vmatpush3.msra.mxu1 %v12176_v32 }
 0x441   :  { %13663 = vmatprep.subr.mxu1 %v12175_v33 }
 0x442   :  { %13664 = vmatpush3.msra.mxu1 %v12175_v33 }
 0x443   :  { %13645 = vmatmul.mubr.msk.f32.gmra.mxu1 %vm1726_vm4, %v15409_v55  ;;  %13685 = vmatprep.subr.mxu1 %v12190_v21 }
 0x444   :  { %13665 = vmatprep.mubr.msk.f32.mxu1 %vm1726_vm4, %v15399_v49 }
 0x447   :  { %13666 = vmatmul.mubr.msk.f32.vlgmr.msra.gmra.mxu1 %vm1726_vm4, %v15401_v50 }
 0x448   :  { %13668 = vmatprep.mubr.msk.f32.mxu1 %vm1726_vm4, %v15407_v54  ;;  %13686 = vmatpush3.msra.mxu1 %v12190_v21  ;;  %v12170_v21 = vld [vmem:[%s16285_s9 + $0xf8] sm:$0xff] }
 0x449   :  { %13687 = vmatprep.subr.mxu1 %v12189_v34 }
 0x44a   :  { %13688 = vmatpush3.msra.mxu1 %v12189_v34  ;;  %v12181_v34 = vld [vmem:[%s16285_s9 + $0x100] sm:$0xff] }
 0x44b   :  { %13669 = vmatmul.mubr.msk.f32.gmra.mxu1 %vm1726_vm4, %v15409_v55  ;;  %13709 = vmatprep.subr.mxu1 %v12204_v35 }
 0x44c   :  { %13689 = vmatprep.mubr.msk.f32.mxu1 %vm1726_vm4, %v15399_v49 }
 0x44f   :  { %13690 = vmatmul.mubr.msk.f32.vlgmr.msra.gmra.mxu1 %vm1726_vm4, %v15401_v50 }
 0x450   :  { %13692 = vmatprep.mubr.msk.f32.mxu1 %vm1726_vm4, %v15407_v54  ;;  %13710 = vmatpush3.msra.mxu1 %v12204_v35 }
 0x451   :  { %13711 = vmatprep.subr.mxu1 %v12203_v36 }
 0x452   :  { %13712 = vmatpush3.msra.mxu1 %v12203_v36 }
 0x453   :  { %13693 = vmatmul.mubr.msk.f32.gmra.mxu1 %vm1726_vm4, %v15409_v55 }
 0x454   :  { %13713 = vmatprep.mubr.msk.f32.mxu1 %vm1726_vm4, %v15399_v49 }
 0x457   :  { %13714 = vmatmul.mubr.msk.f32.vlgmr.msra.gmra.mxu1 %vm1726_vm4, %v15401_v50 }
 0x458   :  { %13716 = vmatprep.mubr.msk.f32.mxu1 %vm1726_vm4, %v15407_v54 }
 0x45b   :  { %13717 = vmatmul.mubr.msk.f32.gmra.mxu1 %vm1726_vm4, %v15409_v55  ;;  %v12112_v55 = vld [vmem:[%s16285_s9 + $0x68] sm:$0xff] }
 0x4cf   :  { %v15544_v38 = vpop.f32.mrf.mxu1 }
 0x4d1   :  { %v15546_v39 = vpop.f32.mrf.mxu1 }
 0x4d3   :  { %v15548_v40 = vpop.f32.mrf.mxu1 }
 0x4d5   :  { %v15550_v22 = vpop.f32.mrf.mxu1 }
 0x4d7   :  { %v13523_v41 = vpop.f32.mrf.mxu1 }
 0x4d9   :  { %v2184_v42 = vpop.f32.mrf.mxu1 }
 0x4db   :  { %v13526_v43 = vpop.f32.mrf.mxu1 }
 0x4dc   :  { %13527 = vmatprep.subr.mxu0 %v13526_v43 }
 0x4dd   :  { %v2194_v44 = vpop.f32.mrf.mxu1  ;;  %13528 = vmatpush3.msra.mxu0 %v13526_v43 }
 0x4de   :  { %13529 = vmatprep.subr.mxu0 %v2194_v44 }
 0x4df   :  { %13530 = vmatpush3.msra.mxu0 %v2194_v44  ;;  %v13547_v45 = vpop.f32.mrf.mxu1  ;;  %v12184_v44 = vld [vmem:[%s16285_s9 + $0x118] sm:$0xff] }
 0x4e0   :  { %13531 = vmatprep.subr.mxu0 %v13523_v41 }
 0x4e1   :  { %13532 = vmatpush3.msra.mxu0 %v13523_v41  ;;  %v2378_v46 = vpop.f32.mrf.mxu1  ;;  %v12183_v41 = vld [vmem:[%s16285_s9 + $0x110] sm:$0xff] }
 0x4e2   :  { %13533 = vmatprep.subr.mxu0 %v2184_v42 }
 0x4e3   :  { %13534 = vmatpush3.msra.mxu0 %v2184_v42  ;;  %v13550_v49 = vpop.f32.mrf.mxu1 }
 0x4e4   :  { %13536 = vmatmul.mubr.msk.f32.vlgmr.msra.gmra.mxu0 %vm279_vm1, %v12098_v47  ;;  %13551 = vmatprep.subr.mxu0 %v13550_v49 }
 0x4e5   :  { %v2388_v50 = vpop.f32.mrf.mxu1  ;;  %13552 = vmatpush3.msra.mxu0 %v13550_v49  ;;  %13538 = vmatprep.mubr.msk.f32.mxu0 %vm279_vm1, %v12099_v48  ;;  %v12196_v48 = vld [vmem:[%s16285_s9 + $0x128] sm:$0xff]  ;;  %v12197_v49 = vld [vmem:[%s16285_s9 + $0x130] sm:$0xff] }
 0x4e6   :  { %13553 = vmatprep.subr.mxu0 %v2388_v50 }
 0x4e7   :  { %13554 = vmatpush3.msra.mxu0 %v2388_v50  ;;  %v13571_v53 = vpop.f32.mrf.mxu1 }
 0x4e8   :  { %13539 = vmatmul.mubr.msk.f32.gmra.mxu0 %vm279_vm1, %v12100_v51  ;;  %13555 = vmatprep.subr.mxu0 %v13547_v45 }
 0x4e9   :  { %13556 = vmatpush3.msra.mxu0 %v13547_v45  ;;  %v2572_v54 = vpop.f32.mrf.mxu1  ;;  %13559 = vmatprep.mubr.msk.f32.mxu0 %vm279_vm1, %v12111_v52  ;;  %v12195_v45 = vld [vmem:[%s16285_s9 + $0x120] sm:$0xff]  ;;  %v12198_v52 = vld [vmem:[%s16285_s9 + $0x138] sm:$0xff] }
 0x4ea   :  { %13557 = vmatprep.subr.mxu0 %v2378_v46 }
 0x4eb   :  { %13558 = vmatpush3.msra.mxu0 %v2378_v46  ;;  %v13574_v57 = vpop.f32.mrf.mxu1 }
 0x4ec   :  { %13560 = vmatmul.mubr.msk.f32.vlgmr.msra.gmra.mxu0 %vm279_vm1, %v12112_v55  ;;  %13575 = vmatprep.subr.mxu0 %v13574_v57  ;;  %v12211_v55 = vld [vmem:[%s16285_s9 + $0x150] sm:$0xff] }
 0x4ed   :  { %v2582_v58 = vpop.f32.mrf.mxu1  ;;  %13576 = vmatpush3.msra.mxu0 %v13574_v57  ;;  %13562 = vmatprep.mubr.msk.f32.mxu0 %vm279_vm1, %v12113_v56  ;;  %v12212_v56 = vld [vmem:[%s16285_s9 + $0x158] sm:$0xff]  ;;  %v3902_v57 = vld [vmem:[%s16286_s11 + $0x8] sm:$0xff] }
 0x4ee   :  { %13577 = vmatprep.subr.mxu0 %v2582_v58  ;;  %13733 = vmatprep.subr.mxu1 %v3902_v57 }
 0x4ef   :  { %13578 = vmatpush3.msra.mxu0 %v2582_v58  ;;  %v13595_v61 = vpop.f32.mrf.mxu1  ;;  %v12222_v58 = vld [vmem:[%s16286_s11 + $0x18] sm:$0xff]  ;;  %13734 = vmatpush3.msra.mxu1 %v3902_v57 }
 0x4f0   :  { %13563 = vmatmul.mubr.msk.f32.gmra.mxu0 %vm279_vm1, %v12114_v59  ;;  %13579 = vmatprep.subr.mxu0 %v13571_v53  ;;  %v3901_v59 = vld [vmem:[%s16286_s11] sm:$0xff] }
 0x4f1   :  { %13580 = vmatpush3.msra.mxu0 %v13571_v53  ;;  %v2766_v62 = vpop.f32.mrf.mxu1  ;;  %13583 = vmatprep.mubr.msk.f32.mxu0 %vm279_vm1, %v12125_v60  ;;  %v12209_v53 = vld [vmem:[%s16285_s9 + $0x140] sm:$0xff]  ;;  %v12221_v60 = vld [vmem:[%s16286_s11 + $0x10] sm:$0xff] }
 0x4f2   :  { %13581 = vmatprep.subr.mxu0 %v2572_v54  ;;  %13735 = vmatprep.subr.mxu1 %v3901_v59 }
 0x4f3   :  { %13582 = vmatpush3.msra.mxu0 %v2572_v54  ;;  %v13598_v2 = vpop.f32.mrf.mxu1  ;;  %v12210_v54 = vld [vmem:[%s16285_s9 + $0x148] sm:$0xff]  ;;  %13736 = vmatpush3.msra.mxu1 %v3901_v59 }
 0x4f4   :  { %13584 = vmatmul.mubr.msk.f32.vlgmr.msra.gmra.mxu0 %vm279_vm1, %v12126_v63  ;;  %13599 = vmatprep.subr.mxu0 %v13598_v2 }
 0x4f5   :  { %v2776_v4 = vpop.f32.mrf.mxu1  ;;  %13600 = vmatpush3.msra.mxu0 %v13598_v2  ;;  %13586 = vmatprep.mubr.msk.f32.mxu0 %vm279_vm1, %v12127_v0 }
 0x4f6   :  { %13601 = vmatprep.subr.mxu0 %v2776_v4 }
 0x4f7   :  { %13602 = vmatpush3.msra.mxu0 %v2776_v4  ;;  %v13619_v10 = vpop.f32.mrf.mxu1 }
 0x4f8   :  { %13587 = vmatmul.mubr.msk.f32.gmra.mxu0 %vm279_vm1, %v12128_v7  ;;  %13603 = vmatprep.subr.mxu0 %v13595_v61 }
 0x4f9   :  { %13604 = vmatpush3.msra.mxu0 %v13595_v61  ;;  %v2960_v11 = vpop.f32.mrf.mxu1  ;;  %13607 = vmatprep.mubr.msk.f32.mxu0 %vm279_vm1, %v12139_v8  ;;  %v13513_v61 = vpop.f32.mrf.mxu0 }
 0x4fa   :  { %13605 = vmatprep.subr.mxu0 %v2766_v62 }
 0x4fb   :  { %13606 = vmatpush3.msra.mxu0 %v2766_v62  ;;  %v13622_v14 = vpop.f32.mrf.mxu1  ;;  %v2096_v62 = vpop.f32.mrf.mxu0 }
 0x4fc   :  { %13608 = vmatmul.mubr.msk.f32.vlgmr.msra.gmra.mxu0 %vm279_vm1, %v12140_v12  ;;  %13623 = vmatprep.subr.mxu0 %v13622_v14 }
 0x4fd   :  { %v2970_v15 = vpop.f32.mrf.mxu1  ;;  %13624 = vmatpush3.msra.mxu0 %v13622_v14  ;;  %13610 = vmatprep.mubr.msk.f32.mxu0 %vm279_vm1, %v12141_v13  ;;  %v13516_v63 = vpop.f32.mrf.mxu0 }
 0x4fe   :  { %13625 = vmatprep.subr.mxu0 %v2970_v15 }
 0x4ff   :  { %13626 = vmatpush3.msra.mxu0 %v2970_v15  ;;  %v13643_v18 = vpop.f32.mrf.mxu1  ;;  %v2106_v0 = vpop.f32.mrf.mxu0 }
 0x500   :  { %13611 = vmatmul.mubr.msk.f32.gmra.mxu0 %vm279_vm1, %v12142_v16  ;;  %13627 = vmatprep.subr.mxu0 %v13619_v10 }
 0x501   :  { %13628 = vmatpush3.msra.mxu0 %v13619_v10  ;;  %v3154_v23 = vpop.f32.mrf.mxu1  ;;  %13631 = vmatprep.mubr.msk.f32.mxu0 %vm279_vm1, %v12153_v17 }
 0x502   :  { %13629 = vmatprep.subr.mxu0 %v2960_v11 }
 0x503   :  { %13630 = vmatpush3.msra.mxu0 %v2960_v11  ;;  %v13646_v26 = vpop.f32.mrf.mxu1 }
 0x504   :  { %13632 = vmatmul.mubr.msk.f32.vlgmr.msra.gmra.mxu0 %vm279_vm1, %v12154_v24  ;;  %13647 = vmatprep.subr.mxu0 %v13646_v26 }
 0x505   :  { %v3164_v27 = vpop.f32.mrf.mxu1  ;;  %13648 = vmatpush3.msra.mxu0 %v13646_v26  ;;  %13634 = vmatprep.mubr.msk.f32.mxu0 %vm279_vm1, %v12155_v25 }
 0x506   :  { %13649 = vmatprep.subr.mxu0 %v3164_v27 }
 0x507   :  { %13650 = vmatpush3.msra.mxu0 %v3164_v27  ;;  %v13667_v29 = vpop.f32.mrf.mxu1 }
 0x508   :  { %13635 = vmatmul.mubr.msk.f32.gmra.mxu0 %vm279_vm1, %v12156_v28  ;;  %13651 = vmatprep.subr.mxu0 %v13643_v18 }
 0x509   :  { %13652 = vmatpush3.msra.mxu0 %v13643_v18  ;;  %v3348_v30 = vpop.f32.mrf.mxu1  ;;  %13655 = vmatprep.mubr.msk.f32.mxu0 %vm279_vm1, %v12167_v19 }
 0x50a   :  { %13653 = vmatprep.subr.mxu0 %v3154_v23 }
 0x50b   :  { %13654 = vmatpush3.msra.mxu0 %v3154_v23  ;;  %v13670_v32 = vpop.f32.mrf.mxu1 }
 0x50c   :  { %13656 = vmatmul.mubr.msk.f32.vlgmr.msra.gmra.mxu0 %vm279_vm1, %v12168_v20  ;;  %13671 = vmatprep.subr.mxu0 %v13670_v32 }
 0x50d   :  { %v3358_v33 = vpop.f32.mrf.mxu1  ;;  %13672 = vmatpush3.msra.mxu0 %v13670_v32  ;;  %13658 = vmatprep.mubr.msk.f32.mxu0 %vm279_vm1, %v12169_v31  ;;  %v2102_v32 = vadd.f32 %v13513_v61, %v15544_v38 }
 0x50e   :  { %13673 = vmatprep.subr.mxu0 %v3358_v33 }
 0x50f   :  { %13674 = vmatpush3.msra.mxu0 %v3358_v33  ;;  %v13691_v35 = vpop.f32.mrf.mxu1 }
 0x510   :  { %13659 = vmatmul.mubr.msk.f32.gmra.mxu0 %vm279_vm1, %v12170_v21  ;;  %13675 = vmatprep.subr.mxu0 %v13667_v29  ;;  %v2097_v21 = vadd.f32 %v2096_v62, %v15546_v39 }
 0x511   :  { %13676 = vmatpush3.msra.mxu0 %v13667_v29  ;;  %v3542_v36 = vpop.f32.mrf.mxu1  ;;  %13679 = vmatprep.mubr.msk.f32.mxu0 %vm279_vm1, %v12181_v34 }
 0x512   :  { %13677 = vmatprep.subr.mxu0 %v3348_v30 }
 0x513   :  { %13678 = vmatpush3.msra.mxu0 %v3348_v30  ;;  %v13694_v42 = vpop.f32.mrf.mxu1 }
 0x514   :  { %13680 = vmatmul.mubr.msk.f32.vlgmr.msra.gmra.mxu0 %vm279_vm1, %v12182_v37  ;;  %13695 = vmatprep.subr.mxu0 %v13694_v42 }
 0x515   :  { %v3552_v43 = vpop.f32.mrf.mxu1  ;;  %13696 = vmatpush3.msra.mxu0 %v13694_v42  ;;  %13682 = vmatprep.mubr.msk.f32.mxu0 %vm279_vm1, %v12183_v41 }
 0x516   :  { %13697 = vmatprep.subr.mxu0 %v3552_v43 }
 0x517   :  { %13698 = vmatpush3.msra.mxu0 %v3552_v43  ;;  %v13715_v46 = vpop.f32.mrf.mxu1 }
 0x518   :  { %13683 = vmatmul.mubr.msk.f32.gmra.mxu0 %vm279_vm1, %v12184_v44  ;;  %13699 = vmatprep.subr.mxu0 %v13691_v35 }
 0x519   :  { %13700 = vmatpush3.msra.mxu0 %v13691_v35  ;;  %v3736_v47 = vpop.f32.mrf.mxu1  ;;  %13703 = vmatprep.mubr.msk.f32.mxu0 %vm279_vm1, %v12195_v45 }
 0x51a   :  { %13701 = vmatprep.subr.mxu0 %v3542_v36 }
 0x51b   :  { %13702 = vmatpush3.msra.mxu0 %v3542_v36  ;;  %v13718_v50 = vpop.f32.mrf.mxu1  ;;  %v2112_v36 = vadd.f32 %v13516_v63, %v15548_v40 }
 0x51c   :  { %13704 = vmatmul.mubr.msk.f32.vlgmr.msra.gmra.mxu0 %vm279_vm1, %v12196_v48  ;;  %13719 = vmatprep.subr.mxu0 %v13718_v50 }
 0x51d   :  { %v3746_v51 = vpop.f32.mrf.mxu1  ;;  %13720 = vmatpush3.msra.mxu0 %v13718_v50  ;;  %13706 = vmatprep.mubr.msk.f32.mxu0 %vm279_vm1, %v12197_v49 }
 0x51e   :  { %13721 = vmatprep.subr.mxu0 %v3746_v51 }
 0x51f   :  { %13722 = vmatpush3.msra.mxu0 %v3746_v51 }
 0x520   :  { %13707 = vmatmul.mubr.msk.f32.gmra.mxu0 %vm279_vm1, %v12198_v52  ;;  %13723 = vmatprep.subr.mxu0 %v13715_v46 }
 0x521   :  { %13724 = vmatpush3.msra.mxu0 %v13715_v46  ;;  %13727 = vmatprep.mubr.msk.f32.mxu0 %vm279_vm1, %v12209_v53  ;;  %v2107_v46 = vadd.f32 %v2106_v0, %v15550_v22 }
 0x522   :  { %13725 = vmatprep.subr.mxu0 %v3736_v47 }
 0x523   :  { %13726 = vmatpush3.msra.mxu0 %v3736_v47 }
 0x524   :  { %13728 = vmatmul.mubr.msk.f32.vlgmr.msra.gmra.mxu0 %vm279_vm1, %v12210_v54  ;;  %13743 = vmatprep.subr.mxu0 %v12222_v58 }
 0x525   :  { %13730 = vmatprep.mubr.msk.f32.mxu0 %vm279_vm1, %v12211_v55  ;;  %13744 = vmatpush3.msra.mxu0 %v12222_v58 }
 0x526   :  { %13745 = vmatprep.subr.mxu0 %v12221_v60 }
 0x527   :  { %13746 = vmatpush3.msra.mxu0 %v12221_v60 }
 0x528   :  { %13731 = vmatmul.mubr.msk.f32.gmra.mxu0 %vm279_vm1, %v12212_v56 }
 0x5a4   :  { %v13537_v2 = vpop.f32.mrf.mxu0 }
 0x5a5   :  { %v2306_v34 = vadd.f32 %v13537_v2, %v2102_v32 }
 0x5a6   :  { %v2286_v4 = vpop.f32.mrf.mxu0 }
 0x5a7   :  { %v2305_v37 = vadd.f32 %v2286_v4, %v2097_v21 }
 0x5a8   :  { %v13540_v7 = vpop.f32.mrf.mxu0 }
 0x5a9   :  { %v2308_v43 = vadd.f32 %v13540_v7, %v2112_v36  ;;  %v3873_v7 = vpop.permute.xlu1 %3872 }
 0x5aa   :  { %v2296_v8 = vpop.f32.mrf.mxu0 }
 0x5ab   :  { %v2307_v38 = vadd.f32 %v2296_v8, %v2107_v46 }
 0x5ac   :  { %v13561_v10 = vpop.f32.mrf.mxu0 }
 0x5ad   :  { %v2500_v41 = vadd.f32 %v13561_v10, %v2306_v34 }
 0x5ae   :  { %v2480_v11 = vpop.f32.mrf.mxu0 }
 0x5af   :  { %v2499_v44 = vadd.f32 %v2480_v11, %v2305_v37 }
 0x5b0   :  { %v13564_v12 = vpop.f32.mrf.mxu0 }
 0x5b1   :  { %v2502_v48 = vadd.f32 %v13564_v12, %v2308_v43  ;;  %v4093_v43 = vld [vmem:[#allocation6 + $0x20] sm:$0xff] }
 0x5b2   :  { %v2490_v13 = vpop.f32.mrf.mxu0 }
 0x5b3   :  { %v2501_v54 = vadd.f32 %v2490_v13, %v2307_v38 }
 0x5b4   :  { %v13585_v14 = vpop.f32.mrf.mxu0 }
 0x5b5   :  { %v2694_v45 = vadd.f32 %v13585_v14, %v2500_v41 }
 0x5b6   :  { %v2674_v15 = vpop.f32.mrf.mxu0 }
 0x5b7   :  { %v2693_v49 = vadd.f32 %v2674_v15, %v2499_v44  ;;  %v4000_v44 = vld [vmem:[#allocation6] sm:$0xff] }
 0x5b8   :  { %v13588_v16 = vpop.f32.mrf.mxu0 }
 0x5b9   :  { %v2696_v52 = vadd.f32 %v13588_v16, %v2502_v48  ;;  %v3868_v16 = vpop.permute.xlu0 %3867 }
 0x5ba   :  { %v2684_v17 = vpop.f32.mrf.mxu0 }
 0x5bb   :  { %v2695_v58 = vadd.f32 %v2684_v17, %v2501_v54  ;;  %v12236_v54 = vld [vmem:[%s16286_s11 + $0x28] sm:$0xff] }
 0x5bc   :  { %v13609_v18 = vpop.f32.mrf.mxu0 }
 0x5bd   :  { %v2888_v50 = vadd.f32 %v13609_v18, %v2694_v45  ;;  %v3878_v21 = vpop.permute.xlu0 %3877 }
 0x5be   :  { %v2868_v23 = vpop.f32.mrf.mxu0 }
 0x5bf   :  { %v2887_v39 = vadd.f32 %v2868_v23, %v2693_v49 }
 0x5c0   :  { %v13612_v24 = vpop.f32.mrf.mxu0 }
 0x5c1   :  { %v2890_v40 = vadd.f32 %v13612_v24, %v2696_v52  ;;  %v4094_v52 = vld [vmem:[#allocation6 + $0x28] sm:$0xff] }
 0x5c2   :  { %v2878_v25 = vpop.f32.mrf.mxu0 }
 0x5c3   :  { %v2889_v22 = vadd.f32 %v2878_v25, %v2695_v58  ;;  %v12246_v58 = vld [vmem:[%s16286_s11 + $0x38] sm:$0xff] }
 0x5c4   :  { %v13633_v26 = vpop.f32.mrf.mxu0 }
 0x5c5   :  { %v3082_v53 = vadd.f32 %v13633_v26, %v2888_v50 }
 0x5c6   :  { %v3062_v27 = vpop.f32.mrf.mxu0 }
 0x5c7   :  { %v3081_v56 = vadd.f32 %v3062_v27, %v2887_v39  ;;  %v4001_v39 = vld [vmem:[#allocation6 + $0x8] sm:$0xff] }
 0x5c8   :  { %v13636_v28 = vpop.f32.mrf.mxu0 }
 0x5c9   :  { %v3084_v60 = vadd.f32 %v13636_v28, %v2890_v40  ;;  %v3883_v28 = vpop.permute.xlu1 %3882  ;;  %v12235_v40 = vld [vmem:[%s16286_s11 + $0x20] sm:$0xff] }
 0x5ca   :  { %v3072_v19 = vpop.f32.mrf.mxu0 }
 0x5cb   :  { %v3083_v8 = vadd.f32 %v3072_v19, %v2889_v22  ;;  %v12265_v22 = vld [vmem:[%s16286_s11 + $0x50] sm:$0xff] }
 0x5cc   :  { %v13657_v29 = vpop.f32.mrf.mxu0 }
 0x5cd   :  { %v3276_v57 = vadd.f32 %v13657_v29, %v3082_v53  ;;  %v4095_v53 = vld [vmem:[#allocation6 + $0x30] sm:$0xff] }
 0x5ce   :  { %v3256_v30 = vpop.f32.mrf.mxu0 }
 0x5cf   :  { %v3275_v61 = vadd.f32 %v3256_v30, %v3081_v56  ;;  %v4096_v56 = vld [vmem:[#allocation6 + $0x38] sm:$0xff] }
 0x5d0   :  { %v13660_v20 = vpop.f32.mrf.mxu0 }
 0x5d1   :  { %v3278_v0 = vadd.f32 %v13660_v20, %v3084_v60  ;;  %v12256_v60 = vld [vmem:[%s16286_s11 + $0x48] sm:$0xff] }
 0x5d2   :  { %v3266_v31 = vpop.f32.mrf.mxu0 }
 0x5d3   :  { %v3277_v14 = vadd.f32 %v3266_v31, %v3083_v8  ;;  %v12295_v8 = vld [vmem:[%s16286_s11 + $0x80] sm:$0xff] }
 0x5d4   :  { %v13681_v33 = vpop.f32.mrf.mxu0 }
 0x5d5   :  { %v3470_v62 = vadd.f32 %v13681_v33, %v3276_v57  ;;  %v4003_v57 = vld [vmem:[#allocation6 + $0x18] sm:$0xff] }
 0x5d6   :  { %v3450_v35 = vpop.f32.mrf.mxu0 }
 0x5d7   :  { %v3469_v2 = vadd.f32 %v3450_v35, %v3275_v61  ;;  %v12255_v61 = vld [vmem:[%s16286_s11 + $0x40] sm:$0xff] }
 0x5d8   :  { %v13684_v42 = vpop.f32.mrf.mxu0 }
 0x5d9   :  { %v3472_v11 = vadd.f32 %v13684_v42, %v3278_v0  ;;  %v12275_v0 = vld [vmem:[%s16286_s11 + $0x60] sm:$0xff] }
 0x5da   :  { %v3460_v47 = vpop.f32.mrf.mxu0 }
 0x5db   :  { %v3471_v24 = vadd.f32 %v3460_v47, %v3277_v14  ;;  %v4380_v14 = vld [vmem:[#allocation6 + $0x40] sm:$0xff] }
 0x5dc   :  { %v13705_v51 = vpop.f32.mrf.mxu0 }
 0x5dd   :  { %v3664_v4 = vadd.f32 %v13705_v51, %v3470_v62  ;;  %v12266_v62 = vld [vmem:[%s16286_s11 + $0x58] sm:$0xff] }
 0x5de   :  { %v3644_v55 = vpop.f32.mrf.mxu0 }
 0x5df   :  { %v3663_v12 = vadd.f32 %v3644_v55, %v3469_v2  ;;  %v4002_v55 = vld [vmem:[#allocation6 + $0x10] sm:$0xff] }
 0x5e0   :  { %v13708_v59 = vpop.f32.mrf.mxu0  ;;  %v12286_v2 = vld [vmem:[%s16286_s11 + $0x78] sm:$0xff] }
 0x5e1   :  { %v3666_v18 = vadd.f32 %v13708_v59, %v3472_v11  ;;  %v12245_v59 = vld [vmem:[%s16286_s11 + $0x30] sm:$0xff] }
 0x5e2   :  { %v3654_v63 = vpop.f32.mrf.mxu0  ;;  %v12305_v11 = vld [vmem:[%s16286_s11 + $0x90] sm:$0xff] }
 0x5e3   :  { %v3665_v29 = vadd.f32 %v3654_v63, %v3471_v24  ;;  %v12276_v63 = vld [vmem:[%s16286_s11 + $0x68] sm:$0xff] }
 0x5e4   :  { %v13729_v10 = vpop.f32.mrf.mxu0 }
 0x5e5   :  { %v3858_v13 = vadd.f32 %v13729_v10, %v3664_v4  ;;  %v12285_v4 = vld [vmem:[%s16286_s11 + $0x70] sm:$0xff]  ;;  %v12306_v10 = vld [vmem:[%s16286_s11 + $0x98] sm:$0xff] }
 0x5e6   :  { %v3838_v15 = vpop.f32.mrf.mxu0 }
 0x5e7   :  { %v3886_v17 = vadd.f32 %v3873_v7, %v3858_v13  ;;  %v3857_v23 = vadd.f32 %v3838_v15, %v3663_v12  ;;  %v12296_v7 = vld [vmem:[%s16286_s11 + $0x88] sm:$0xff]  ;;  %v12315_v13 = vld [vmem:[%s16286_s11 + $0xa0] sm:$0xff] }
 0x5e8   :  { %v13732_v26 = vpop.f32.mrf.mxu0  ;;  %v12316_v12 = vld [vmem:[%s16286_s11 + $0xa8] sm:$0xff] }
 0x5e9   :  { %v3885_v27 = vadd.f32 %v3868_v16, %v3857_v23  ;;  %v3860_v25 = vadd.f32 %v13732_v26, %v3666_v18  ;;  %v3894_v30 = vmul.f32 0.01, %v3886_v17  ;;  %vm3890_vm9 = vcmp.ge.f32.partialorder %v3886_v17, 0.0 }
 0x5ea   :  { %v3848_v20 = vpop.f32.mrf.mxu0 }
 0x5eb   :  { %vm3889_vm10 = vcmp.ge.f32.partialorder %v3885_v27, 0.0  ;;  %v3893_v19 = vmul.f32 0.01, %v3885_v27  ;;  %v3888_v32 = vadd.f32 %v3883_v28, %v3860_v25  ;;  %v3859_v33 = vadd.f32 %v3848_v20, %v3665_v29  ;;  %v4381_v29 = vld [vmem:[#allocation6 + $0x48] sm:$0xff] }
 0x5ec   :  { %v15632_v34 = vsel %vm3890_vm9, %v3886_v17, %v3894_v30  ;;  %v4382_v30 = vld [vmem:[#allocation6 + $0x50] sm:$0xff] }
 0x5ed   :  { %v15630_v31 = vsel %vm3889_vm10, %v3885_v27, %v3893_v19  ;;  %v3887_v35 = vadd.f32 %v3878_v21, %v3859_v33  ;;  %v3896_v36 = vmul.f32 0.01, %v3888_v32  ;;  %vm3892_vm11 = vcmp.ge.f32.partialorder %v3888_v32, 0.0  ;;  %v4574_v33 = vld [vmem:[#allocation6 + $0x60] sm:$0xff] }
 0x5ee   :  { %13737 = vmatprep.mubr.msk.f32.mxu1 %vm1726_vm4, %v15630_v31  ;;  %13747 = vmatprep.mubr.msk.f32.mxu0 %vm1726_vm4, %v15630_v31 }
 0x5ef   :  { %13738 = vmatmul.mubr.msk.f32.vlgmr.msra.gmra.mxu1 %vm1726_vm4, %v15632_v34  ;;  %13748 = vmatmul.mubr.msk.f32.vlgmr.msra.gmra.mxu0 %vm1726_vm4, %v15632_v34  ;;  %vm3891_vm12 = vcmp.ge.f32.partialorder %v3887_v35, 0.0  ;;  %v3895_v37 = vmul.f32 0.01, %v3887_v35  ;;  %v15644_v42 = vsel %vm3892_vm11, %v3888_v32, %v3896_v36  ;;  %v4383_v32 = vld [vmem:[#allocation6 + $0x58] sm:$0xff] }
 0x5f1   :  { %v15642_v41 = vsel %vm3891_vm12, %v3887_v35, %v3895_v37  ;;  %v4576_v35 = vld [vmem:[#allocation6 + $0x70] sm:$0xff] }
 0x5f2   :  { %13740 = vmatprep.mubr.msk.f32.mxu1 %vm1726_vm4, %v15642_v41  ;;  %13750 = vmatprep.mubr.msk.f32.mxu0 %vm1726_vm4, %v15642_v41 }
 0x5f3   :  { %13741 = vmatmul.mubr.msk.f32.gmra.mxu1 %vm1726_vm4, %v15644_v42  ;;  %13751 = vmatmul.mubr.msk.f32.gmra.mxu0 %vm1726_vm4, %v15644_v42 }
 0x5f4   :  { %13761 = vmatprep.mubr.msk.f32.mxu1 %vm279_vm1, %v4093_v43  ;;  %13775 = vmatprep.mubr.msk.f32.mxu0 %vm279_vm1, %v4000_v44 }
 0x6af   :  { %v13739_v45 = vpop.f32.mrf.mxu1  ;;  %v13749_v46 = vpop.f32.mrf.mxu0 }
 0x6b1   :  { %v3981_v47 = vpop.f32.mrf.mxu1  ;;  %v4073_v48 = vpop.f32.mrf.mxu0 }
 0x6b3   :  { %v13742_v49 = vpop.f32.mrf.mxu1  ;;  %v13752_v50 = vpop.f32.mrf.mxu0 }
 0x6b4   :  { %13753 = vmatprep.subr.mxu1 %v13752_v50  ;;  %13767 = vmatprep.subr.mxu0 %v13742_v49 }
 0x6b5   :  { %v3991_v38 = vpop.f32.mrf.mxu1  ;;  %v4083_v51 = vpop.f32.mrf.mxu0  ;;  %13754 = vmatpush3.msra.mxu1 %v13752_v50  ;;  %13768 = vmatpush3.msra.mxu0 %v13742_v49  ;;  %v4771_v49 = vld [vmem:[#allocation6 + $0x98] sm:$0xff]  ;;  %v4962_v50 = vld [vmem:[#allocation6 + $0xa0] sm:$0xff] }
 0x6b6   :  { %13755 = vmatprep.subr.mxu1 %v4083_v51  ;;  %13769 = vmatprep.subr.mxu0 %v3991_v38 }
 0x6b7   :  { %13756 = vmatpush3.msra.mxu1 %v4083_v51  ;;  %13770 = vmatpush3.msra.mxu0 %v3991_v38 }
 0x6b8   :  { %13757 = vmatprep.subr.mxu1 %v13749_v46  ;;  %13771 = vmatprep.subr.mxu0 %v13739_v45 }
 0x6b9   :  { %13758 = vmatpush3.msra.mxu1 %v13749_v46  ;;  %13772 = vmatpush3.msra.mxu0 %v13739_v45  ;;  %v4769_v45 = vld [vmem:[#allocation6 + $0x88] sm:$0xff]  ;;  %v4770_v46 = vld [vmem:[#allocation6 + $0x90] sm:$0xff] }
 0x6ba   :  { %13759 = vmatprep.subr.mxu1 %v4073_v48  ;;  %13773 = vmatprep.subr.mxu0 %v3981_v47 }
 0x6bb   :  { %13760 = vmatpush3.msra.mxu1 %v4073_v48  ;;  %13774 = vmatpush3.msra.mxu0 %v3981_v47 }
 0x6bc   :  { %13762 = vmatmul.mubr.msk.f32.vlgmr.msra.gmra.mxu1 %vm279_vm1, %v4094_v52  ;;  %13776 = vmatmul.mubr.msk.f32.vlgmr.msra.gmra.mxu0 %vm279_vm1, %v4001_v39  ;;  %v4963_v52 = vld [vmem:[#allocation6 + $0xa8] sm:$0xff]  ;;  %v4964_v39 = vld [vmem:[#allocation6 + $0xb0] sm:$0xff] }
 0x6bd   :  { %13764 = vmatprep.mubr.msk.f32.mxu1 %vm279_vm1, %v4095_v53  ;;  %13781 = vmatprep.subr.mxu1 %v12236_v54 }
 0x6be   :  { %13782 = vmatpush3.msra.mxu1 %v12236_v54  ;;  %13778 = vmatprep.mubr.msk.f32.mxu0 %vm279_vm1, %v4002_v55  ;;  %v4965_v55 = vld [vmem:[#allocation6 + $0xb8] sm:$0xff] }
 0x6bf   :  { %13783 = vmatprep.subr.mxu1 %v12235_v40 }
 0x6c0   :  { %13765 = vmatmul.mubr.msk.f32.gmra.mxu1 %vm279_vm1, %v4096_v56  ;;  %13779 = vmatmul.mubr.msk.f32.gmra.mxu0 %vm279_vm1, %v4003_v57 }
 0x6c1   :  { %13785 = vmatprep.mubr.msk.f32.mxu1 %vm1726_vm4, %v15630_v31  ;;  %13784 = vmatpush3.msra.mxu1 %v12235_v40  ;;  %v5156_v40 = vld [vmem:[#allocation6 + $0xc0] sm:$0xff] }
 0x6c2   :  { %13805 = vmatprep.subr.mxu1 %v12246_v58  ;;  %13799 = vmatprep.mubr.msk.f32.mxu0 %vm279_vm1, %v4380_v14  ;;  %v5545_v14 = vld [vmem:[#allocation6 + $0x108] sm:$0xff] }
 0x6c4   :  { %13786 = vmatmul.mubr.msk.f32.vlgmr.msra.gmra.mxu1 %vm1726_vm4, %v15632_v34 }
 0x6c5   :  { %13788 = vmatprep.mubr.msk.f32.mxu1 %vm1726_vm4, %v15642_v41  ;;  %13806 = vmatpush3.msra.mxu1 %v12246_v58  ;;  %v5157_v58 = vld [vmem:[#allocation6 + $0xc8] sm:$0xff] }
 0x6c6   :  { %13807 = vmatprep.subr.mxu1 %v12245_v59 }
 0x6c7   :  { %13808 = vmatpush3.msra.mxu1 %v12245_v59  ;;  %v5158_v59 = vld [vmem:[#allocation6 + $0xd0] sm:$0xff] }
 0x6c8   :  { %13789 = vmatmul.mubr.msk.f32.gmra.mxu1 %vm1726_vm4, %v15644_v42  ;;  %13829 = vmatprep.subr.mxu1 %v12256_v60 }
 0x6c9   :  { %13809 = vmatprep.mubr.msk.f32.mxu1 %vm1726_vm4, %v15630_v31 }
 0x6cc   :  { %13810 = vmatmul.mubr.msk.f32.vlgmr.msra.gmra.mxu1 %vm1726_vm4, %v15632_v34 }
 0x6cd   :  { %13812 = vmatprep.mubr.msk.f32.mxu1 %vm1726_vm4, %v15642_v41  ;;  %13830 = vmatpush3.msra.mxu1 %v12256_v60 }
 0x6ce   :  { %13831 = vmatprep.subr.mxu1 %v12255_v61 }
 0x6cf   :  { %13832 = vmatpush3.msra.mxu1 %v12255_v61 }
 0x6d0   :  { %13813 = vmatmul.mubr.msk.f32.gmra.mxu1 %vm1726_vm4, %v15644_v42  ;;  %13853 = vmatprep.subr.mxu1 %v12266_v62 }
 0x6d1   :  { %13833 = vmatprep.mubr.msk.f32.mxu1 %vm1726_vm4, %v15630_v31 }
 0x6d4   :  { %13834 = vmatmul.mubr.msk.f32.vlgmr.msra.gmra.mxu1 %vm1726_vm4, %v15632_v34 }
 0x6d5   :  { %13836 = vmatprep.mubr.msk.f32.mxu1 %vm1726_vm4, %v15642_v41  ;;  %13854 = vmatpush3.msra.mxu1 %v12266_v62  ;;  %v5159_v62 = vld [vmem:[#allocation6 + $0xd8] sm:$0xff] }
 0x6d6   :  { %13855 = vmatprep.subr.mxu1 %v12265_v22 }
 0x6d7   :  { %13856 = vmatpush3.msra.mxu1 %v12265_v22  ;;  %v5350_v22 = vld [vmem:[#allocation6 + $0xe0] sm:$0xff] }
 0x6d8   :  { %13837 = vmatmul.mubr.msk.f32.gmra.mxu1 %vm1726_vm4, %v15644_v42  ;;  %13877 = vmatprep.subr.mxu1 %v12276_v63 }
 0x6d9   :  { %13857 = vmatprep.mubr.msk.f32.mxu1 %vm1726_vm4, %v15630_v31 }
 0x6dc   :  { %13858 = vmatmul.mubr.msk.f32.vlgmr.msra.gmra.mxu1 %vm1726_vm4, %v15632_v34 }
 0x6dd   :  { %13860 = vmatprep.mubr.msk.f32.mxu1 %vm1726_vm4, %v15642_v41  ;;  %13878 = vmatpush3.msra.mxu1 %v12276_v63 }
 0x6de   :  { %13879 = vmatprep.subr.mxu1 %v12275_v0 }
 0x6df   :  { %13880 = vmatpush3.msra.mxu1 %v12275_v0 }
 0x6e0   :  { %13861 = vmatmul.mubr.msk.f32.gmra.mxu1 %vm1726_vm4, %v15644_v42  ;;  %13901 = vmatprep.subr.mxu1 %v12286_v2 }
 0x6e1   :  { %13881 = vmatprep.mubr.msk.f32.mxu1 %vm1726_vm4, %v15630_v31 }
 0x6e4   :  { %13882 = vmatmul.mubr.msk.f32.vlgmr.msra.gmra.mxu1 %vm1726_vm4, %v15632_v34 }
 0x6e5   :  { %13884 = vmatprep.mubr.msk.f32.mxu1 %vm1726_vm4, %v15642_v41  ;;  %13902 = vmatpush3.msra.mxu1 %v12286_v2  ;;  %v5351_v2 = vld [vmem:[#allocation6 + $0xe8] sm:$0xff] }
 0x6e6   :  { %13903 = vmatprep.subr.mxu1 %v12285_v4 }
 0x6e7   :  { %13904 = vmatpush3.msra.mxu1 %v12285_v4  ;;  %v5352_v4 = vld [vmem:[#allocation6 + $0xf0] sm:$0xff] }
 0x6e8   :  { %13885 = vmatmul.mubr.msk.f32.gmra.mxu1 %vm1726_vm4, %v15644_v42  ;;  %13925 = vmatprep.subr.mxu1 %v12296_v7 }
 0x6e9   :  { %13905 = vmatprep.mubr.msk.f32.mxu1 %vm1726_vm4, %v15630_v31 }
 0x6ec   :  { %13906 = vmatmul.mubr.msk.f32.vlgmr.msra.gmra.mxu1 %vm1726_vm4, %v15632_v34 }
 0x6ed   :  { %13908 = vmatprep.mubr.msk.f32.mxu1 %vm1726_vm4, %v15642_v41  ;;  %13926 = vmatpush3.msra.mxu1 %v12296_v7 }
 0x6ee   :  { %13927 = vmatprep.subr.mxu1 %v12295_v8 }
 0x6ef   :  { %13928 = vmatpush3.msra.mxu1 %v12295_v8 }
 0x6f0   :  { %13909 = vmatmul.mubr.msk.f32.gmra.mxu1 %vm1726_vm4, %v15644_v42  ;;  %13949 = vmatprep.subr.mxu1 %v12306_v10 }
 0x6f1   :  { %13929 = vmatprep.mubr.msk.f32.mxu1 %vm1726_vm4, %v15630_v31 }
 0x6f4   :  { %13930 = vmatmul.mubr.msk.f32.vlgmr.msra.gmra.mxu1 %vm1726_vm4, %v15632_v34 }
 0x6f5   :  { %13932 = vmatprep.mubr.msk.f32.mxu1 %vm1726_vm4, %v15642_v41  ;;  %13950 = vmatpush3.msra.mxu1 %v12306_v10  ;;  %v5353_v10 = vld [vmem:[#allocation6 + $0xf8] sm:$0xff] }
 0x6f6   :  { %13951 = vmatprep.subr.mxu1 %v12305_v11 }
 0x6f7   :  { %13952 = vmatpush3.msra.mxu1 %v12305_v11  ;;  %v5544_v11 = vld [vmem:[#allocation6 + $0x100] sm:$0xff] }
 0x6f8   :  { %13933 = vmatmul.mubr.msk.f32.gmra.mxu1 %vm1726_vm4, %v15644_v42  ;;  %13973 = vmatprep.subr.mxu1 %v12316_v12 }
 0x6f9   :  { %13953 = vmatprep.mubr.msk.f32.mxu1 %vm1726_vm4, %v15630_v31 }
 0x6fc   :  { %13954 = vmatmul.mubr.msk.f32.vlgmr.msra.gmra.mxu1 %vm1726_vm4, %v15632_v34 }
 0x6fd   :  { %13956 = vmatprep.mubr.msk.f32.mxu1 %vm1726_vm4, %v15642_v41  ;;  %13974 = vmatpush3.msra.mxu1 %v12316_v12 }
 0x6fe   :  { %13975 = vmatprep.subr.mxu1 %v12315_v13 }
 0x6ff   :  { %13976 = vmatpush3.msra.mxu1 %v12315_v13 }
 0x700   :  { %13957 = vmatmul.mubr.msk.f32.gmra.mxu1 %vm1726_vm4, %v15644_v42 }
 0x701   :  { %13977 = vmatprep.mubr.msk.f32.mxu1 %vm1726_vm4, %v15630_v31 }
 0x704   :  { %13978 = vmatmul.mubr.msk.f32.vlgmr.msra.gmra.mxu1 %vm1726_vm4, %v15632_v34  ;;  %v4575_v34 = vld [vmem:[#allocation6 + $0x68] sm:$0xff] }
 0x705   :  { %13980 = vmatprep.mubr.msk.f32.mxu1 %vm1726_vm4, %v15642_v41  ;;  %v4577_v41 = vld [vmem:[#allocation6 + $0x78] sm:$0xff] }
 0x708   :  { %13981 = vmatmul.mubr.msk.f32.gmra.mxu1 %vm1726_vm4, %v15644_v42  ;;  %v4768_v42 = vld [vmem:[#allocation6 + $0x80] sm:$0xff] }
 0x77c   :  { %v15753_v15 = vpop.f32.mrf.mxu1 }
 0x77e   :  { %v15755_v16 = vpop.f32.mrf.mxu1 }
 0x780   :  { %v15757_v18 = vpop.f32.mrf.mxu1 }
 0x782   :  { %v15759_v17 = vpop.f32.mrf.mxu1 }
 0x784   :  { %v13787_v23 = vpop.f32.mrf.mxu1 }
 0x786   :  { %v4360_v24 = vpop.f32.mrf.mxu1 }
 0x788   :  { %v13790_v26 = vpop.f32.mrf.mxu1 }
 0x789   :  { %13791 = vmatprep.subr.mxu0 %v13790_v26 }
 0x78a   :  { %v4370_v27 = vpop.f32.mrf.mxu1  ;;  %13792 = vmatpush3.msra.mxu0 %v13790_v26 }
 0x78b   :  { %13793 = vmatprep.subr.mxu0 %v4370_v27 }
 0x78c   :  { %13794 = vmatpush3.msra.mxu0 %v4370_v27  ;;  %v13811_v25 = vpop.f32.mrf.mxu1  ;;  %v5547_v27 = vld [vmem:[#allocation6 + $0x118] sm:$0xff] }
 0x78d   :  { %13795 = vmatprep.subr.mxu0 %v13787_v23 }
 0x78e   :  { %13796 = vmatpush3.msra.mxu0 %v13787_v23  ;;  %v4554_v28 = vpop.f32.mrf.mxu1  ;;  %v5546_v23 = vld [vmem:[#allocation6 + $0x110] sm:$0xff] }
 0x78f   :  { %13797 = vmatprep.subr.mxu0 %v4360_v24 }
 0x790   :  { %13798 = vmatpush3.msra.mxu0 %v4360_v24  ;;  %v13814_v20 = vpop.f32.mrf.mxu1 }
 0x791   :  { %13800 = vmatmul.mubr.msk.f32.vlgmr.msra.gmra.mxu0 %vm279_vm1, %v4381_v29  ;;  %13815 = vmatprep.subr.mxu0 %v13814_v20 }
 0x792   :  { %v4564_v19 = vpop.f32.mrf.mxu1  ;;  %13816 = vmatpush3.msra.mxu0 %v13814_v20  ;;  %13802 = vmatprep.mubr.msk.f32.mxu0 %vm279_vm1, %v4382_v30  ;;  %v5739_v30 = vld [vmem:[#allocation6 + $0x128] sm:$0xff]  ;;  %v5740_v20 = vld [vmem:[#allocation6 + $0x130] sm:$0xff] }
 0x793   :  { %13817 = vmatprep.subr.mxu0 %v4564_v19 }
 0x794   :  { %13818 = vmatpush3.msra.mxu0 %v4564_v19  ;;  %v13835_v21 = vpop.f32.mrf.mxu1 }
 0x795   :  { %13803 = vmatmul.mubr.msk.f32.gmra.mxu0 %vm279_vm1, %v4383_v32  ;;  %13819 = vmatprep.subr.mxu0 %v13811_v25 }
 0x796   :  { %13820 = vmatpush3.msra.mxu0 %v13811_v25  ;;  %v4748_v31 = vpop.f32.mrf.mxu1  ;;  %13823 = vmatprep.mubr.msk.f32.mxu0 %vm279_vm1, %v4574_v33  ;;  %v5738_v25 = vld [vmem:[#allocation6 + $0x120] sm:$0xff]  ;;  %v5741_v33 = vld [vmem:[#allocation6 + $0x138] sm:$0xff] }
 0x797   :  { %13821 = vmatprep.subr.mxu0 %v4554_v28 }
 0x798   :  { %13822 = vmatpush3.msra.mxu0 %v4554_v28  ;;  %v13838_v36 = vpop.f32.mrf.mxu1 }
 0x799   :  { %13824 = vmatmul.mubr.msk.f32.vlgmr.msra.gmra.mxu0 %vm279_vm1, %v4575_v34  ;;  %13839 = vmatprep.subr.mxu0 %v13838_v36  ;;  %v5934_v34 = vld [vmem:[#allocation6 + $0x150] sm:$0xff] }
 0x79a   :  { %v4758_v37 = vpop.f32.mrf.mxu1  ;;  %13840 = vmatpush3.msra.mxu0 %v13838_v36  ;;  %13826 = vmatprep.mubr.msk.f32.mxu0 %vm279_vm1, %v4576_v35  ;;  %v5935_v35 = vld [vmem:[#allocation6 + $0x158] sm:$0xff]  ;;  %v6094_v36 = vld [vmem:[#allocation9 + $0x8] sm:$0xff] }
 0x79b   :  { %13841 = vmatprep.subr.mxu0 %v4758_v37  ;;  %13997 = vmatprep.subr.mxu1 %v6094_v36 }
 0x79c   :  { %13842 = vmatpush3.msra.mxu0 %v4758_v37  ;;  %v13859_v43 = vpop.f32.mrf.mxu1  ;;  %v6198_v37 = vld [vmem:[#allocation9 + $0x18] sm:$0xff]  ;;  %13998 = vmatpush3.msra.mxu1 %v6094_v36 }
 0x79d   :  { %13827 = vmatmul.mubr.msk.f32.gmra.mxu0 %vm279_vm1, %v4577_v41  ;;  %13843 = vmatprep.subr.mxu0 %v13835_v21  ;;  %v6093_v41 = vld [vmem:[#allocation9] sm:$0xff] }
 0x79e   :  { %13844 = vmatpush3.msra.mxu0 %v13835_v21  ;;  %v4942_v44 = vpop.f32.mrf.mxu1  ;;  %13847 = vmatprep.mubr.msk.f32.mxu0 %vm279_vm1, %v4768_v42  ;;  %v5932_v21 = vld [vmem:[#allocation6 + $0x140] sm:$0xff]  ;;  %v6197_v42 = vld [vmem:[#allocation9 + $0x10] sm:$0xff] }
 0x79f   :  { %13845 = vmatprep.subr.mxu0 %v4748_v31  ;;  %13999 = vmatprep.subr.mxu1 %v6093_v41 }
 0x7a0   :  { %13846 = vmatpush3.msra.mxu0 %v4748_v31  ;;  %v13862_v47 = vpop.f32.mrf.mxu1  ;;  %v5933_v31 = vld [vmem:[#allocation6 + $0x148] sm:$0xff]  ;;  %14000 = vmatpush3.msra.mxu1 %v6093_v41 }
 0x7a1   :  { %13848 = vmatmul.mubr.msk.f32.vlgmr.msra.gmra.mxu0 %vm279_vm1, %v4769_v45  ;;  %13863 = vmatprep.subr.mxu0 %v13862_v47 }
 0x7a2   :  { %v4952_v48 = vpop.f32.mrf.mxu1  ;;  %13864 = vmatpush3.msra.mxu0 %v13862_v47  ;;  %13850 = vmatprep.mubr.msk.f32.mxu0 %vm279_vm1, %v4770_v46 }
 0x7a3   :  { %13865 = vmatprep.subr.mxu0 %v4952_v48 }
 0x7a4   :  { %13866 = vmatpush3.msra.mxu0 %v4952_v48  ;;  %v13883_v38 = vpop.f32.mrf.mxu1 }
 0x7a5   :  { %13851 = vmatmul.mubr.msk.f32.gmra.mxu0 %vm279_vm1, %v4771_v49  ;;  %13867 = vmatprep.subr.mxu0 %v13859_v43 }
 0x7a6   :  { %13868 = vmatpush3.msra.mxu0 %v13859_v43  ;;  %v5136_v51 = vpop.f32.mrf.mxu1  ;;  %13871 = vmatprep.mubr.msk.f32.mxu0 %vm279_vm1, %v4962_v50  ;;  %v13777_v43 = vpop.f32.mrf.mxu0 }
 0x7a7   :  { %13869 = vmatprep.subr.mxu0 %v4942_v44 }
 0x7a8   :  { %13870 = vmatpush3.msra.mxu0 %v4942_v44  ;;  %v13886_v53 = vpop.f32.mrf.mxu1  ;;  %v4272_v44 = vpop.f32.mrf.mxu0 }
 0x7a9   :  { %13872 = vmatmul.mubr.msk.f32.vlgmr.msra.gmra.mxu0 %vm279_vm1, %v4963_v52  ;;  %13887 = vmatprep.subr.mxu0 %v13886_v53 }
 0x7aa   :  { %v5146_v54 = vpop.f32.mrf.mxu1  ;;  %13888 = vmatpush3.msra.mxu0 %v13886_v53  ;;  %13874 = vmatprep.mubr.msk.f32.mxu0 %vm279_vm1, %v4964_v39  ;;  %v13780_v45 = vpop.f32.mrf.mxu0 }
 0x7ab   :  { %13889 = vmatprep.subr.mxu0 %v5146_v54 }
 0x7ac   :  { %13890 = vmatpush3.msra.mxu0 %v5146_v54  ;;  %v13907_v56 = vpop.f32.mrf.mxu1  ;;  %v4282_v46 = vpop.f32.mrf.mxu0 }
 0x7ad   :  { %13875 = vmatmul.mubr.msk.f32.gmra.mxu0 %vm279_vm1, %v4965_v55  ;;  %13891 = vmatprep.subr.mxu0 %v13883_v38 }
 0x7ae   :  { %13892 = vmatpush3.msra.mxu0 %v13883_v38  ;;  %v5330_v57 = vpop.f32.mrf.mxu1  ;;  %13895 = vmatprep.mubr.msk.f32.mxu0 %vm279_vm1, %v5156_v40 }
 0x7af   :  { %13893 = vmatprep.subr.mxu0 %v5136_v51 }
 0x7b0   :  { %13894 = vmatpush3.msra.mxu0 %v5136_v51  ;;  %v13910_v60 = vpop.f32.mrf.mxu1 }
 0x7b1   :  { %13896 = vmatmul.mubr.msk.f32.vlgmr.msra.gmra.mxu0 %vm279_vm1, %v5157_v58  ;;  %13911 = vmatprep.subr.mxu0 %v13910_v60 }
 0x7b2   :  { %v5340_v61 = vpop.f32.mrf.mxu1  ;;  %13912 = vmatpush3.msra.mxu0 %v13910_v60  ;;  %13898 = vmatprep.mubr.msk.f32.mxu0 %vm279_vm1, %v5158_v59 }
 0x7b3   :  { %13913 = vmatprep.subr.mxu0 %v5340_v61 }
 0x7b4   :  { %13914 = vmatpush3.msra.mxu0 %v5340_v61  ;;  %v13931_v63 = vpop.f32.mrf.mxu1 }
 0x7b5   :  { %13899 = vmatmul.mubr.msk.f32.gmra.mxu0 %vm279_vm1, %v5159_v62  ;;  %13915 = vmatprep.subr.mxu0 %v13907_v56 }
 0x7b6   :  { %13916 = vmatpush3.msra.mxu0 %v13907_v56  ;;  %v5524_v0 = vpop.f32.mrf.mxu1  ;;  %13919 = vmatprep.mubr.msk.f32.mxu0 %vm279_vm1, %v5350_v22 }
 0x7b7   :  { %13917 = vmatprep.subr.mxu0 %v5330_v57 }
 0x7b8   :  { %13918 = vmatpush3.msra.mxu0 %v5330_v57  ;;  %v13934_v7 = vpop.f32.mrf.mxu1 }
 0x7b9   :  { %13920 = vmatmul.mubr.msk.f32.vlgmr.msra.gmra.mxu0 %vm279_vm1, %v5351_v2  ;;  %13935 = vmatprep.subr.mxu0 %v13934_v7 }
 0x7ba   :  { %v5534_v8 = vpop.f32.mrf.mxu1  ;;  %13936 = vmatpush3.msra.mxu0 %v13934_v7  ;;  %13922 = vmatprep.mubr.msk.f32.mxu0 %vm279_vm1, %v5352_v4  ;;  %v4278_v7 = vadd.f32 %v13777_v43, %v15753_v15 }
 0x7bb   :  { %13937 = vmatprep.subr.mxu0 %v5534_v8 }
 0x7bc   :  { %13938 = vmatpush3.msra.mxu0 %v5534_v8  ;;  %v13955_v12 = vpop.f32.mrf.mxu1 }
 0x7bd   :  { %13923 = vmatmul.mubr.msk.f32.gmra.mxu0 %vm279_vm1, %v5353_v10  ;;  %13939 = vmatprep.subr.mxu0 %v13931_v63  ;;  %v4273_v10 = vadd.f32 %v4272_v44, %v15755_v16 }
 0x7be   :  { %13940 = vmatpush3.msra.mxu0 %v13931_v63  ;;  %v5718_v13 = vpop.f32.mrf.mxu1  ;;  %13943 = vmatprep.mubr.msk.f32.mxu0 %vm279_vm1, %v5544_v11 }
 0x7bf   :  { %13941 = vmatprep.subr.mxu0 %v5524_v0 }
 0x7c0   :  { %13942 = vmatpush3.msra.mxu0 %v5524_v0  ;;  %v13958_v24 = vpop.f32.mrf.mxu1 }
 0x7c1   :  { %13944 = vmatmul.mubr.msk.f32.vlgmr.msra.gmra.mxu0 %vm279_vm1, %v5545_v14  ;;  %13959 = vmatprep.subr.mxu0 %v13958_v24  ;;  %v4288_v14 = vadd.f32 %v13780_v45, %v15757_v18 }
 0x7c2   :  { %v5728_v26 = vpop.f32.mrf.mxu1  ;;  %13960 = vmatpush3.msra.mxu0 %v13958_v24  ;;  %13946 = vmatprep.mubr.msk.f32.mxu0 %vm279_vm1, %v5546_v23 }
 0x7c3   :  { %13961 = vmatprep.subr.mxu0 %v5728_v26 }
 0x7c4   :  { %13962 = vmatpush3.msra.mxu0 %v5728_v26  ;;  %v13979_v28 = vpop.f32.mrf.mxu1  ;;  %v6044_v26 = vpop.permute.xlu1 %6043 }
 0x7c5   :  { %13947 = vmatmul.mubr.msk.f32.gmra.mxu0 %vm279_vm1, %v5547_v27  ;;  %13963 = vmatprep.subr.mxu0 %v13955_v12 }
 0x7c6   :  { %13964 = vmatpush3.msra.mxu0 %v13955_v12  ;;  %v5912_v29 = vpop.f32.mrf.mxu1  ;;  %13967 = vmatprep.mubr.msk.f32.mxu0 %vm279_vm1, %v5738_v25 }
 0x7c7   :  { %13965 = vmatprep.subr.mxu0 %v5718_v13 }
 0x7c8   :  { %13966 = vmatpush3.msra.mxu0 %v5718_v13  ;;  %v13982_v19 = vpop.f32.mrf.mxu1  ;;  %v1598_v13 = vpop.permute.xlu0 %1597 }
 0x7c9   :  { %13968 = vmatmul.mubr.msk.f32.vlgmr.msra.gmra.mxu0 %vm279_vm1, %v5739_v30  ;;  %13983 = vmatprep.subr.mxu0 %v13982_v19  ;;  %v4283_v30 = vadd.f32 %v4282_v46, %v15759_v17  ;;  %v6049_v18 = vpop.permute.xlu1 %6048 }
 0x7ca   :  { %v5922_v32 = vpop.f32.mrf.mxu1  ;;  %13984 = vmatpush3.msra.mxu0 %v13982_v19  ;;  %13970 = vmatprep.mubr.msk.f32.mxu0 %vm279_vm1, %v5740_v20 }
 0x7cb   :  { %13985 = vmatprep.subr.mxu0 %v5922_v32 }
 0x7cc   :  { %13986 = vmatpush3.msra.mxu0 %v5922_v32 }
 0x7cd   :  { %13971 = vmatmul.mubr.msk.f32.gmra.mxu0 %vm279_vm1, %v5741_v33  ;;  %13987 = vmatprep.subr.mxu0 %v13979_v28 }
 0x7ce   :  { %13988 = vmatpush3.msra.mxu0 %v13979_v28  ;;  %13991 = vmatprep.mubr.msk.f32.mxu0 %vm279_vm1, %v5932_v21  ;;  %v1603_v21 = vpop.permute.xlu0 %1602 }
 0x7cf   :  { %13989 = vmatprep.subr.mxu0 %v5912_v29 }
 0x7d0   :  { %13990 = vmatpush3.msra.mxu0 %v5912_v29 }
 0x7d1   :  { %13992 = vmatmul.mubr.msk.f32.vlgmr.msra.gmra.mxu0 %vm279_vm1, %v5933_v31  ;;  %14007 = vmatprep.subr.mxu0 %v6198_v37 }
 0x7d2   :  { %13994 = vmatprep.mubr.msk.f32.mxu0 %vm279_vm1, %v5934_v34  ;;  %14008 = vmatpush3.msra.mxu0 %v6198_v37 }
 0x7d3   :  { %14009 = vmatprep.subr.mxu0 %v6197_v42 }
 0x7d4   :  { %14010 = vmatpush3.msra.mxu0 %v6197_v42 }
 0x7d5   :  { %13995 = vmatmul.mubr.msk.f32.gmra.mxu0 %vm279_vm1, %v5935_v35 }
 0x851   :  { %v13801_v47 = vpop.f32.mrf.mxu0 }
 0x852   :  { %v4482_v11 = vadd.f32 %v13801_v47, %v4278_v7 }
 0x853   :  { %v4462_v48 = vpop.f32.mrf.mxu0 }
 0x854   :  { %v4481_v23 = vadd.f32 %v4462_v48, %v4273_v10 }
 0x855   :  { %v13804_v49 = vpop.f32.mrf.mxu0 }
 0x856   :  { %v4484_v25 = vadd.f32 %v13804_v49, %v4288_v14 }
 0x857   :  { %v4472_v50 = vpop.f32.mrf.mxu0 }
 0x858   :  { %v4483_v33 = vadd.f32 %v4472_v50, %v4283_v30 }
 0x859   :  { %v13825_v38 = vpop.f32.mrf.mxu0 }
 0x85a   :  { %v4676_v24 = vadd.f32 %v13825_v38, %v4482_v11  ;;  %v1608_v38 = vpop.permute.xlu0 %1607 }
 0x85b   :  { %v4656_v51 = vpop.f32.mrf.mxu0  ;;  %v1704_v30 = vadd.f32 %v15440_v9, %v1608_v38  ;;  %v6485_v38 = vld [vmem:[#allocation9 + $0x28] sm:$0xff] }
 0x85c   :  { %v4675_v28 = vadd.f32 %v4656_v51, %v4481_v23 }
 0x85d   :  { %v13828_v52 = vpop.f32.mrf.mxu0 }
 0x85e   :  { %v4678_v19 = vadd.f32 %v13828_v52, %v4484_v25  ;;  %v1613_v7 = vpop.permute.xlu0 %1612 }
 0x85f   :  { %v4666_v39 = vpop.f32.mrf.mxu0 }
 0x860   :  { %v4677_v36 = vadd.f32 %v4666_v39, %v4483_v33 }
 0x861   :  { %v13849_v53 = vpop.f32.mrf.mxu0 }
 0x862   :  { %v4870_v29 = vadd.f32 %v13849_v53, %v4676_v24  ;;  %v6054_v53 = vpop.permute.xlu1 %6053 }
 0x863   :  { %v4850_v54 = vpop.f32.mrf.mxu0 }
 0x864   :  { %v4869_v15 = vadd.f32 %v4850_v54, %v4675_v28 }
 0x865   :  { %v13852_v55 = vpop.f32.mrf.mxu0 }
 0x866   :  { %v4872_v31 = vadd.f32 %v13852_v55, %v4678_v19 }
 0x867   :  { %v4860_v40 = vpop.f32.mrf.mxu0 }
 0x868   :  { %v4871_v44 = vadd.f32 %v4860_v40, %v4677_v36  ;;  %v1699_v40 = vadd.f32 %v15432_v3, %v1603_v21  ;;  %v6192_v36 = vld [vmem:[#allocation8] sm:$0xff] }
 0x869   :  { %v13873_v56 = vpop.f32.mrf.mxu0 }
 0x86a   :  { %v5064_v32 = vadd.f32 %v13873_v56, %v4870_v29 }
 0x86b   :  { %v5044_v57 = vpop.f32.mrf.mxu0 }
 0x86c   :  { %v5063_v34 = vadd.f32 %v5044_v57, %v4869_v15 }
 0x86d   :  { %v13876_v58 = vpop.f32.mrf.mxu0 }
 0x86e   :  { %v5066_v41 = vadd.f32 %v13876_v58, %v4872_v31 }
 0x86f   :  { %v5054_v59 = vpop.f32.mrf.mxu0 }
 0x870   :  { %v5065_v48 = vadd.f32 %v5054_v59, %v4871_v44 }
 0x871   :  { %v13897_v60 = vpop.f32.mrf.mxu0 }
 0x872   :  { %v5258_v35 = vadd.f32 %v13897_v60, %v5064_v32 }
 0x873   :  { %v5238_v61 = vpop.f32.mrf.mxu0 }
 0x874   :  { %v5257_v42 = vadd.f32 %v5238_v61, %v5063_v34 }
 0x875   :  { %v13900_v62 = vpop.f32.mrf.mxu0 }
 0x876   :  { %v5260_v47 = vadd.f32 %v13900_v62, %v5066_v41 }
 0x877   :  { %v5248_v22 = vpop.f32.mrf.mxu0 }
 0x878   :  { %v5259_v54 = vadd.f32 %v5248_v22, %v5065_v48  ;;  %v6059_v22 = vpop.permute.xlu1 %6058  ;;  %v6193_v48 = vld [vmem:[#allocation8 + $0x8] sm:$0xff] }
 0x879   :  { %v13921_v63 = vpop.f32.mrf.mxu0 }
 0x87a   :  { %v5452_v43 = vadd.f32 %v13921_v63, %v5258_v35 }
 0x87b   :  { %v5432_v0 = vpop.f32.mrf.mxu0 }
 0x87c   :  { %v5451_v17 = vadd.f32 %v5432_v0, %v5257_v42 }
 0x87d   :  { %v13924_v2 = vpop.f32.mrf.mxu0 }
 0x87e   :  { %v5454_v50 = vadd.f32 %v13924_v2, %v5260_v47  ;;  %v1694_v2 = vadd.f32 %v15434_v5, %v1598_v13 }
 0x87f   :  { %v5442_v4 = vpop.f32.mrf.mxu0 }
 0x880   :  { %v5453_v58 = vadd.f32 %v5442_v4, %v5259_v54  ;;  %v6679_v54 = vld [vmem:[#allocation9 + $0x38] sm:$0xff] }
 0x881   :  { %v13945_v8 = vpop.f32.mrf.mxu0 }
 0x882   :  { %v5646_v46 = vadd.f32 %v13945_v8, %v5452_v43 }
 0x883   :  { %v5626_v12 = vpop.f32.mrf.mxu0 }
 0x884   :  { %v5645_v51 = vadd.f32 %v5626_v12, %v5451_v17  ;;  %v1709_v12 = vadd.f32 %v15436_v6, %v1613_v7 }
 0x885   :  { %v13948_v27 = vpop.f32.mrf.mxu0 }
 0x886   :  { %v5648_v56 = vadd.f32 %v13948_v27, %v5454_v50  ;;  %v6194_v50 = vld [vmem:[#allocation8 + $0x10] sm:$0xff] }
 0x887   :  { %v5636_v20 = vpop.f32.mrf.mxu0 }
 0x888   :  { %v5647_v0 = vadd.f32 %v5636_v20, %v5453_v58  ;;  %v7066_v58 = vld [vmem:[#allocation9 + $0x50] sm:$0xff] }
 0x889   :  { %v13969_v16 = vpop.f32.mrf.mxu0 }
 0x88a   :  { %v5840_v52 = vadd.f32 %v13969_v16, %v5646_v46  ;;  %v6286_v46 = vld [vmem:[#allocation8 + $0x28] sm:$0xff] }
 0x88b   :  { %v5820_v37 = vpop.f32.mrf.mxu0 }
 0x88c   :  { %v5839_v39 = vadd.f32 %v5820_v37, %v5645_v51  ;;  %v6484_v51 = vld [vmem:[#allocation9 + $0x20] sm:$0xff] }
 0x88d   :  { %v13972_v45 = vpop.f32.mrf.mxu0 }
 0x88e   :  { %v5842_v61 = vadd.f32 %v13972_v45, %v5648_v56  ;;  %v6873_v56 = vld [vmem:[#allocation9 + $0x48] sm:$0xff] }
 0x88f   :  { %v5830_v49 = vpop.f32.mrf.mxu0 }
 0x890   :  { %v5841_v14 = vadd.f32 %v5830_v49, %v5647_v0  ;;  %v6287_v49 = vld [vmem:[#allocation8 + $0x30] sm:$0xff] }
 0x891   :  { %v13993_v55 = vpop.f32.mrf.mxu0 }
 0x892   :  { %v6034_v57 = vadd.f32 %v13993_v55, %v5840_v52  ;;  %v6288_v52 = vld [vmem:[#allocation8 + $0x38] sm:$0xff]  ;;  %v6678_v55 = vld [vmem:[#allocation9 + $0x30] sm:$0xff] }
 0x893   :  { %v6014_v60 = vpop.f32.mrf.mxu0 }
 0x894   :  { %v6062_v62 = vadd.f32 %v6049_v18, %v6034_v57  ;;  %v6033_v63 = vadd.f32 %v6014_v60, %v5839_v39  ;;  %v6285_v18 = vld [vmem:[#allocation8 + $0x20] sm:$0xff]  ;;  %v7067_v57 = vld [vmem:[#allocation9 + $0x58] sm:$0xff]  ;;  %v7261_v60 = vld [vmem:[#allocation9 + $0x68] sm:$0xff] }
 0x895   :  { %v13996_v59 = vpop.f32.mrf.mxu0  ;;  %v6872_v39 = vld [vmem:[#allocation9 + $0x40] sm:$0xff] }
 0x896   :  { %v6066_v8 = vadd.f32 %v6062_v62, %v1699_v40  ;;  %v6061_v10 = vadd.f32 %v6044_v26, %v6033_v63  ;;  %v6036_v11 = vadd.f32 %v13996_v59, %v5842_v61  ;;  %v7260_v40 = vld [vmem:[#allocation9 + $0x60] sm:$0xff] }
 0x897   :  { %v6024_v23 = vpop.f32.mrf.mxu0  ;;  %v6572_v61 = vld [vmem:[#allocation8 + $0x40] sm:$0xff] }
 0x898   :  { %vm6070_vm13 = vcmp.ge.f32.partialorder %v6066_v8, 0.0  ;;  %v6074_v4 = vmul.f32 0.01, %v6066_v8  ;;  %v6065_v24 = vadd.f32 %v6061_v10, %v1694_v2  ;;  %v6064_v3 = vadd.f32 %v6059_v22, %v6036_v11 }
 0x899   :  { %v6035_v27 = vadd.f32 %v6024_v23, %v5841_v14  ;;  %v6574_v14 = vld [vmem:[#allocation8 + $0x50] sm:$0xff] }
 0x89a   :  { %v6078_v25 = vsel %vm6070_vm13, %v6066_v8, %v6074_v4  ;;  %vm6069_vm14 = vcmp.ge.f32.partialorder %v6065_v24, 0.0  ;;  %v6073_v28 = vmul.f32 0.01, %v6065_v24  ;;  %v6068_v29 = vadd.f32 %v6064_v3, %v1709_v12  ;;  %v6573_v12 = vld [vmem:[#allocation8 + $0x48] sm:$0xff]  ;;  %v6766_v3 = vld [vmem:[#allocation8 + $0x60] sm:$0xff] }
 0x89b   :  { %v6063_v5 = vadd.f32 %v6054_v53, %v6035_v27  ;;  %v6086_v20 = vmul.f32 0.01, %v6078_v25  ;;  %vm6082_vm3 = vcmp.ge.f32.partialorder %v6078_v25, 0.0  ;;  %v6195_v53 = vld [vmem:[#allocation8 + $0x18] sm:$0xff] }
 0x89c   :  { %v6077_v13 = vsel %vm6069_vm14, %v6065_v24, %v6073_v28  ;;  %vm6072_vm15 = vcmp.ge.f32.partialorder %v6068_v29, 0.0  ;;  %v6076_v26 = vmul.f32 0.01, %v6068_v29  ;;  %v6575_v24 = vld [vmem:[#allocation8 + $0x58] sm:$0xff]  ;;  %v6767_v28 = vld [vmem:[#allocation8 + $0x68] sm:$0xff] }
 0x89d   :  { %vm6081_vm2 = vcmp.ge.f32.partialorder %v6077_v13, 0.0  ;;  %v6085_v6 = vmul.f32 0.01, %v6077_v13  ;;  %v6067_v19 = vadd.f32 %v6063_v5, %v1704_v30  ;;  %v15806_v16 = vsel %vm6082_vm3, %v6078_v25, %v6086_v20 }
 0x89e   :  { %v6080_v15 = vsel %vm6072_vm15, %v6068_v29, %v6076_v26  ;;  %v6768_v29 = vld [vmem:[#allocation8 + $0x70] sm:$0xff]  ;;  %v6960_v26 = vld [vmem:[#allocation8 + $0x80] sm:$0xff] }
 0x89f   :  { %vm6071_vm5 = vcmp.ge.f32.partialorder %v6067_v19, 0.0  ;;  %v6075_v32 = vmul.f32 0.01, %v6067_v19  ;;  %v15804_v33 = vsel %vm6081_vm2, %v6077_v13, %v6085_v6  ;;  %v6088_v21 = vmul.f32 0.01, %v6080_v15  ;;  %v6769_v13 = vld [vmem:[#allocation8 + $0x78] sm:$0xff] }
 0x8a0   :  { %14001 = vmatprep.mubr.msk.f32.mxu1 %vm1726_vm4, %v15804_v33  ;;  %14011 = vmatprep.mubr.msk.f32.mxu0 %vm1726_vm4, %v15804_v33  ;;  %vm6084_vm6 = vcmp.ge.f32.partialorder %v6080_v15, 0.0 }
 0x8a1   :  { %v6079_v31 = vsel %vm6071_vm5, %v6067_v19, %v6075_v32  ;;  %14002 = vmatmul.mubr.msk.f32.vlgmr.msra.gmra.mxu1 %vm1726_vm4, %v15806_v16  ;;  %14012 = vmatmul.mubr.msk.f32.vlgmr.msra.gmra.mxu0 %vm1726_vm4, %v15806_v16  ;;  %v15818_v35 = vsel %vm6084_vm6, %v6080_v15, %v6088_v21  ;;  %v6961_v19 = vld [vmem:[#allocation8 + $0x88] sm:$0xff]  ;;  %v6962_v15 = vld [vmem:[#allocation8 + $0x90] sm:$0xff]  ;;  %v7154_v21 = vld [vmem:[#allocation8 + $0xa0] sm:$0xff] }
 0x8a2   :  { %vm6083_vm7 = vcmp.ge.f32.partialorder %v6079_v31, 0.0  ;;  %v6087_v9 = vmul.f32 0.01, %v6079_v31 }
 0x8a4   :  { %v15816_v34 = vsel %vm6083_vm7, %v6079_v31, %v6087_v9 }
 0x8a5   :  { %14004 = vmatprep.mubr.msk.f32.mxu1 %vm1726_vm4, %v15816_v34  ;;  %14014 = vmatprep.mubr.msk.f32.mxu0 %vm1726_vm4, %v15816_v34 }
 0x8a6   :  { %14005 = vmatmul.mubr.msk.f32.gmra.mxu1 %vm1726_vm4, %v15818_v35  ;;  %14015 = vmatmul.mubr.msk.f32.gmra.mxu0 %vm1726_vm4, %v15818_v35 }
 0x8a7   :  { %14025 = vmatprep.mubr.msk.f32.mxu1 %vm279_vm1, %v6285_v18  ;;  %14039 = vmatprep.mubr.msk.f32.mxu0 %vm279_vm1, %v6192_v36 }
 0x961   :  { %v14003_v37 = vpop.f32.mrf.mxu1  ;;  %v14013_v41 = vpop.f32.mrf.mxu0 }
 0x963   :  { %v6173_v42 = vpop.f32.mrf.mxu1  ;;  %v6265_v43 = vpop.f32.mrf.mxu0 }
 0x966   :  { %v14006_v44 = vpop.f32.mrf.mxu1  ;;  %v14016_v45 = vpop.f32.mrf.mxu0 }
 0x967   :  { %14017 = vmatprep.subr.mxu1 %v14016_v45  ;;  %14031 = vmatprep.subr.mxu0 %v14006_v44 }
 0x968   :  { %v6183_v47 = vpop.f32.mrf.mxu1  ;;  %v6275_v17 = vpop.f32.mrf.mxu0  ;;  %14018 = vmatpush3.msra.mxu1 %v14016_v45  ;;  %14032 = vmatpush3.msra.mxu0 %v14006_v44  ;;  %v7351_v44 = vld [vmem:[#allocation8 + $0xd8] sm:$0xff]  ;;  %v7618_v45 = vld [vmem:[#allocation14] sm:$0xff] }
 0x969   :  { %14019 = vmatprep.subr.mxu1 %v6275_v17  ;;  %14033 = vmatprep.subr.mxu0 %v6183_v47 }
 0x96a   :  { %14020 = vmatpush3.msra.mxu1 %v6275_v17  ;;  %14034 = vmatpush3.msra.mxu0 %v6183_v47  ;;  %v7481_v47 = vld [vmem:[#allocation11] sm:$0xff] }
 0x96b   :  { %14021 = vmatprep.subr.mxu1 %v14013_v41  ;;  %14035 = vmatprep.subr.mxu0 %v14003_v37 }
 0x96c   :  { %14022 = vmatpush3.msra.mxu1 %v14013_v41  ;;  %14036 = vmatpush3.msra.mxu0 %v14003_v37  ;;  %v7157_v37 = vld [vmem:[#allocation8 + $0xb8] sm:$0xff]  ;;  %v7348_v41 = vld [vmem:[#allocation8 + $0xc0] sm:$0xff] }
 0x96d   :  { %14023 = vmatprep.subr.mxu1 %v6265_v43  ;;  %14037 = vmatprep.subr.mxu0 %v6173_v42 }
 0x96e   :  { %14024 = vmatpush3.msra.mxu1 %v6265_v43  ;;  %14038 = vmatpush3.msra.mxu0 %v6173_v42  ;;  %v7349_v42 = vld [vmem:[#allocation8 + $0xc8] sm:$0xff]  ;;  %v7350_v43 = vld [vmem:[#allocation8 + $0xd0] sm:$0xff] }
 0x96f   :  { %14026 = vmatmul.mubr.msk.f32.vlgmr.msra.gmra.mxu1 %vm279_vm1, %v6286_v46  ;;  %14040 = vmatmul.mubr.msk.f32.vlgmr.msra.gmra.mxu0 %vm279_vm1, %v6193_v48 }
 0x970   :  { %14028 = vmatprep.mubr.msk.f32.mxu1 %vm279_vm1, %v6287_v49  ;;  %14045 = vmatprep.subr.mxu1 %v6485_v38 }
 0x971   :  { %14046 = vmatpush3.msra.mxu1 %v6485_v38  ;;  %14042 = vmatprep.mubr.msk.f32.mxu0 %vm279_vm1, %v6194_v50 }
 0x972   :  { %14047 = vmatprep.subr.mxu1 %v6484_v51 }
 0x973   :  { %14029 = vmatmul.mubr.msk.f32.gmra.mxu1 %vm279_vm1, %v6288_v52  ;;  %14043 = vmatmul.mubr.msk.f32.gmra.mxu0 %vm279_vm1, %v6195_v53 }
 0x974   :  { %14049 = vmatprep.mubr.msk.f32.mxu1 %vm1726_vm4, %v15804_v33  ;;  %14048 = vmatpush3.msra.mxu1 %v6484_v51 }
 0x975   :  { %14069 = vmatprep.subr.mxu1 %v6679_v54  ;;  %14063 = vmatprep.mubr.msk.f32.mxu0 %vm279_vm1, %v6572_v61 }
 0x977   :  { %14050 = vmatmul.mubr.msk.f32.vlgmr.msra.gmra.mxu1 %vm1726_vm4, %v15806_v16 }
 0x978   :  { %14052 = vmatprep.mubr.msk.f32.mxu1 %vm1726_vm4, %v15816_v34  ;;  %14070 = vmatpush3.msra.mxu1 %v6679_v54 }
 0x979   :  { %14071 = vmatprep.subr.mxu1 %v6678_v55 }
 0x97a   :  { %14072 = vmatpush3.msra.mxu1 %v6678_v55 }
 0x97b   :  { %14053 = vmatmul.mubr.msk.f32.gmra.mxu1 %vm1726_vm4, %v15818_v35  ;;  %14093 = vmatprep.subr.mxu1 %v6873_v56 }
 0x97c   :  { %14073 = vmatprep.mubr.msk.f32.mxu1 %vm1726_vm4, %v15804_v33 }
 0x97f   :  { %14074 = vmatmul.mubr.msk.f32.vlgmr.msra.gmra.mxu1 %vm1726_vm4, %v15806_v16 }
 0x980   :  { %14076 = vmatprep.mubr.msk.f32.mxu1 %vm1726_vm4, %v15816_v34  ;;  %14094 = vmatpush3.msra.mxu1 %v6873_v56 }
 0x981   :  { %14095 = vmatprep.subr.mxu1 %v6872_v39 }
 0x982   :  { %14096 = vmatpush3.msra.mxu1 %v6872_v39 }
 0x983   :  { %14077 = vmatmul.mubr.msk.f32.gmra.mxu1 %vm1726_vm4, %v15818_v35  ;;  %14117 = vmatprep.subr.mxu1 %v7067_v57 }
 0x984   :  { %14097 = vmatprep.mubr.msk.f32.mxu1 %vm1726_vm4, %v15804_v33 }
 0x987   :  { %14098 = vmatmul.mubr.msk.f32.vlgmr.msra.gmra.mxu1 %vm1726_vm4, %v15806_v16 }
 0x988   :  { %14100 = vmatprep.mubr.msk.f32.mxu1 %vm1726_vm4, %v15816_v34  ;;  %14118 = vmatpush3.msra.mxu1 %v7067_v57 }
 0x989   :  { %14119 = vmatprep.subr.mxu1 %v7066_v58 }
 0x98a   :  { %14120 = vmatpush3.msra.mxu1 %v7066_v58 }
 0x98b   :  { %14101 = vmatmul.mubr.msk.f32.gmra.mxu1 %vm1726_vm4, %v15818_v35  ;;  %14141 = vmatprep.subr.mxu1 %v7261_v60 }
 0x98c   :  { %14121 = vmatprep.mubr.msk.f32.mxu1 %vm1726_vm4, %v15804_v33 }
 0x98f   :  { %14122 = vmatmul.mubr.msk.f32.vlgmr.msra.gmra.mxu1 %vm1726_vm4, %v15806_v16 }
 0x990   :  { %14124 = vmatprep.mubr.msk.f32.mxu1 %vm1726_vm4, %v15816_v34  ;;  %14142 = vmatpush3.msra.mxu1 %v7261_v60 }
 0x991   :  { %14143 = vmatprep.subr.mxu1 %v7260_v40 }
 0x992   :  { %14144 = vmatpush3.msra.mxu1 %v7260_v40 }
 0x993   :  { %14125 = vmatmul.mubr.msk.f32.gmra.mxu1 %vm1726_vm4, %v15818_v35 }
 0x994   :  { %14145 = vmatprep.mubr.msk.f32.mxu1 %vm1726_vm4, %v15804_v33 }
 0x997   :  { %14146 = vmatmul.mubr.msk.f32.vlgmr.msra.gmra.mxu1 %vm1726_vm4, %v15806_v16  ;;  %v6963_v16 = vld [vmem:[#allocation8 + $0x98] sm:$0xff] }
 0x998   :  { %14148 = vmatprep.mubr.msk.f32.mxu1 %vm1726_vm4, %v15816_v34  ;;  %v7155_v34 = vld [vmem:[#allocation8 + $0xa8] sm:$0xff] }
 0x99b   :  { %14149 = vmatmul.mubr.msk.f32.gmra.mxu1 %vm1726_vm4, %v15818_v35  ;;  %v7156_v35 = vld [vmem:[#allocation8 + $0xb0] sm:$0xff]  ;;  %vm7619_vm4 = vcmask 64512  }
 0x99c   :  { %14173 = vmatprep.mubr.msk.f32.mxu1 %vm279_vm1, %v7481_v47 }
 0xa2f   :  { %v15877_v62 = vpop.f32.mrf.mxu1  ;;  %v14041_v17 = vpop.f32.mrf.mxu0 }
 0xa30   :  { %v6470_v40 = vadd.f32 %v14041_v17, %v15877_v62 }
 0xa31   :  { %v15879_v63 = vpop.f32.mrf.mxu1  ;;  %v6464_v46 = vpop.f32.mrf.mxu0 }
 0xa33   :  { %v15881_v0 = vpop.f32.mrf.mxu1  ;;  %v14044_v48 = vpop.f32.mrf.mxu0 }
 0xa35   :  { %v15883_v59 = vpop.f32.mrf.mxu1  ;;  %v6474_v49 = vpop.f32.mrf.mxu0 }
 0xa37   :  { %v14051_v7 = vpop.f32.mrf.mxu1 }
 0xa39   :  { %v6552_v2 = vpop.f32.mrf.mxu1 }
 0xa3b   :  { %v14054_v8 = vpop.f32.mrf.mxu1 }
 0xa3c   :  { %14055 = vmatprep.subr.mxu0 %v14054_v8 }
 0xa3d   :  { %v6562_v10 = vpop.f32.mrf.mxu1  ;;  %14056 = vmatpush3.msra.mxu0 %v14054_v8 }
 0xa3e   :  { %14057 = vmatprep.subr.mxu0 %v6562_v10 }
 0xa3f   :  { %14058 = vmatpush3.msra.mxu0 %v6562_v10  ;;  %v14075_v11 = vpop.f32.mrf.mxu1  ;;  %v6480_v10 = vadd.f32 %v14044_v48, %v15881_v0  ;;  %v7722_v48 = vld [vmem:[#allocation14 + $0x8] sm:$0xff] }
 0xa40   :  { %14059 = vmatprep.subr.mxu0 %v14051_v7 }
 0xa41   :  { %14060 = vmatpush3.msra.mxu0 %v14051_v7  ;;  %v6746_v22 = vpop.f32.mrf.mxu1  ;;  %v6465_v7 = vadd.f32 %v6464_v46, %v15879_v63  ;;  %v7482_v46 = vld [vmem:[#allocation11 + $0x8] sm:$0xff] }
 0xa42   :  { %14061 = vmatprep.subr.mxu0 %v6552_v2 }
 0xa43   :  { %14062 = vmatpush3.msra.mxu0 %v6552_v2  ;;  %v14078_v23 = vpop.f32.mrf.mxu1 }
 0xa44   :  { %14064 = vmatmul.mubr.msk.f32.vlgmr.msra.gmra.mxu0 %vm279_vm1, %v6573_v12  ;;  %14079 = vmatprep.subr.mxu0 %v14078_v23  ;;  %v7475_v12 = vpop.permute.xlu0 %7474 }
 0xa45   :  { %v6756_v4 = vpop.f32.mrf.mxu1  ;;  %14080 = vmatpush3.msra.mxu0 %v14078_v23  ;;  %14066 = vmatprep.mubr.msk.f32.mxu0 %vm279_vm1, %v6574_v14  ;;  %v6475_v23 = vadd.f32 %v6474_v49, %v15883_v59  ;;  %v7483_v49 = vld [vmem:[#allocation11 + $0x10] sm:$0xff] }
 0xa46   :  { %14081 = vmatprep.subr.mxu0 %v6756_v4 }
 0xa47   :  { %14082 = vmatpush3.msra.mxu0 %v6756_v4  ;;  %v14099_v27 = vpop.f32.mrf.mxu1 }
 0xa48   :  { %14067 = vmatmul.mubr.msk.f32.gmra.mxu0 %vm279_vm1, %v6575_v24  ;;  %14083 = vmatprep.subr.mxu0 %v14075_v11 }
 0xa49   :  { %14084 = vmatpush3.msra.mxu0 %v14075_v11  ;;  %v6940_v25 = vpop.f32.mrf.mxu1  ;;  %14087 = vmatprep.mubr.msk.f32.mxu0 %vm279_vm1, %v6766_v3 }
 0xa4a   :  { %14085 = vmatprep.subr.mxu0 %v6746_v22 }
 0xa4b   :  { %14086 = vmatpush3.msra.mxu0 %v6746_v22  ;;  %v14102_v30 = vpop.f32.mrf.mxu1 }
 0xa4c   :  { %14088 = vmatmul.mubr.msk.f32.vlgmr.msra.gmra.mxu0 %vm279_vm1, %v6767_v28  ;;  %14103 = vmatprep.subr.mxu0 %v14102_v30 }
 0xa4d   :  { %v6950_v5 = vpop.f32.mrf.mxu1  ;;  %14104 = vmatpush3.msra.mxu0 %v14102_v30  ;;  %14090 = vmatprep.mubr.msk.f32.mxu0 %vm279_vm1, %v6768_v29 }
 0xa4e   :  { %14105 = vmatprep.subr.mxu0 %v6950_v5 }
 0xa4f   :  { %14106 = vmatpush3.msra.mxu0 %v6950_v5  ;;  %v14123_v20 = vpop.f32.mrf.mxu1 }
 0xa50   :  { %14091 = vmatmul.mubr.msk.f32.gmra.mxu0 %vm279_vm1, %v6769_v13  ;;  %14107 = vmatprep.subr.mxu0 %v14099_v27 }
 0xa51   :  { %14108 = vmatpush3.msra.mxu0 %v14099_v27  ;;  %v7134_v6 = vpop.f32.mrf.mxu1  ;;  %14111 = vmatprep.mubr.msk.f32.mxu0 %vm279_vm1, %v6960_v26  ;;  %v7470_v27 = vpop.permute.xlu1 %7469 }
 0xa52   :  { %14109 = vmatprep.subr.mxu0 %v6940_v25 }
 0xa53   :  { %14110 = vmatpush3.msra.mxu0 %v6940_v25  ;;  %v14126_v32 = vpop.f32.mrf.mxu1 }
 0xa54   :  { %14112 = vmatmul.mubr.msk.f32.vlgmr.msra.gmra.mxu0 %vm279_vm1, %v6961_v19  ;;  %14127 = vmatprep.subr.mxu0 %v14126_v32 }
 0xa55   :  { %v7144_v33 = vpop.f32.mrf.mxu1  ;;  %14128 = vmatpush3.msra.mxu0 %v14126_v32  ;;  %14114 = vmatprep.mubr.msk.f32.mxu0 %vm279_vm1, %v6962_v15 }
 0xa56   :  { %14129 = vmatprep.subr.mxu0 %v7144_v33 }
 0xa57   :  { %14130 = vmatpush3.msra.mxu0 %v7144_v33  ;;  %v14147_v31 = vpop.f32.mrf.mxu1  ;;  %v7460_v33 = vpop.permute.xlu1 %7459 }
 0xa58   :  { %14115 = vmatmul.mubr.msk.f32.gmra.mxu0 %vm279_vm1, %v6963_v16  ;;  %14131 = vmatprep.subr.mxu0 %v14123_v20 }
 0xa59   :  { %14132 = vmatpush3.msra.mxu0 %v14123_v20  ;;  %v7328_v9 = vpop.f32.mrf.mxu1  ;;  %14135 = vmatprep.mubr.msk.f32.mxu0 %vm279_vm1, %v7154_v21  ;;  %v7465_v20 = vpop.permute.xlu0 %7464 }
 0xa5a   :  { %14133 = vmatprep.subr.mxu0 %v7134_v6 }
 0xa5b   :  { %14134 = vmatpush3.msra.mxu0 %v7134_v6  ;;  %v14150_v18 = vpop.f32.mrf.mxu1 }
 0xa5c   :  { %14136 = vmatmul.mubr.msk.f32.vlgmr.msra.gmra.mxu0 %vm279_vm1, %v7155_v34  ;;  %14151 = vmatprep.subr.mxu0 %v14150_v18 }
 0xa5d   :  { %v7338_v36 = vpop.f32.mrf.mxu1  ;;  %14152 = vmatpush3.msra.mxu0 %v14150_v18  ;;  %14138 = vmatprep.mubr.msk.f32.mxu0 %vm279_vm1, %v7156_v35 }
 0xa5e   :  { %14153 = vmatprep.subr.mxu0 %v7338_v36 }
 0xa5f   :  { %14154 = vmatpush3.msra.mxu0 %v7338_v36 }
 0xa60   :  { %14139 = vmatmul.mubr.msk.f32.gmra.mxu0 %vm279_vm1, %v7157_v37  ;;  %14155 = vmatprep.subr.mxu0 %v14147_v31 }
 0xa61   :  { %14156 = vmatpush3.msra.mxu0 %v14147_v31  ;;  %14159 = vmatprep.mubr.msk.f32.mxu0 %vm279_vm1, %v7348_v41 }
 0xa62   :  { %14157 = vmatprep.subr.mxu0 %v7328_v9 }
 0xa63   :  { %14158 = vmatpush3.msra.mxu0 %v7328_v9 }
 0xa64   :  { %14160 = vmatmul.mubr.msk.f32.vlgmr.msra.gmra.mxu0 %vm279_vm1, %v7349_v42  ;;  %14179 = vmatprep.subr.mxu0 %v7618_v45 }
 0xa65   :  { %14162 = vmatprep.mubr.msk.f32.mxu0 %vm279_vm1, %v7350_v43  ;;  %14180 = vmatpush3.msra.mxu0 %v7618_v45 }
 0xa68   :  { %14163 = vmatmul.mubr.msk.f32.gmra.mxu0 %vm279_vm1, %v7351_v44 }
 0xb04   :  { %v14065_v38 = vpop.f32.mrf.mxu0 }
 0xb05   :  { %v6674_v2 = vadd.f32 %v14065_v38, %v6470_v40  ;;  %v7484_v38 = vld [vmem:[#allocation11 + $0x18] sm:$0xff] }
 0xb06   :  { %v6654_v50 = vpop.f32.mrf.mxu0 }
 0xb07   :  { %v6673_v11 = vadd.f32 %v6654_v50, %v6465_v7  ;;  %v7809_v50 = vld [vmem:[#allocation12 + $0x20] sm:$0xff]  ;;  %v7720_v7 = vld [vmem:[#allocation12 + $0x18] sm:$0xff] }
 0xb08   :  { %v14068_v51 = vpop.f32.mrf.mxu0 }
 0xb09   :  { %v6676_v4 = vadd.f32 %v14068_v51, %v6480_v10  ;;  %v7717_v51 = vld [vmem:[#allocation12] sm:$0xff] }
 0xb0a   :  { %v6664_v52 = vpop.f32.mrf.mxu0 }
 0xb0b   :  { %v6675_v28 = vadd.f32 %v6664_v52, %v6475_v23  ;;  %v7812_v23 = vld [vmem:[#allocation12 + $0x38] sm:$0xff] }
 0xb0c   :  { %v14089_v53 = vpop.f32.mrf.mxu0 }
 0xb0d   :  { %v6868_v22 = vadd.f32 %v14089_v53, %v6674_v2 }
 0xb0e   :  { %v6848_v54 = vpop.f32.mrf.mxu0 }
 0xb0f   :  { %v6867_v24 = vadd.f32 %v6848_v54, %v6673_v11  ;;  %v7810_v11 = vld [vmem:[#allocation12 + $0x28] sm:$0xff] }
 0xb10   :  { %v14092_v55 = vpop.f32.mrf.mxu0 }
 0xb11   :  { %v6870_v62 = vadd.f32 %v14092_v55, %v6676_v4  ;;  %v8394_v4 = vld [vmem:[#allocation14 + $0x20] sm:$0xff] }
 0xb12   :  { %v6858_v56 = vpop.f32.mrf.mxu0 }
 0xb13   :  { %v6869_v5 = vadd.f32 %v6858_v56, %v6675_v28 }
 0xb14   :  { %v14113_v39 = vpop.f32.mrf.mxu0 }
 0xb15   :  { %v7062_v3 = vadd.f32 %v14113_v39, %v6868_v22  ;;  %v8008_v22 = vld [vmem:[#allocation14 + $0x10] sm:$0xff] }
 0xb16   :  { %v7042_v57 = vpop.f32.mrf.mxu0 }
 0xb17   :  { %v7061_v29 = vadd.f32 %v7042_v57, %v6867_v24  ;;  %v8587_v24 = vld [vmem:[#allocation14 + $0x28] sm:$0xff] }
 0xb18   :  { %v14116_v58 = vpop.f32.mrf.mxu0 }
 0xb19   :  { %v7064_v13 = vadd.f32 %v14116_v58, %v6870_v62  ;;  %v7718_v58 = vld [vmem:[#allocation12 + $0x8] sm:$0xff] }
 0xb1a   :  { %v7052_v60 = vpop.f32.mrf.mxu0 }
 0xb1b   :  { %v7063_v19 = vadd.f32 %v7052_v60, %v6869_v5  ;;  %v7719_v60 = vld [vmem:[#allocation12 + $0x10] sm:$0xff] }
 0xb1c   :  { %v14137_v61 = vpop.f32.mrf.mxu0 }
 0xb1d   :  { %v7256_v30 = vadd.f32 %v14137_v61, %v7062_v3  ;;  %v8780_v3 = vld [vmem:[#allocation14 + $0x30] sm:$0xff] }
 0xb1e   :  { %v7236_v8 = vpop.f32.mrf.mxu0 }
 0xb1f   :  { %v7255_v26 = vadd.f32 %v7236_v8, %v7061_v29 }
 0xb20   :  { %v14140_v14 = vpop.f32.mrf.mxu0 }
 0xb21   :  { %v7258_v15 = vadd.f32 %v14140_v14, %v7064_v13  ;;  %v8201_v14 = vld [vmem:[#allocation14 + $0x18] sm:$0xff] }
 0xb22   :  { %v7246_v25 = vpop.f32.mrf.mxu0 }
 0xb23   :  { %v7257_v21 = vadd.f32 %v7246_v25, %v7063_v19 }
 0xb24   :  { %v14161_v63 = vpop.f32.mrf.mxu0 }
 0xb25   :  { %v7450_v0 = vadd.f32 %v14161_v63, %v7256_v30 }
 0xb26   :  { %v7430_v6 = vpop.f32.mrf.mxu0 }
 0xb27   :  { %v7478_v32 = vadd.f32 %v7465_v20, %v7450_v0  ;;  %v7449_v59 = vadd.f32 %v7430_v6, %v7255_v26  ;;  %v8096_v20 = vld [vmem:[#allocation12 + $0x48] sm:$0xff]  ;;  %v8097_v6 = vld [vmem:[#allocation12 + $0x50] sm:$0xff] }
 0xb28   :  { %v14164_v16 = vpop.f32.mrf.mxu0 }
 0xb29   :  { %v7477_v31 = vadd.f32 %v7460_v33, %v7449_v59  ;;  %v7452_v9 = vadd.f32 %v14164_v16, %v7258_v15  ;;  %v7611_v34 = vmul.f32 0.01, %v7478_v32  ;;  %vm7607_vm8 = vcmp.ge.f32.partialorder %v7478_v32, 0.0  ;;  %v8288_v59 = vld [vmem:[#allocation12 + $0x60] sm:$0xff] }
 0xb2a   :  { %v7440_v35 = vpop.f32.mrf.mxu0 }
 0xb2b   :  { %v7610_v18 = vmul.f32 0.01, %v7477_v31  ;;  %v7480_v36 = vadd.f32 %v7475_v12, %v7452_v9  ;;  %v7451_v37 = vadd.f32 %v7440_v35, %v7257_v21  ;;  %vm7606_vm9 = vcmp.ge.f32.partialorder %v7477_v31, 0.0  ;;  %v7811_v12 = vld [vmem:[#allocation12 + $0x30] sm:$0xff]  ;;  %v8289_v21 = vld [vmem:[#allocation12 + $0x68] sm:$0xff]  ;;  %v8291_v35 = vld [vmem:[#allocation12 + $0x78] sm:$0xff] }
 0xb2c   :  { %v15913_v44 = vsel %vm7607_vm8, %v7478_v32, %v7611_v34 }
 0xb2d   :  { %v7479_v41 = vadd.f32 %v7470_v27, %v7451_v37  ;;  %14165 = vmatprep.subr.mxu1 %v7480_v36  ;;  %v15909_v42 = vsel %vm7606_vm9, %v7477_v31, %v7610_v18  ;;  %v7613_v43 = vmul.f32 0.01, %v7480_v36  ;;  %vm7609_vm11 = vcmp.ge.f32.partialorder %v7480_v36, 0.0  ;;  %v8095_v27 = vld [vmem:[#allocation12 + $0x40] sm:$0xff] }
 0xb2e   :  { %14166 = vmatpush3.msra.mxu1 %v7480_v36  ;;  %14181 = vmatprep.mubr.msk.f32.mxu0 %vm7619_vm4, %v15909_v42  ;;  %v8481_v18 = vld [vmem:[#allocation12 + $0x80] sm:$0xff] }
 0xb2f   :  { %v7612_v45 = vmul.f32 0.01, %v7479_v41  ;;  %14167 = vmatprep.subr.mxu1 %v7479_v41  ;;  %14182 = vmatmul.mubr.msk.f32.vlgmr.msra.gmra.mxu0 %vm7619_vm4, %v15913_v44  ;;  %vm7608_vm10 = vcmp.ge.f32.partialorder %v7479_v41, 0.0  ;;  %v15921_v17 = vsel %vm7609_vm11, %v7480_v36, %v7613_v43  ;;  %vm11822_vm11 = vcmask 31744  }
 0xb30   :  { %14168 = vmatpush3.msra.mxu1 %v7479_v41 }
 0xb31   :  { %14169 = vmatprep.subr.mxu1 %v7478_v32  ;;  %v15917_v47 = vsel %vm7608_vm10, %v7479_v41, %v7612_v45  ;;  %v8482_v41 = vld [vmem:[#allocation12 + $0x88] sm:$0xff]  ;;  %v8484_v45 = vld [vmem:[#allocation12 + $0x98] sm:$0xff] }
 0xb32   :  { %14170 = vmatpush3.msra.mxu1 %v7478_v32  ;;  %14184 = vmatprep.mubr.msk.f32.mxu0 %vm7619_vm4, %v15917_v47  ;;  %v8098_v32 = vld [vmem:[#allocation12 + $0x58] sm:$0xff] }
 0xb33   :  { %14171 = vmatprep.subr.mxu1 %v7477_v31  ;;  %14185 = vmatmul.mubr.msk.f32.gmra.mxu0 %vm7619_vm4, %v15921_v17 }
 0xb34   :  { %14172 = vmatpush3.msra.mxu1 %v7477_v31  ;;  %14203 = vmatprep.mubr.msk.f32.mxu0 %vm279_vm1, %v7809_v50  ;;  %v8290_v31 = vld [vmem:[#allocation12 + $0x70] sm:$0xff] }
 0xb35   :  { %14174 = vmatmul.mubr.msk.f32.vlgmr.msra.gmra.mxu1 %vm279_vm1, %v7482_v46  ;;  %14187 = vmatprep.subr.mxu1 %v7722_v48 }
 0xb36   :  { %14176 = vmatprep.mubr.msk.f32.mxu1 %vm279_vm1, %v7483_v49  ;;  %14188 = vmatpush3.msra.mxu1 %v7722_v48  ;;  %v8675_v48 = vld [vmem:[#allocation12 + $0xa8] sm:$0xff]  ;;  %v8676_v49 = vld [vmem:[#allocation12 + $0xb0] sm:$0xff] }
 0xb39   :  { %14177 = vmatmul.mubr.msk.f32.gmra.mxu1 %vm279_vm1, %v7484_v38 }
 0xb3a   :  { %14189 = vmatprep.mubr.msk.f32.mxu1 %vm7619_vm4, %v15909_v42 }
 0xb3d   :  { %14190 = vmatmul.mubr.msk.f32.vlgmr.msra.gmra.mxu1 %vm7619_vm4, %v15913_v44 }
 0xb3e   :  { %14192 = vmatprep.mubr.msk.f32.mxu1 %vm7619_vm4, %v15917_v47 }
 0xb41   :  { %14193 = vmatmul.mubr.msk.f32.gmra.mxu1 %vm7619_vm4, %v15921_v17 }
 0xb42   :  { %14217 = vmatprep.mubr.msk.f32.mxu1 %vm279_vm1, %v7717_v51  ;;  %v8677_v51 = vld [vmem:[#allocation12 + $0xb8] sm:$0xff] }
 0xbef   :  { %v14183_v52 = vpop.f32.mrf.mxu0 }
 0xbf1   :  { %v7698_v53 = vpop.f32.mrf.mxu0 }
 0xbf3   :  { %v14186_v54 = vpop.f32.mrf.mxu0 }
 0xbf4   :  { %14209 = vmatprep.subr.mxu1 %v14186_v54 }
 0xbf5   :  { %v15938_v55 = vpop.f32.mrf.mxu1  ;;  %v7708_v56 = vpop.f32.mrf.mxu0  ;;  %14210 = vmatpush3.msra.mxu1 %v14186_v54  ;;  %v8869_v54 = vld [vmem:[#allocation12 + $0xd0] sm:$0xff] }
 0xbf6   :  { %14211 = vmatprep.subr.mxu1 %v7708_v56 }
 0xbf7   :  { %v15940_v39 = vpop.f32.mrf.mxu1  ;;  %14212 = vmatpush3.msra.mxu1 %v7708_v56  ;;  %v8870_v56 = vld [vmem:[#allocation12 + $0xd8] sm:$0xff] }
 0xbf8   :  { %14213 = vmatprep.subr.mxu1 %v14183_v52 }
 0xbf9   :  { %v15942_v57 = vpop.f32.mrf.mxu1  ;;  %14214 = vmatpush3.msra.mxu1 %v14183_v52  ;;  %v8867_v52 = vld [vmem:[#allocation12 + $0xc0] sm:$0xff] }
 0xbfa   :  { %14215 = vmatprep.subr.mxu1 %v7698_v53 }
 0xbfb   :  { %v15944_v40 = vpop.f32.mrf.mxu1  ;;  %14216 = vmatpush3.msra.mxu1 %v7698_v53  ;;  %v8868_v53 = vld [vmem:[#allocation12 + $0xc8] sm:$0xff] }
 0xbfc   :  { %14218 = vmatmul.mubr.msk.f32.vlgmr.msra.gmra.mxu1 %vm279_vm1, %v7718_v58  ;;  %v9012_v58 = vld [vmem:[#allocation17] sm:$0xff] }
 0xbfd   :  { %v14191_v61 = vpop.f32.mrf.mxu1  ;;  %14220 = vmatprep.mubr.msk.f32.mxu1 %vm279_vm1, %v7719_v60  ;;  %v9115_v60 = vld [vmem:[#allocation17 + $0x8] sm:$0xff] }
 0xbff   :  { %v7789_v2 = vpop.f32.mrf.mxu1 }
 0xc00   :  { %14221 = vmatmul.mubr.msk.f32.gmra.mxu1 %vm279_vm1, %v7720_v7 }
 0xc01   :  { %v14194_v8 = vpop.f32.mrf.mxu1  ;;  %14239 = vmatprep.mubr.msk.f32.mxu1 %vm279_vm1, %v8095_v27 }
 0xc02   :  { %14195 = vmatprep.subr.mxu0 %v14194_v8 }
 0xc03   :  { %v7799_v10 = vpop.f32.mrf.mxu1  ;;  %14196 = vmatpush3.msra.mxu0 %v14194_v8 }
 0xc04   :  { %14197 = vmatprep.subr.mxu0 %v7799_v10 }
 0xc05   :  { %14198 = vmatpush3.msra.mxu0 %v7799_v10 }
 0xc06   :  { %14199 = vmatprep.subr.mxu0 %v14191_v61 }
 0xc07   :  { %14200 = vmatpush3.msra.mxu0 %v14191_v61 }
 0xc08   :  { %14201 = vmatprep.subr.mxu0 %v7789_v2 }
 0xc09   :  { %14202 = vmatpush3.msra.mxu0 %v7789_v2 }
 0xc0a   :  { %14204 = vmatmul.mubr.msk.f32.vlgmr.msra.gmra.mxu0 %vm279_vm1, %v7810_v11  ;;  %14223 = vmatprep.subr.mxu0 %v8008_v22 }
 0xc0b   :  { %14206 = vmatprep.mubr.msk.f32.mxu0 %vm279_vm1, %v7811_v12  ;;  %14224 = vmatpush3.msra.mxu0 %v8008_v22 }
 0xc0c   :  { %14245 = vmatprep.subr.mxu0 %v8201_v14 }
 0xc0e   :  { %14207 = vmatmul.mubr.msk.f32.gmra.mxu0 %vm279_vm1, %v7812_v23 }
 0xc0f   :  { %14225 = vmatprep.mubr.msk.f32.mxu0 %vm7619_vm4, %v15909_v42 }
 0xc12   :  { %14226 = vmatmul.mubr.msk.f32.vlgmr.msra.gmra.mxu0 %vm7619_vm4, %v15913_v44 }
 0xc13   :  { %14228 = vmatprep.mubr.msk.f32.mxu0 %vm7619_vm4, %v15917_v47  ;;  %14246 = vmatpush3.msra.mxu0 %v8201_v14 }
 0xc14   :  { %14267 = vmatprep.subr.mxu0 %v8394_v4 }
 0xc16   :  { %14229 = vmatmul.mubr.msk.f32.gmra.mxu0 %vm7619_vm4, %v15921_v17 }
 0xc17   :  { %14247 = vmatprep.mubr.msk.f32.mxu0 %vm7619_vm4, %v15909_v42 }
 0xc1a   :  { %14248 = vmatmul.mubr.msk.f32.vlgmr.msra.gmra.mxu0 %vm7619_vm4, %v15913_v44 }
 0xc1b   :  { %14250 = vmatprep.mubr.msk.f32.mxu0 %vm7619_vm4, %v15917_v47  ;;  %14268 = vmatpush3.msra.mxu0 %v8394_v4 }
 0xc1c   :  { %14289 = vmatprep.subr.mxu0 %v8587_v24 }
 0xc1e   :  { %14251 = vmatmul.mubr.msk.f32.gmra.mxu0 %vm7619_vm4, %v15921_v17 }
 0xc1f   :  { %14269 = vmatprep.mubr.msk.f32.mxu0 %vm7619_vm4, %v15909_v42 }
 0xc22   :  { %14270 = vmatmul.mubr.msk.f32.vlgmr.msra.gmra.mxu0 %vm7619_vm4, %v15913_v44 }
 0xc23   :  { %14272 = vmatprep.mubr.msk.f32.mxu0 %vm7619_vm4, %v15917_v47  ;;  %14290 = vmatpush3.msra.mxu0 %v8587_v24 }
 0xc24   :  { %14311 = vmatprep.subr.mxu0 %v8780_v3 }
 0xc26   :  { %14273 = vmatmul.mubr.msk.f32.gmra.mxu0 %vm7619_vm4, %v15921_v17 }
 0xc27   :  { %14291 = vmatprep.mubr.msk.f32.mxu0 %vm7619_vm4, %v15909_v42 }
 0xc2a   :  { %14292 = vmatmul.mubr.msk.f32.vlgmr.msra.gmra.mxu0 %vm7619_vm4, %v15913_v44 }
 0xc2b   :  { %14294 = vmatprep.mubr.msk.f32.mxu0 %vm7619_vm4, %v15917_v47  ;;  %14312 = vmatpush3.msra.mxu0 %v8780_v3 }
 0xc2c   :  { %14333 = vmatprep.subr.mxu0 %v9012_v58 }
 0xc2e   :  { %14295 = vmatmul.mubr.msk.f32.gmra.mxu0 %vm7619_vm4, %v15921_v17 }
 0xc2f   :  { %14313 = vmatprep.mubr.msk.f32.mxu0 %vm7619_vm4, %v15909_v42  ;;  %v8483_v42 = vld [vmem:[#allocation12 + $0x90] sm:$0xff] }
 0xc32   :  { %14314 = vmatmul.mubr.msk.f32.vlgmr.msra.gmra.mxu0 %vm7619_vm4, %v15913_v44 }
 0xc33   :  { %14316 = vmatprep.mubr.msk.f32.mxu0 %vm7619_vm4, %v15917_v47  ;;  %v8674_v47 = vld [vmem:[#allocation12 + $0xa0] sm:$0xff]  ;;  %14334 = vmatpush3.msra.mxu0 %v9012_v58 }
 0xc36   :  { %14317 = vmatmul.mubr.msk.f32.gmra.mxu0 %vm7619_vm4, %v15921_v17 }
 0xcbc   :  { %v14219_v61 = vpop.f32.mrf.mxu1 }
 0xcbe   :  { %v7988_v7 = vpop.f32.mrf.mxu1 }
 0xcc0   :  { %v14222_v2 = vpop.f32.mrf.mxu1 }
 0xcc2   :  { %v7998_v8 = vpop.f32.mrf.mxu1 }
 0xcca   :  { %v15993_v25 = vpop.f32.mrf.mxu0 }
 0xccc   :  { %v15995_v28 = vpop.f32.mrf.mxu0 }
 0xcce   :  { %v15997_v62 = vpop.f32.mrf.mxu0 }
 0xcd0   :  { %v15999_v29 = vpop.f32.mrf.mxu0 }
 0xcd2   :  { %v14227_v30 = vpop.f32.mrf.mxu0 }
 0xcd4   :  { %v8075_v63 = vpop.f32.mrf.mxu0 }
 0xcd6   :  { %v14230_v5 = vpop.f32.mrf.mxu0 }
 0xcd7   :  { %14231 = vmatprep.subr.mxu1 %v14230_v5 }
 0xcd8   :  { %v8085_v13 = vpop.f32.mrf.mxu0  ;;  %14232 = vmatpush3.msra.mxu1 %v14230_v5  ;;  %v7994_v5 = vadd.f32 %v14219_v61, %v15993_v25  ;;  %v8984_v25 = vpop.permute.xlu1 %8983 }
 0xcd9   :  { %14233 = vmatprep.subr.mxu1 %v8085_v13 }
 0xcda   :  { %14234 = vmatpush3.msra.mxu1 %v8085_v13  ;;  %v14249_v26 = vpop.f32.mrf.mxu0 }
 0xcdb   :  { %14235 = vmatprep.subr.mxu1 %v14227_v30 }
 0xcdc   :  { %14236 = vmatpush3.msra.mxu1 %v14227_v30  ;;  %v8268_v0 = vpop.f32.mrf.mxu0 }
 0xcdd   :  { %14237 = vmatprep.subr.mxu1 %v8075_v63 }
 0xcde   :  { %14238 = vmatpush3.msra.mxu1 %v8075_v63  ;;  %v14252_v19 = vpop.f32.mrf.mxu0 }
 0xcdf   :  { %14240 = vmatmul.mubr.msk.f32.vlgmr.msra.gmra.mxu1 %vm279_vm1, %v8096_v20  ;;  %14253 = vmatprep.subr.mxu1 %v14252_v19 }
 0xce0   :  { %v8278_v15 = vpop.f32.mrf.mxu0  ;;  %14254 = vmatpush3.msra.mxu1 %v14252_v19  ;;  %14242 = vmatprep.mubr.msk.f32.mxu1 %vm279_vm1, %v8097_v6  ;;  %v8004_v6 = vadd.f32 %v14222_v2, %v15997_v62 }
 0xce1   :  { %14255 = vmatprep.subr.mxu1 %v8278_v15 }
 0xce2   :  { %14256 = vmatpush3.msra.mxu1 %v8278_v15  ;;  %v14271_v33 = vpop.f32.mrf.mxu0 }
 0xce3   :  { %14243 = vmatmul.mubr.msk.f32.gmra.mxu1 %vm279_vm1, %v8098_v32  ;;  %14257 = vmatprep.subr.mxu1 %v14249_v26 }
 0xce4   :  { %14258 = vmatpush3.msra.mxu1 %v14249_v26  ;;  %v8461_v16 = vpop.f32.mrf.mxu0  ;;  %14261 = vmatprep.mubr.msk.f32.mxu1 %vm279_vm1, %v8288_v59  ;;  %v7989_v26 = vadd.f32 %v7988_v7, %v15995_v28 }
 0xce5   :  { %14259 = vmatprep.subr.mxu1 %v8268_v0 }
 0xce6   :  { %14260 = vmatpush3.msra.mxu1 %v8268_v0  ;;  %v14274_v9 = vpop.f32.mrf.mxu0 }
 0xce7   :  { %14262 = vmatmul.mubr.msk.f32.vlgmr.msra.gmra.mxu1 %vm279_vm1, %v8289_v21  ;;  %14275 = vmatprep.subr.mxu1 %v14274_v9  ;;  %v7999_v21 = vadd.f32 %v7998_v8, %v15999_v29 }
 0xce8   :  { %v8471_v34 = vpop.f32.mrf.mxu0  ;;  %14276 = vmatpush3.msra.mxu1 %v14274_v9  ;;  %14264 = vmatprep.mubr.msk.f32.mxu1 %vm279_vm1, %v8290_v31 }
 0xce9   :  { %14277 = vmatprep.subr.mxu1 %v8471_v34 }
 0xcea   :  { %14278 = vmatpush3.msra.mxu1 %v8471_v34  ;;  %v14293_v36 = vpop.f32.mrf.mxu0 }
 0xceb   :  { %14265 = vmatmul.mubr.msk.f32.gmra.mxu1 %vm279_vm1, %v8291_v35  ;;  %14279 = vmatprep.subr.mxu1 %v14271_v33 }
 0xcec   :  { %14280 = vmatpush3.msra.mxu1 %v14271_v33  ;;  %v8654_v37 = vpop.f32.mrf.mxu0  ;;  %14283 = vmatprep.mubr.msk.f32.mxu1 %vm279_vm1, %v8481_v18 }
 0xced   :  { %14281 = vmatprep.subr.mxu1 %v8461_v16 }
 0xcee   :  { %14282 = vmatpush3.msra.mxu1 %v8461_v16  ;;  %v14296_v43 = vpop.f32.mrf.mxu0 }
 0xcef   :  { %14284 = vmatmul.mubr.msk.f32.vlgmr.msra.gmra.mxu1 %vm279_vm1, %v8482_v41  ;;  %14297 = vmatprep.subr.mxu1 %v14296_v43 }
 0xcf0   :  { %v8664_v44 = vpop.f32.mrf.mxu0  ;;  %14298 = vmatpush3.msra.mxu1 %v14296_v43  ;;  %14286 = vmatprep.mubr.msk.f32.mxu1 %vm279_vm1, %v8483_v42  ;;  %v8979_v43 = vpop.permute.xlu0 %8978 }
 0xcf1   :  { %14299 = vmatprep.subr.mxu1 %v8664_v44 }
 0xcf2   :  { %14300 = vmatpush3.msra.mxu1 %v8664_v44  ;;  %v14315_v17 = vpop.f32.mrf.mxu0 }
 0xcf3   :  { %14287 = vmatmul.mubr.msk.f32.gmra.mxu1 %vm279_vm1, %v8484_v45  ;;  %14301 = vmatprep.subr.mxu1 %v14293_v36 }
 0xcf4   :  { %14302 = vmatpush3.msra.mxu1 %v14293_v36  ;;  %v8847_v46 = vpop.f32.mrf.mxu0  ;;  %14305 = vmatprep.mubr.msk.f32.mxu1 %vm279_vm1, %v8674_v47 }
 0xcf5   :  { %14303 = vmatprep.subr.mxu1 %v8654_v37 }
 0xcf6   :  { %14304 = vmatpush3.msra.mxu1 %v8654_v37  ;;  %v14318_v38 = vpop.f32.mrf.mxu0 }
 0xcf7   :  { %14306 = vmatmul.mubr.msk.f32.vlgmr.msra.gmra.mxu1 %vm279_vm1, %v8675_v48  ;;  %14319 = vmatprep.subr.mxu1 %v14318_v38 }
 0xcf8   :  { %v8857_v50 = vpop.f32.mrf.mxu0  ;;  %14320 = vmatpush3.msra.mxu1 %v14318_v38  ;;  %14308 = vmatprep.mubr.msk.f32.mxu1 %vm279_vm1, %v8676_v49  ;;  %v8994_v49 = vpop.permute.xlu1 %8993 }
 0xcf9   :  { %14321 = vmatprep.subr.mxu1 %v8857_v50 }
 0xcfa   :  { %14322 = vmatpush3.msra.mxu1 %v8857_v50 }
 0xcfb   :  { %14309 = vmatmul.mubr.msk.f32.gmra.mxu1 %vm279_vm1, %v8677_v51  ;;  %14323 = vmatprep.subr.mxu1 %v14315_v17 }
 0xcfc   :  { %14324 = vmatpush3.msra.mxu1 %v14315_v17  ;;  %14327 = vmatprep.mubr.msk.f32.mxu1 %vm279_vm1, %v8867_v52 }
 0xcfd   :  { %14325 = vmatprep.subr.mxu1 %v8847_v46 }
 0xcfe   :  { %14326 = vmatpush3.msra.mxu1 %v8847_v46 }
 0xcff   :  { %14328 = vmatmul.mubr.msk.f32.vlgmr.msra.gmra.mxu1 %vm279_vm1, %v8868_v53  ;;  %14341 = vmatprep.subr.mxu1 %v9115_v60 }
 0xd00   :  { %14330 = vmatprep.mubr.msk.f32.mxu1 %vm279_vm1, %v8869_v54  ;;  %14342 = vmatpush3.msra.mxu1 %v9115_v60 }
 0xd03   :  { %14331 = vmatmul.mubr.msk.f32.gmra.mxu1 %vm279_vm1, %v8870_v56  ;;  %v8989_v56 = vpop.permute.xlu0 %8988 }
 0xd9f   :  { %v14241_v10 = vpop.f32.mrf.mxu1 }
 0xda0   :  { %v8197_v0 = vadd.f32 %v14241_v10, %v7994_v5  ;;  %v9111_v5 = vld [vmem:[#allocation15 + $0x8] sm:$0xff] }
 0xda1   :  { %v8177_v11 = vpop.f32.mrf.mxu1 }
 0xda2   :  { %v8196_v19 = vadd.f32 %v8177_v11, %v7989_v26  ;;  %v9202_v11 = vld [vmem:[#allocation15 + $0x20] sm:$0xff]  ;;  %v9401_v26 = vld [vmem:[#allocation17 + $0x10] sm:$0xff] }
 0xda3   :  { %v14244_v22 = vpop.f32.mrf.mxu1 }
 0xda4   :  { %v8199_v59 = vadd.f32 %v14244_v22, %v8004_v6  ;;  %v9110_v22 = vld [vmem:[#allocation15] sm:$0xff]  ;;  %v9205_v6 = vld [vmem:[#allocation15 + $0x38] sm:$0xff] }
 0xda5   :  { %v8187_v12 = vpop.f32.mrf.mxu1 }
 0xda6   :  { %v8198_v18 = vadd.f32 %v8187_v12, %v7999_v21 }
 0xda7   :  { %v14263_v14 = vpop.f32.mrf.mxu1 }
 0xda8   :  { %v8390_v15 = vadd.f32 %v14263_v14, %v8197_v0  ;;  %v9112_v0 = vld [vmem:[#allocation15 + $0x10] sm:$0xff] }
 0xda9   :  { %v8370_v23 = vpop.f32.mrf.mxu1 }
 0xdaa   :  { %v8389_v33 = vadd.f32 %v8370_v23, %v8196_v19  ;;  %v9113_v19 = vld [vmem:[#allocation15 + $0x18] sm:$0xff] }
 0xdab   :  { %v14266_v4 = vpop.f32.mrf.mxu1 }
 0xdac   :  { %v8392_v9 = vadd.f32 %v14266_v4, %v8199_v59  ;;  %v10173_v59 = vld [vmem:[#allocation17 + $0x30] sm:$0xff] }
 0xdad   :  { %v8380_v24 = vpop.f32.mrf.mxu1 }
 0xdae   :  { %v8391_v42 = vadd.f32 %v8380_v24, %v8198_v18 }
 0xdaf   :  { %v14285_v3 = vpop.f32.mrf.mxu1 }
 0xdb0   :  { %v8583_v16 = vadd.f32 %v14285_v3, %v8390_v15  ;;  %v9787_v15 = vld [vmem:[#allocation17 + $0x20] sm:$0xff] }
 0xdb1   :  { %v8563_v27 = vpop.f32.mrf.mxu1 }
 0xdb2   :  { %v8582_v34 = vadd.f32 %v8563_v27, %v8389_v33  ;;  %v9488_v33 = vld [vmem:[#allocation15 + $0x40] sm:$0xff] }
 0xdb3   :  { %v14288_v30 = vpop.f32.mrf.mxu1 }
 0xdb4   :  { %v8585_v28 = vadd.f32 %v14288_v30, %v8392_v9 }
 0xdb5   :  { %v8573_v63 = vpop.f32.mrf.mxu1 }
 0xdb6   :  { %v8584_v17 = vadd.f32 %v8573_v63, %v8391_v42  ;;  %v9203_v63 = vld [vmem:[#allocation15 + $0x28] sm:$0xff] }
 0xdb7   :  { %v14307_v13 = vpop.f32.mrf.mxu1 }
 0xdb8   :  { %v8776_v35 = vadd.f32 %v14307_v13, %v8583_v16  ;;  %v9204_v13 = vld [vmem:[#allocation15 + $0x30] sm:$0xff] }
 0xdb9   :  { %v8756_v20 = vpop.f32.mrf.mxu1 }
 0xdba   :  { %v8775_v37 = vadd.f32 %v8756_v20, %v8582_v34  ;;  %v9594_v20 = vld [vmem:[#allocation17 + $0x18] sm:$0xff] }
 0xdbb   :  { %v14310_v32 = vpop.f32.mrf.mxu1 }
 0xdbc   :  { %v8778_v44 = vadd.f32 %v14310_v32, %v8585_v28  ;;  %v9980_v32 = vld [vmem:[#allocation17 + $0x28] sm:$0xff] }
 0xdbd   :  { %v8766_v31 = vpop.f32.mrf.mxu1 }
 0xdbe   :  { %v8777_v38 = vadd.f32 %v8766_v31, %v8584_v17  ;;  %v9682_v17 = vld [vmem:[#allocation15 + $0x68] sm:$0xff] }
 0xdbf   :  { %v14329_v36 = vpop.f32.mrf.mxu1 }
 0xdc0   :  { %v8969_v41 = vadd.f32 %v14329_v36, %v8776_v35 }
 0xdc1   :  { %v8949_v62 = vpop.f32.mrf.mxu1 }
 0xdc2   :  { %v8997_v45 = vadd.f32 %v8984_v25, %v8969_v41  ;;  %v8968_v47 = vadd.f32 %v8949_v62, %v8775_v37  ;;  %v9489_v37 = vld [vmem:[#allocation15 + $0x48] sm:$0xff]  ;;  %v9490_v41 = vld [vmem:[#allocation15 + $0x50] sm:$0xff] }
 0xdc3   :  { %v14332_v46 = vpop.f32.mrf.mxu1 }
 0xdc4   :  { %v8996_v48 = vadd.f32 %v8979_v43, %v8968_v47  ;;  %v8971_v29 = vadd.f32 %v14332_v46, %v8778_v44  ;;  %v9005_v50 = vmul.f32 0.01, %v8997_v45  ;;  %vm9001_vm12 = vcmp.ge.f32.partialorder %v8997_v45, 0.0  ;;  %v9491_v43 = vld [vmem:[#allocation15 + $0x58] sm:$0xff]  ;;  %v9681_v44 = vld [vmem:[#allocation15 + $0x60] sm:$0xff]  ;;  %v9683_v46 = vld [vmem:[#allocation15 + $0x70] sm:$0xff] }
 0xdc5   :  { %v8959_v51 = vpop.f32.mrf.mxu1 }
 0xdc6   :  { %vm9000_vm13 = vcmp.ge.f32.partialorder %v8996_v48, 0.0  ;;  %v9004_v52 = vmul.f32 0.01, %v8996_v48  ;;  %v8999_v53 = vadd.f32 %v8994_v49, %v8971_v29  ;;  %v8970_v54 = vadd.f32 %v8959_v51, %v8777_v38  ;;  %v9684_v49 = vld [vmem:[#allocation15 + $0x78] sm:$0xff]  ;;  %v9874_v38 = vld [vmem:[#allocation15 + $0x80] sm:$0xff] }
 0xdc7   :  { %v16026_v60 = vsel %vm9001_vm12, %v8997_v45, %v9005_v50 }
 0xdc8   :  { %v16024_v58 = vsel %vm9000_vm13, %v8996_v48, %v9004_v52  ;;  %v8998_v61 = vadd.f32 %v8989_v56, %v8970_v54  ;;  %v9007_v7 = vmul.f32 0.01, %v8999_v53  ;;  %vm9003_vm14 = vcmp.ge.f32.partialorder %v8999_v53, 0.0  ;;  %v9875_v52 = vld [vmem:[#allocation15 + $0x88] sm:$0xff] }
 0xdc9   :  { %14335 = vmatprep.mubr.msk.f32.mxu0 %vm7619_vm4, %v16024_v58  ;;  %14343 = vmatprep.mubr.msk.f32.mxu1 %vm7619_vm4, %v16024_v58 }
 0xdca   :  { %14336 = vmatmul.mubr.msk.f32.vlgmr.msra.gmra.mxu0 %vm7619_vm4, %v16026_v60  ;;  %14344 = vmatmul.mubr.msk.f32.vlgmr.msra.gmra.mxu1 %vm7619_vm4, %v16026_v60  ;;  %vm9002_vm15 = vcmp.ge.f32.partialorder %v8998_v61, 0.0  ;;  %v9006_v2 = vmul.f32 0.01, %v8998_v61  ;;  %v16038_v10 = vsel %vm9003_vm14, %v8999_v53, %v9007_v7  ;;  %v9876_v53 = vld [vmem:[#allocation15 + $0x90] sm:$0xff]  ;;  %vm11924_vm14 = vcmask 8192  }
 0xdcc   :  { %v16036_v8 = vsel %vm9002_vm15, %v8998_v61, %v9006_v2  ;;  %v10068_v2 = vld [vmem:[#allocation15 + $0xa8] sm:$0xff] }
 0xdcd   :  { %14338 = vmatprep.mubr.msk.f32.mxu0 %vm7619_vm4, %v16036_v8  ;;  %14346 = vmatprep.mubr.msk.f32.mxu1 %vm7619_vm4, %v16036_v8 }
 0xdce   :  { %14339 = vmatmul.mubr.msk.f32.gmra.mxu0 %vm7619_vm4, %v16038_v10  ;;  %14347 = vmatmul.mubr.msk.f32.gmra.mxu1 %vm7619_vm4, %v16038_v10 }
 0xdcf   :  { %14357 = vmatprep.mubr.msk.f32.mxu0 %vm279_vm1, %v9202_v11  ;;  %14371 = vmatprep.mubr.msk.f32.mxu1 %vm279_vm1, %v9110_v22  ;;  %v10070_v22 = vld [vmem:[#allocation15 + $0xb8] sm:$0xff] }
 0xe8a   :  { %v14337_v12 = vpop.f32.mrf.mxu0  ;;  %v14345_v14 = vpop.f32.mrf.mxu1 }
 0xe8c   :  { %v9091_v23 = vpop.f32.mrf.mxu0  ;;  %v9182_v4 = vpop.f32.mrf.mxu1 }
 0xe8e   :  { %v14340_v24 = vpop.f32.mrf.mxu0  ;;  %v14348_v3 = vpop.f32.mrf.mxu1 }
 0xe8f   :  { %14349 = vmatprep.subr.mxu0 %v14348_v3  ;;  %14363 = vmatprep.subr.mxu1 %v14340_v24 }
 0xe90   :  { %v9101_v27 = vpop.f32.mrf.mxu0  ;;  %v9192_v30 = vpop.f32.mrf.mxu1  ;;  %14350 = vmatpush3.msra.mxu0 %v14348_v3  ;;  %14364 = vmatpush3.msra.mxu1 %v14340_v24  ;;  %v10421_v24 = vld [vmem:[#allocation20] sm:$0xff]  ;;  %v10524_v3 = vld [vmem:[#allocation20 + $0x8] sm:$0xff] }
 0xe91   :  { %14351 = vmatprep.subr.mxu0 %v9192_v30  ;;  %14365 = vmatprep.subr.mxu1 %v9101_v27 }
 0xe92   :  { %14352 = vmatpush3.msra.mxu0 %v9192_v30  ;;  %14366 = vmatpush3.msra.mxu1 %v9101_v27 }
 0xe93   :  { %14353 = vmatprep.subr.mxu0 %v14345_v14  ;;  %14367 = vmatprep.subr.mxu1 %v14337_v12 }
 0xe94   :  { %14354 = vmatpush3.msra.mxu0 %v14345_v14  ;;  %14368 = vmatpush3.msra.mxu1 %v14337_v12  ;;  %v10260_v12 = vld [vmem:[#allocation15 + $0xc0] sm:$0xff]  ;;  %v10261_v14 = vld [vmem:[#allocation15 + $0xc8] sm:$0xff] }
 0xe95   :  { %14355 = vmatprep.subr.mxu0 %v9182_v4  ;;  %14369 = vmatprep.subr.mxu1 %v9091_v23 }
 0xe96   :  { %14356 = vmatpush3.msra.mxu0 %v9182_v4  ;;  %14370 = vmatpush3.msra.mxu1 %v9091_v23  ;;  %v10262_v23 = vld [vmem:[#allocation15 + $0xd0] sm:$0xff]  ;;  %v10263_v4 = vld [vmem:[#allocation15 + $0xd8] sm:$0xff] }
 0xe97   :  { %14358 = vmatmul.mubr.msk.f32.vlgmr.msra.gmra.mxu0 %vm279_vm1, %v9203_v63  ;;  %14372 = vmatmul.mubr.msk.f32.vlgmr.msra.gmra.mxu1 %vm279_vm1, %v9111_v5 }
 0xe98   :  { %14360 = vmatprep.mubr.msk.f32.mxu0 %vm279_vm1, %v9204_v13  ;;  %14377 = vmatprep.subr.mxu0 %v9401_v26 }
 0xe99   :  { %14374 = vmatprep.mubr.msk.f32.mxu1 %vm279_vm1, %v9112_v0  ;;  %14378 = vmatpush3.msra.mxu0 %v9401_v26 }
 0xe9a   :  { %14399 = vmatprep.subr.mxu0 %v9594_v20 }
 0xe9b   :  { %14361 = vmatmul.mubr.msk.f32.gmra.mxu0 %vm279_vm1, %v9205_v6  ;;  %14375 = vmatmul.mubr.msk.f32.gmra.mxu1 %vm279_vm1, %v9113_v19 }
 0xe9c   :  { %14379 = vmatprep.mubr.msk.f32.mxu0 %vm7619_vm4, %v16024_v58  ;;  %14393 = vmatprep.mubr.msk.f32.mxu1 %vm279_vm1, %v9488_v33 }
 0xe9f   :  { %14380 = vmatmul.mubr.msk.f32.vlgmr.msra.gmra.mxu0 %vm7619_vm4, %v16026_v60 }
 0xea0   :  { %14382 = vmatprep.mubr.msk.f32.mxu0 %vm7619_vm4, %v16036_v8  ;;  %14400 = vmatpush3.msra.mxu0 %v9594_v20 }
 0xea1   :  { %14421 = vmatprep.subr.mxu0 %v9787_v15 }
 0xea3   :  { %14383 = vmatmul.mubr.msk.f32.gmra.mxu0 %vm7619_vm4, %v16038_v10 }
 0xea4   :  { %14401 = vmatprep.mubr.msk.f32.mxu0 %vm7619_vm4, %v16024_v58 }
 0xea7   :  { %14402 = vmatmul.mubr.msk.f32.vlgmr.msra.gmra.mxu0 %vm7619_vm4, %v16026_v60 }
 0xea8   :  { %14404 = vmatprep.mubr.msk.f32.mxu0 %vm7619_vm4, %v16036_v8  ;;  %14422 = vmatpush3.msra.mxu0 %v9787_v15 }
 0xea9   :  { %14443 = vmatprep.subr.mxu0 %v9980_v32 }
 0xeab   :  { %14405 = vmatmul.mubr.msk.f32.gmra.mxu0 %vm7619_vm4, %v16038_v10 }
 0xeac   :  { %14423 = vmatprep.mubr.msk.f32.mxu0 %vm7619_vm4, %v16024_v58 }
 0xeaf   :  { %14424 = vmatmul.mubr.msk.f32.vlgmr.msra.gmra.mxu0 %vm7619_vm4, %v16026_v60 }
 0xeb0   :  { %14426 = vmatprep.mubr.msk.f32.mxu0 %vm7619_vm4, %v16036_v8  ;;  %14444 = vmatpush3.msra.mxu0 %v9980_v32 }
 0xeb1   :  { %14465 = vmatprep.subr.mxu0 %v10173_v59 }
 0xeb3   :  { %14427 = vmatmul.mubr.msk.f32.gmra.mxu0 %vm7619_vm4, %v16038_v10 }
 0xeb4   :  { %14445 = vmatprep.mubr.msk.f32.mxu0 %vm7619_vm4, %v16024_v58 }
 0xeb7   :  { %14446 = vmatmul.mubr.msk.f32.vlgmr.msra.gmra.mxu0 %vm7619_vm4, %v16026_v60 }
 0xeb8   :  { %14448 = vmatprep.mubr.msk.f32.mxu0 %vm7619_vm4, %v16036_v8  ;;  %14466 = vmatpush3.msra.mxu0 %v10173_v59 }
 0xeb9   :  { %14487 = vmatprep.subr.mxu0 %v10421_v24 }
 0xebb   :  { %14449 = vmatmul.mubr.msk.f32.gmra.mxu0 %vm7619_vm4, %v16038_v10 }
 0xebc   :  { %14467 = vmatprep.mubr.msk.f32.mxu0 %vm7619_vm4, %v16024_v58  ;;  %v9877_v58 = vld [vmem:[#allocation15 + $0x98] sm:$0xff] }
 0xebf   :  { %14468 = vmatmul.mubr.msk.f32.vlgmr.msra.gmra.mxu0 %vm7619_vm4, %v16026_v60  ;;  %v10067_v60 = vld [vmem:[#allocation15 + $0xa0] sm:$0xff] }
 0xec0   :  { %14470 = vmatprep.mubr.msk.f32.mxu0 %vm7619_vm4, %v16036_v8  ;;  %v10069_v8 = vld [vmem:[#allocation15 + $0xb0] sm:$0xff]  ;;  %14488 = vmatpush3.msra.mxu0 %v10421_v24 }
 0xec3   :  { %14471 = vmatmul.mubr.msk.f32.gmra.mxu0 %vm7619_vm4, %v16038_v10 }
 0xf57   :  { %v16097_v16 = vpop.f32.mrf.mxu0  ;;  %v14373_v27 = vpop.f32.mrf.mxu1 }
 0xf59   :  { %v16099_v21 = vpop.f32.mrf.mxu0  ;;  %v9381_v30 = vpop.f32.mrf.mxu1 }
 0xf5b   :  { %v16101_v31 = vpop.f32.mrf.mxu0  ;;  %v14376_v63 = vpop.f32.mrf.mxu1 }
 0xf5d   :  { %v16103_v9 = vpop.f32.mrf.mxu0  ;;  %v9391_v5 = vpop.f32.mrf.mxu1 }
 0xf5f   :  { %v14381_v34 = vpop.f32.mrf.mxu0 }
 0xf61   :  { %v9468_v35 = vpop.f32.mrf.mxu0 }
 0xf63   :  { %v14384_v25 = vpop.f32.mrf.mxu0 }
 0xf64   :  { %14385 = vmatprep.subr.mxu1 %v14384_v25 }
 0xf65   :  { %v9478_v18 = vpop.f32.mrf.mxu0  ;;  %14386 = vmatpush3.msra.mxu1 %v14384_v25 }
 0xf66   :  { %14387 = vmatprep.subr.mxu1 %v9478_v18 }
 0xf67   :  { %14388 = vmatpush3.msra.mxu1 %v9478_v18  ;;  %v14403_v36 = vpop.f32.mrf.mxu0 }
 0xf68   :  { %14389 = vmatprep.subr.mxu1 %v14381_v34 }
 0xf69   :  { %14390 = vmatpush3.msra.mxu1 %v14381_v34  ;;  %v9661_v28 = vpop.f32.mrf.mxu0  ;;  %v7492_v34 = vpop.permute.xlu0 %7491 }
 0xf6a   :  { %14391 = vmatprep.subr.mxu1 %v9468_v35 }
 0xf6b   :  { %14392 = vmatpush3.msra.mxu1 %v9468_v35  ;;  %v14406_v42 = vpop.f32.mrf.mxu0  ;;  %v10372_v35 = vpop.permute.xlu1 %10371 }
 0xf6c   :  { %14394 = vmatmul.mubr.msk.f32.vlgmr.msra.gmra.mxu1 %vm279_vm1, %v9489_v37  ;;  %14407 = vmatprep.subr.mxu1 %v14406_v42 }
 0xf6d   :  { %v9671_v62 = vpop.f32.mrf.mxu0  ;;  %14408 = vmatpush3.msra.mxu1 %v14406_v42  ;;  %14396 = vmatprep.mubr.msk.f32.mxu1 %vm279_vm1, %v9490_v41  ;;  %v7497_v37 = vpop.permute.xlu0 %7496  ;;  %v9382_v41 = vadd.f32 %v9381_v30, %v16099_v21 }
 0xf6e   :  { %14409 = vmatprep.subr.mxu1 %v9671_v62 }
 0xf6f   :  { %14410 = vmatpush3.msra.mxu1 %v9671_v62  ;;  %v14425_v45 = vpop.f32.mrf.mxu0  ;;  %v10377_v62 = vpop.permute.xlu1 %10376 }
 0xf70   :  { %14397 = vmatmul.mubr.msk.f32.gmra.mxu1 %vm279_vm1, %v9491_v43  ;;  %14411 = vmatprep.subr.mxu1 %v14403_v36 }
 0xf71   :  { %14412 = vmatpush3.msra.mxu1 %v14403_v36  ;;  %v9854_v47 = vpop.f32.mrf.mxu0  ;;  %14415 = vmatprep.mubr.msk.f32.mxu1 %vm279_vm1, %v9681_v44  ;;  %v9387_v36 = vadd.f32 %v14373_v27, %v16097_v16  ;;  %v9397_v44 = vadd.f32 %v14376_v63, %v16101_v31 }
 0xf72   :  { %14413 = vmatprep.subr.mxu1 %v9661_v28 }
 0xf73   :  { %14414 = vmatpush3.msra.mxu1 %v9661_v28  ;;  %v14428_v48 = vpop.f32.mrf.mxu0 }
 0xf74   :  { %14416 = vmatmul.mubr.msk.f32.vlgmr.msra.gmra.mxu1 %vm279_vm1, %v9682_v17  ;;  %14429 = vmatprep.subr.mxu1 %v14428_v48 }
 0xf75   :  { %v9864_v29 = vpop.f32.mrf.mxu0  ;;  %14430 = vmatpush3.msra.mxu1 %v14428_v48  ;;  %14418 = vmatprep.mubr.msk.f32.mxu1 %vm279_vm1, %v9683_v46 }
 0xf76   :  { %14431 = vmatprep.subr.mxu1 %v9864_v29 }
 0xf77   :  { %14432 = vmatpush3.msra.mxu1 %v9864_v29  ;;  %v14447_v50 = vpop.f32.mrf.mxu0 }
 0xf78   :  { %14419 = vmatmul.mubr.msk.f32.gmra.mxu1 %vm279_vm1, %v9684_v49  ;;  %14433 = vmatprep.subr.mxu1 %v14425_v45  ;;  %v9392_v49 = vadd.f32 %v9391_v5, %v16103_v9 }
 0xf79   :  { %14434 = vmatpush3.msra.mxu1 %v14425_v45  ;;  %v10047_v51 = vpop.f32.mrf.mxu0  ;;  %14437 = vmatprep.mubr.msk.f32.mxu1 %vm279_vm1, %v9874_v38 }
 0xf7a   :  { %14435 = vmatprep.subr.mxu1 %v9854_v47 }
 0xf7b   :  { %14436 = vmatpush3.msra.mxu1 %v9854_v47  ;;  %v14450_v54 = vpop.f32.mrf.mxu0 }
 0xf7c   :  { %14438 = vmatmul.mubr.msk.f32.vlgmr.msra.gmra.mxu1 %vm279_vm1, %v9875_v52  ;;  %14451 = vmatprep.subr.mxu1 %v14450_v54 }
 0xf7d   :  { %v10057_v56 = vpop.f32.mrf.mxu0  ;;  %14452 = vmatpush3.msra.mxu1 %v14450_v54  ;;  %14440 = vmatprep.mubr.msk.f32.mxu1 %vm279_vm1, %v9876_v53  ;;  %v10382_v53 = vpop.permute.xlu1 %10381 }
 0xf7e   :  { %14453 = vmatprep.subr.mxu1 %v10057_v56 }
 0xf7f   :  { %14454 = vmatpush3.msra.mxu1 %v10057_v56  ;;  %v14469_v61 = vpop.f32.mrf.mxu0 }
 0xf80   :  { %14441 = vmatmul.mubr.msk.f32.gmra.mxu1 %vm279_vm1, %v9877_v58  ;;  %14455 = vmatprep.subr.mxu1 %v14447_v50 }
 0xf81   :  { %14456 = vmatpush3.msra.mxu1 %v14447_v50  ;;  %v10240_v7 = vpop.f32.mrf.mxu0  ;;  %14459 = vmatprep.mubr.msk.f32.mxu1 %vm279_vm1, %v10067_v60  ;;  %v7502_v50 = vpop.permute.xlu0 %7501 }
 0xf82   :  { %14457 = vmatprep.subr.mxu1 %v10047_v51  ;;  %v10387_v24 = vpop.permute.xlu1 %10386 }
 0xf83   :  { %14458 = vmatpush3.msra.mxu1 %v10047_v51  ;;  %v14472_v10 = vpop.f32.mrf.mxu0 }
 0xf84   :  { %14460 = vmatmul.mubr.msk.f32.vlgmr.msra.gmra.mxu1 %vm279_vm1, %v10068_v2  ;;  %14473 = vmatprep.subr.mxu1 %v14472_v10 }
 0xf85   :  { %v10250_v11 = vpop.f32.mrf.mxu0  ;;  %14474 = vmatpush3.msra.mxu1 %v14472_v10  ;;  %14462 = vmatprep.mubr.msk.f32.mxu1 %vm279_vm1, %v10069_v8 }
 0xf86   :  { %14475 = vmatprep.subr.mxu1 %v10250_v11 }
 0xf87   :  { %14476 = vmatpush3.msra.mxu1 %v10250_v11 }
 0xf88   :  { %14463 = vmatmul.mubr.msk.f32.gmra.mxu1 %vm279_vm1, %v10070_v22  ;;  %14477 = vmatprep.subr.mxu1 %v14469_v61  ;;  %v7507_v22 = vpop.permute.xlu0 %7506 }
 0xf89   :  { %14478 = vmatpush3.msra.mxu1 %v14469_v61  ;;  %14481 = vmatprep.mubr.msk.f32.mxu1 %vm279_vm1, %v10260_v12  ;;  %v7588_v12 = vadd.f32 %v15940_v39, %v7492_v34 }
 0xf8a   :  { %14479 = vmatprep.subr.mxu1 %v10240_v7 }
 0xf8b   :  { %14480 = vmatpush3.msra.mxu1 %v10240_v7  ;;  %v7593_v7 = vadd.f32 %v15938_v55, %v7497_v37 }
 0xf8c   :  { %14482 = vmatmul.mubr.msk.f32.vlgmr.msra.gmra.mxu1 %vm279_vm1, %v10261_v14  ;;  %14495 = vmatprep.subr.mxu1 %v10524_v3 }
 0xf8d   :  { %14484 = vmatprep.mubr.msk.f32.mxu1 %vm279_vm1, %v10262_v23  ;;  %14496 = vmatpush3.msra.mxu1 %v10524_v3  ;;  %v7603_v3 = vadd.f32 %v15942_v57, %v7507_v22  ;;  %v10898_v22 = vld [vmem:[#allocation18 + $0x48] sm:$0xff] }
 0xf90   :  { %14485 = vmatmul.mubr.msk.f32.gmra.mxu1 %vm279_vm1, %v10263_v4 }
0x102c   :  { %v14395_v13 = vpop.f32.mrf.mxu1 }
0x102d   :  { %v9590_v42 = vadd.f32 %v14395_v13, %v9387_v36 }
0x102e   :  { %v9570_v26 = vpop.f32.mrf.mxu1 }
0x102f   :  { %v9589_v45 = vadd.f32 %v9570_v26, %v9382_v41  ;;  %v10611_v41 = vld [vmem:[#allocation18 + $0x20] sm:$0xff] }
0x1030   :  { %v14398_v0 = vpop.f32.mrf.mxu1 }
0x1031   :  { %v9592_v46 = vadd.f32 %v14398_v0, %v9397_v44 }
0x1032   :  { %v9580_v20 = vpop.f32.mrf.mxu1 }
0x1033   :  { %v9591_v21 = vadd.f32 %v9580_v20, %v9392_v49  ;;  %v10520_v49 = vld [vmem:[#allocation18 + $0x8] sm:$0xff] }
0x1034   :  { %v14417_v6 = vpop.f32.mrf.mxu1 }
0x1035   :  { %v9783_v47 = vadd.f32 %v14417_v6, %v9590_v42  ;;  %v7598_v6 = vadd.f32 %v15944_v40, %v7502_v50  ;;  %v10519_v42 = vld [vmem:[#allocation18] sm:$0xff]  ;;  %v10810_v50 = vld [vmem:[#allocation20 + $0x10] sm:$0xff] }
0x1036   :  { %v9763_v19 = vpop.f32.mrf.mxu1 }
0x1037   :  { %v9782_v48 = vadd.f32 %v9763_v19, %v9589_v45 }
0x1038   :  { %v14420_v15 = vpop.f32.mrf.mxu1 }
0x1039   :  { %v9785_v16 = vadd.f32 %v14420_v15, %v9592_v46 }
0x103a   :  { %v9773_v32 = vpop.f32.mrf.mxu1 }
0x103b   :  { %v9784_v31 = vadd.f32 %v9773_v32, %v9591_v21  ;;  %v11196_v21 = vld [vmem:[#allocation20 + $0x20] sm:$0xff] }
0x103c   :  { %v14439_v59 = vpop.f32.mrf.mxu1 }
0x103d   :  { %v9976_v29 = vadd.f32 %v14439_v59, %v9783_v47 }
0x103e   :  { %v9956_v33 = vpop.f32.mrf.mxu1 }
0x103f   :  { %v9975_v51 = vadd.f32 %v9956_v33, %v9782_v48 }
0x1040   :  { %v14442_v25 = vpop.f32.mrf.mxu1 }
0x1041   :  { %v9978_v56 = vadd.f32 %v14442_v25, %v9785_v16  ;;  %v10521_v16 = vld [vmem:[#allocation18 + $0x10] sm:$0xff] }
0x1042   :  { %v9966_v18 = vpop.f32.mrf.mxu1 }
0x1043   :  { %v9977_v11 = vadd.f32 %v9966_v18, %v9784_v31 }
0x1044   :  { %v14461_v28 = vpop.f32.mrf.mxu1 }
0x1045   :  { %v10169_v52 = vadd.f32 %v14461_v28, %v9976_v29  ;;  %v10612_v29 = vld [vmem:[#allocation18 + $0x28] sm:$0xff] }
0x1046   :  { %v10149_v43 = vpop.f32.mrf.mxu1 }
0x1047   :  { %v10168_v58 = vadd.f32 %v10149_v43, %v9975_v51  ;;  %v11003_v51 = vld [vmem:[#allocation20 + $0x18] sm:$0xff] }
0x1048   :  { %v14464_v17 = vpop.f32.mrf.mxu1 }
0x1049   :  { %v10171_v2 = vadd.f32 %v14464_v17, %v9978_v56  ;;  %v11582_v56 = vld [vmem:[#allocation20 + $0x30] sm:$0xff] }
0x104a   :  { %v10159_v38 = vpop.f32.mrf.mxu1 }
0x104b   :  { %v10170_v27 = vadd.f32 %v10159_v38, %v9977_v11  ;;  %v10613_v38 = vld [vmem:[#allocation18 + $0x30] sm:$0xff] }
0x104c   :  { %v14483_v54 = vpop.f32.mrf.mxu1 }
0x104d   :  { %v10362_v60 = vadd.f32 %v14483_v54, %v10169_v52  ;;  %v10614_v52 = vld [vmem:[#allocation18 + $0x38] sm:$0xff]  ;;  %v11389_v54 = vld [vmem:[#allocation20 + $0x28] sm:$0xff] }
0x104e   :  { %v10342_v61 = vpop.f32.mrf.mxu1 }
0x104f   :  { %v10390_v8 = vadd.f32 %v10377_v62, %v10362_v60  ;;  %v10361_v10 = vadd.f32 %v10342_v61, %v10168_v58  ;;  %v10897_v58 = vld [vmem:[#allocation18 + $0x40] sm:$0xff] }
0x1050   :  { %v14486_v9 = vpop.f32.mrf.mxu1 }
0x1051   :  { %v10394_v14 = vadd.f32 %v10390_v8, %v7593_v7  ;;  %v10389_v23 = vadd.f32 %v10372_v35, %v10361_v10  ;;  %v10364_v4 = vadd.f32 %v14486_v9, %v10171_v2 }
0x1052   :  { %v10352_v30 = vpop.f32.mrf.mxu1 }
0x1053   :  { %vm10398_vm2 = vcmp.ge.f32.partialorder %v10394_v14, 0.0  ;;  %v10402_v63 = vmul.f32 0.01, %v10394_v14  ;;  %v10393_v5 = vadd.f32 %v10389_v23, %v7588_v12  ;;  %v10392_v55 = vadd.f32 %v10387_v24, %v10364_v4  ;;  %v10899_v12 = vld [vmem:[#allocation18 + $0x50] sm:$0xff]  ;;  %v10900_v4 = vld [vmem:[#allocation18 + $0x58] sm:$0xff]  ;;  %v11090_v24 = vld [vmem:[#allocation18 + $0x60] sm:$0xff] }
0x1054   :  { %v10363_v13 = vadd.f32 %v10352_v30, %v10170_v27  ;;  %v11091_v30 = vld [vmem:[#allocation18 + $0x68] sm:$0xff] }
0x1055   :  { %v10406_v26 = vsel %vm10398_vm2, %v10394_v14, %v10402_v63  ;;  %vm10397_vm3 = vcmp.ge.f32.partialorder %v10393_v5, 0.0  ;;  %v10401_v0 = vmul.f32 0.01, %v10393_v5  ;;  %v10396_v20 = vadd.f32 %v10392_v55, %v7603_v3  ;;  %v11092_v63 = vld [vmem:[#allocation18 + $0x70] sm:$0xff] }
0x1056   :  { %v10391_v39 = vadd.f32 %v10382_v53, %v10363_v13  ;;  %v10414_v19 = vmul.f32 0.01, %v10406_v26  ;;  %vm10410_vm6 = vcmp.ge.f32.partialorder %v10406_v26, 0.0  ;;  %v10522_v53 = vld [vmem:[#allocation18 + $0x18] sm:$0xff] }
0x1057   :  { %v10405_v15 = vsel %vm10397_vm3, %v10393_v5, %v10401_v0  ;;  %vm10400_vm5 = vcmp.ge.f32.partialorder %v10396_v20, 0.0  ;;  %v10404_v32 = vmul.f32 0.01, %v10396_v20  ;;  %v11093_v13 = vld [vmem:[#allocation18 + $0x78] sm:$0xff] }
0x1058   :  { %vm10409_vm7 = vcmp.ge.f32.partialorder %v10405_v15, 0.0  ;;  %v10413_v57 = vmul.f32 0.01, %v10405_v15  ;;  %v10395_v59 = vadd.f32 %v10391_v39, %v7598_v6  ;;  %v16134_v35 = vsel %vm10410_vm6, %v10406_v26, %v10414_v19  ;;  %v11283_v26 = vld [vmem:[#allocation18 + $0x80] sm:$0xff]  ;;  %v11284_v6 = vld [vmem:[#allocation18 + $0x88] sm:$0xff]  ;;  %v11285_v39 = vld [vmem:[#allocation18 + $0x90] sm:$0xff] }
0x1059   :  { %v10408_v34 = vsel %vm10400_vm5, %v10396_v20, %v10404_v32  ;;  %v11286_v32 = vld [vmem:[#allocation18 + $0x98] sm:$0xff] }
0x105a   :  { %v16132_v33 = vsel %vm10409_vm7, %v10405_v15, %v10413_v57  ;;  %vm10399_vm8 = vcmp.ge.f32.partialorder %v10395_v59, 0.0  ;;  %v10403_v25 = vmul.f32 0.01, %v10395_v59  ;;  %v10416_v40 = vmul.f32 0.01, %v10408_v34  ;;  %v11476_v57 = vld [vmem:[#allocation18 + $0xa0] sm:$0xff] }
0x105b   :  { %14489 = vmatprep.mubr.msk.f32.mxu0 %vm7619_vm4, %v16132_v33  ;;  %14497 = vmatprep.mubr.msk.f32.mxu1 %vm7619_vm4, %v16132_v33  ;;  %vm10412_vm9 = vcmp.ge.f32.partialorder %v10408_v34, 0.0 }
0x105c   :  { %14490 = vmatmul.mubr.msk.f32.vlgmr.msra.gmra.mxu0 %vm7619_vm4, %v16134_v35  ;;  %14498 = vmatmul.mubr.msk.f32.vlgmr.msra.gmra.mxu1 %vm7619_vm4, %v16134_v35  ;;  %v10407_v18 = vsel %vm10399_vm8, %v10395_v59, %v10403_v25  ;;  %v16146_v37 = vsel %vm10412_vm9, %v10408_v34, %v10416_v40  ;;  %v11477_v34 = vld [vmem:[#allocation18 + $0xa8] sm:$0xff] }
0x105d   :  { %vm10411_vm10 = vcmp.ge.f32.partialorder %v10407_v18, 0.0  ;;  %v10415_v36 = vmul.f32 0.01, %v10407_v18 }
0x105f   :  { %v16144_v28 = vsel %vm10411_vm10, %v10407_v18, %v10415_v36  ;;  %v11479_v18 = vld [vmem:[#allocation18 + $0xb8] sm:$0xff]  ;;  %v11669_v36 = vld [vmem:[#allocation18 + $0xc0] sm:$0xff] }
0x1060   :  { %14492 = vmatprep.mubr.msk.f32.mxu0 %vm7619_vm4, %v16144_v28  ;;  %14500 = vmatprep.mubr.msk.f32.mxu1 %vm7619_vm4, %v16144_v28 }
0x1061   :  { %14493 = vmatmul.mubr.msk.f32.gmra.mxu0 %vm7619_vm4, %v16146_v37  ;;  %14501 = vmatmul.mubr.msk.f32.gmra.mxu1 %vm7619_vm4, %v16146_v37 }
0x1062   :  { %14511 = vmatprep.mubr.msk.f32.mxu0 %vm279_vm1, %v10611_v41  ;;  %14525 = vmatprep.mubr.msk.f32.mxu1 %vm279_vm1, %v10519_v42  ;;  %v11672_v41 = vld [vmem:[#allocation18 + $0xd8] sm:$0xff] }
0x1063   :  { %v11836_v42 = vld [vmem:[%s15140_s19] sm:$0xf] }
0x111c   :  { %v14491_v62 = vpop.f32.mrf.mxu0  ;;  %v14499_v43 = vpop.f32.mrf.mxu1 }
0x111e   :  { %v10500_v44 = vpop.f32.mrf.mxu0  ;;  %v10591_v45 = vpop.f32.mrf.mxu1 }
0x1121   :  { %v14494_v47 = vpop.f32.mrf.mxu0  ;;  %v14502_v17 = vpop.f32.mrf.mxu1 }
0x1122   :  { %14503 = vmatprep.subr.mxu0 %v14502_v17  ;;  %14517 = vmatprep.subr.mxu1 %v14494_v47 }
0x1123   :  { %v10510_v46 = vpop.f32.mrf.mxu0  ;;  %v10601_v48 = vpop.f32.mrf.mxu1  ;;  %14504 = vmatpush3.msra.mxu0 %v14502_v17  ;;  %14518 = vmatpush3.msra.mxu1 %v14494_v47 }
0x1124   :  { %14505 = vmatprep.subr.mxu0 %v10601_v48  ;;  %14519 = vmatprep.subr.mxu1 %v10510_v46 }
0x1125   :  { %14506 = vmatpush3.msra.mxu0 %v10601_v48  ;;  %14520 = vmatpush3.msra.mxu1 %v10510_v46 }
0x1126   :  { %14507 = vmatprep.subr.mxu0 %v14499_v43  ;;  %14521 = vmatprep.subr.mxu1 %v14491_v62 }
0x1127   :  { %14508 = vmatpush3.msra.mxu0 %v14499_v43  ;;  %14522 = vmatpush3.msra.mxu1 %v14491_v62 }
0x1128   :  { %14509 = vmatprep.subr.mxu0 %v10591_v45  ;;  %14523 = vmatprep.subr.mxu1 %v10500_v44 }
0x1129   :  { %14510 = vmatpush3.msra.mxu0 %v10591_v45  ;;  %14524 = vmatpush3.msra.mxu1 %v10500_v44 }
0x112a   :  { %14512 = vmatmul.mubr.msk.f32.vlgmr.msra.gmra.mxu0 %vm279_vm1, %v10612_v29  ;;  %14526 = vmatmul.mubr.msk.f32.vlgmr.msra.gmra.mxu1 %vm279_vm1, %v10520_v49 }
0x112b   :  { %14514 = vmatprep.mubr.msk.f32.mxu0 %vm279_vm1, %v10613_v38  ;;  %14531 = vmatprep.subr.mxu0 %v10810_v50 }
0x112c   :  { %14528 = vmatprep.mubr.msk.f32.mxu1 %vm279_vm1, %v10521_v16  ;;  %14532 = vmatpush3.msra.mxu0 %v10810_v50 }
0x112d   :  { %14553 = vmatprep.subr.mxu0 %v11003_v51 }
0x112e   :  { %14515 = vmatmul.mubr.msk.f32.gmra.mxu0 %vm279_vm1, %v10614_v52  ;;  %14529 = vmatmul.mubr.msk.f32.gmra.mxu1 %vm279_vm1, %v10522_v53 }
0x112f   :  { %14533 = vmatprep.mubr.msk.f32.mxu0 %vm7619_vm4, %v16132_v33  ;;  %14547 = vmatprep.mubr.msk.f32.mxu1 %vm279_vm1, %v10897_v58 }
0x1132   :  { %14534 = vmatmul.mubr.msk.f32.vlgmr.msra.gmra.mxu0 %vm7619_vm4, %v16134_v35 }
0x1133   :  { %14536 = vmatprep.mubr.msk.f32.mxu0 %vm7619_vm4, %v16144_v28  ;;  %14554 = vmatpush3.msra.mxu0 %v11003_v51 }
0x1134   :  { %14575 = vmatprep.subr.mxu0 %v11196_v21 }
0x1136   :  { %14537 = vmatmul.mubr.msk.f32.gmra.mxu0 %vm7619_vm4, %v16146_v37 }
0x1137   :  { %14555 = vmatprep.mubr.msk.f32.mxu0 %vm7619_vm4, %v16132_v33 }
0x113a   :  { %14556 = vmatmul.mubr.msk.f32.vlgmr.msra.gmra.mxu0 %vm7619_vm4, %v16134_v35 }
0x113b   :  { %14558 = vmatprep.mubr.msk.f32.mxu0 %vm7619_vm4, %v16144_v28  ;;  %14576 = vmatpush3.msra.mxu0 %v11196_v21 }
0x113c   :  { %14597 = vmatprep.subr.mxu0 %v11389_v54 }
0x113e   :  { %14559 = vmatmul.mubr.msk.f32.gmra.mxu0 %vm7619_vm4, %v16146_v37 }
0x113f   :  { %14577 = vmatprep.mubr.msk.f32.mxu0 %vm7619_vm4, %v16132_v33 }
0x1142   :  { %14578 = vmatmul.mubr.msk.f32.vlgmr.msra.gmra.mxu0 %vm7619_vm4, %v16134_v35 }
0x1143   :  { %14580 = vmatprep.mubr.msk.f32.mxu0 %vm7619_vm4, %v16144_v28  ;;  %14598 = vmatpush3.msra.mxu0 %v11389_v54 }
0x1144   :  { %14619 = vmatprep.subr.mxu0 %v11582_v56 }
0x1146   :  { %14581 = vmatmul.mubr.msk.f32.gmra.mxu0 %vm7619_vm4, %v16146_v37 }
0x1147   :  { %14599 = vmatprep.mubr.msk.f32.mxu0 %vm7619_vm4, %v16132_v33 }
0x114a   :  { %14600 = vmatmul.mubr.msk.f32.vlgmr.msra.gmra.mxu0 %vm7619_vm4, %v16134_v35 }
0x114b   :  { %14602 = vmatprep.mubr.msk.f32.mxu0 %vm7619_vm4, %v16144_v28  ;;  %14620 = vmatpush3.msra.mxu0 %v11582_v56 }
0x114c   :  { %14641 = vmatprep.subr.mxu0 %v14990_v1 }
0x114e   :  { %14603 = vmatmul.mubr.msk.f32.gmra.mxu0 %vm7619_vm4, %v16146_v37 }
0x114f   :  { %14621 = vmatprep.mubr.msk.f32.mxu0 %vm7619_vm4, %v16132_v33 }
0x1152   :  { %14622 = vmatmul.mubr.msk.f32.vlgmr.msra.gmra.mxu0 %vm7619_vm4, %v16134_v35  ;;  %v11478_v35 = vld [vmem:[#allocation18 + $0xb0] sm:$0xff] }
0x1153   :  { %14624 = vmatprep.mubr.msk.f32.mxu0 %vm7619_vm4, %v16144_v28  ;;  %v11670_v28 = vld [vmem:[#allocation18 + $0xc8] sm:$0xff] }
0x1156   :  { %14625 = vmatmul.mubr.msk.f32.gmra.mxu0 %vm7619_vm4, %v16146_v37  ;;  %v11671_v37 = vld [vmem:[#allocation18 + $0xd0] sm:$0xff] }
0x1157   :  { %14643 = vmatprep.mubr.msk.f32.mxu0 %vm14991_vm0, %v14990_v1  ;;  %vm11850_vm0 = vcmask 1043456  }
0x1158   :  { %14642 = vmatpush3.msk.msra.mxu0 %vm11850_vm0, %v11836_v42 }
0x11ea   :  { %v16208_v60 = vpop.f32.mrf.mxu0  ;;  %v14527_v62 = vpop.f32.mrf.mxu1 }
0x11eb   :  { %v10796_v21 = vadd.f32 %v14527_v62, %v16208_v60  ;;  %v11786_v60 = vpop.permute.xlu1 %11785 }
0x11ec   :  { %v16210_v31 = vpop.f32.mrf.mxu0  ;;  %v10790_v43 = vpop.f32.mrf.mxu1 }
0x11ed   :  { %v10791_v56 = vadd.f32 %v10790_v43, %v16210_v31 }
0x11ee   :  { %v16212_v61 = vpop.f32.mrf.mxu0  ;;  %v14530_v44 = vpop.f32.mrf.mxu1 }
0x11f0   :  { %v16214_v7 = vpop.f32.mrf.mxu0  ;;  %v10800_v45 = vpop.f32.mrf.mxu1 }
0x11f2   :  { %v14535_v2 = vpop.f32.mrf.mxu0 }
0x11f4   :  { %v10877_v8 = vpop.f32.mrf.mxu0 }
0x11f6   :  { %v14538_v10 = vpop.f32.mrf.mxu0 }
0x11f7   :  { %14539 = vmatprep.subr.mxu1 %v14538_v10 }
0x11f8   :  { %v10887_v11 = vpop.f32.mrf.mxu0  ;;  %14540 = vmatpush3.msra.mxu1 %v14538_v10 }
0x11f9   :  { %14541 = vmatprep.subr.mxu1 %v10887_v11 }
0x11fa   :  { %14542 = vmatpush3.msra.mxu1 %v10887_v11  ;;  %v14557_v1 = vpop.f32.mrf.mxu0 }
0x11fb   :  { %14543 = vmatprep.subr.mxu1 %v14535_v2 }
0x11fc   :  { %14544 = vmatpush3.msra.mxu1 %v14535_v2  ;;  %v11070_v9 = vpop.f32.mrf.mxu0 }
0x11fd   :  { %14545 = vmatprep.subr.mxu1 %v10877_v8 }
0x11fe   :  { %14546 = vmatpush3.msra.mxu1 %v10877_v8  ;;  %v14560_v14 = vpop.f32.mrf.mxu0  ;;  %v10806_v8 = vadd.f32 %v14530_v44, %v16212_v61 }
0x11ff   :  { %14548 = vmatmul.mubr.msk.f32.vlgmr.msra.gmra.mxu1 %vm279_vm1, %v10898_v22  ;;  %14561 = vmatprep.subr.mxu1 %v14560_v14 }
0x1200   :  { %v11080_v23 = vpop.f32.mrf.mxu0  ;;  %14562 = vmatpush3.msra.mxu1 %v14560_v14  ;;  %14550 = vmatprep.mubr.msk.f32.mxu1 %vm279_vm1, %v10899_v12  ;;  %v10801_v14 = vadd.f32 %v10800_v45, %v16214_v7 }
0x1201   :  { %14563 = vmatprep.subr.mxu1 %v11080_v23 }
0x1202   :  { %14564 = vmatpush3.msra.mxu1 %v11080_v23  ;;  %v14579_v3 = vpop.f32.mrf.mxu0 }
0x1203   :  { %14551 = vmatmul.mubr.msk.f32.gmra.mxu1 %vm279_vm1, %v10900_v4  ;;  %14565 = vmatprep.subr.mxu1 %v14557_v1 }
0x1204   :  { %14566 = vmatpush3.msra.mxu1 %v14557_v1  ;;  %v11263_v27 = vpop.f32.mrf.mxu0  ;;  %14569 = vmatprep.mubr.msk.f32.mxu1 %vm279_vm1, %v11090_v24 }
0x1205   :  { %14567 = vmatprep.subr.mxu1 %v11070_v9 }
0x1206   :  { %14568 = vmatpush3.msra.mxu1 %v11070_v9  ;;  %v14582_v5 = vpop.f32.mrf.mxu0 }
0x1207   :  { %14570 = vmatmul.mubr.msk.f32.vlgmr.msra.gmra.mxu1 %vm279_vm1, %v11091_v30  ;;  %14583 = vmatprep.subr.mxu1 %v14582_v5 }
0x1208   :  { %v11273_v55 = vpop.f32.mrf.mxu0  ;;  %14584 = vmatpush3.msra.mxu1 %v14582_v5  ;;  %14572 = vmatprep.mubr.msk.f32.mxu1 %vm279_vm1, %v11092_v63 }
0x1209   :  { %14585 = vmatprep.subr.mxu1 %v11273_v55 }
0x120a   :  { %14586 = vmatpush3.msra.mxu1 %v11273_v55  ;;  %v14601_v0 = vpop.f32.mrf.mxu0 }
0x120b   :  { %14573 = vmatmul.mubr.msk.f32.gmra.mxu1 %vm279_vm1, %v11093_v13  ;;  %14587 = vmatprep.subr.mxu1 %v14579_v3  ;;  %v11781_v13 = vpop.permute.xlu0 %11780 }
0x120c   :  { %14588 = vmatpush3.msra.mxu1 %v14579_v3  ;;  %v11456_v20 = vpop.f32.mrf.mxu0  ;;  %14591 = vmatprep.mubr.msk.f32.mxu1 %vm279_vm1, %v11283_v26 }
0x120d   :  { %14589 = vmatprep.subr.mxu1 %v11263_v27 }
0x120e   :  { %14590 = vmatpush3.msra.mxu1 %v11263_v27  ;;  %v14604_v19 = vpop.f32.mrf.mxu0 }
0x120f   :  { %14592 = vmatmul.mubr.msk.f32.vlgmr.msra.gmra.mxu1 %vm279_vm1, %v11284_v6  ;;  %14605 = vmatprep.subr.mxu1 %v14604_v19 }
0x1210   :  { %v11466_v15 = vpop.f32.mrf.mxu0  ;;  %14606 = vmatpush3.msra.mxu1 %v14604_v19  ;;  %14594 = vmatprep.mubr.msk.f32.mxu1 %vm279_vm1, %v11285_v39  ;;  %v11815_v19 = vld [vmem:[%s15132_s25 + $0x8] sm:$0xff] }
0x1211   :  { %14607 = vmatprep.subr.mxu1 %v11466_v15 }
0x1212   :  { %14608 = vmatpush3.msra.mxu1 %v11466_v15  ;;  %v14623_v59 = vpop.f32.mrf.mxu0 }
0x1213   :  { %14595 = vmatmul.mubr.msk.f32.gmra.mxu1 %vm279_vm1, %v11286_v32  ;;  %14609 = vmatprep.subr.mxu1 %v14601_v0 }
0x1214   :  { %14610 = vmatpush3.msra.mxu1 %v14601_v0  ;;  %v11649_v33 = vpop.f32.mrf.mxu0  ;;  %14613 = vmatprep.mubr.msk.f32.mxu1 %vm279_vm1, %v11476_v57  ;;  %v11796_v57 = vpop.permute.xlu1 %11795 }
0x1215   :  { %14611 = vmatprep.subr.mxu1 %v11456_v20 }
0x1216   :  { %14612 = vmatpush3.msra.mxu1 %v11456_v20  ;;  %v14626_v25 = vpop.f32.mrf.mxu0 }
0x1217   :  { %14614 = vmatmul.mubr.msk.f32.vlgmr.msra.gmra.mxu1 %vm279_vm1, %v11477_v34  ;;  %14627 = vmatprep.subr.mxu1 %v14626_v25 }
0x1218   :  { %v11659_v40 = vpop.f32.mrf.mxu0  ;;  %14628 = vmatpush3.msra.mxu1 %v14626_v25  ;;  %14616 = vmatprep.mubr.msk.f32.mxu1 %vm279_vm1, %v11478_v35  ;;  %v11814_v25 = vld [vmem:[%s15132_s25] sm:$0xff] }
0x1219   :  { %14629 = vmatprep.subr.mxu1 %v11659_v40 }
0x121a   :  { %14630 = vmatpush3.msra.mxu1 %v11659_v40 }
0x121b   :  { %14617 = vmatmul.mubr.msk.f32.gmra.mxu1 %vm279_vm1, %v11479_v18  ;;  %14631 = vmatprep.subr.mxu1 %v14623_v59 }
0x121c   :  { %14632 = vmatpush3.msra.mxu1 %v14623_v59  ;;  %14635 = vmatprep.mubr.msk.f32.mxu1 %vm279_vm1, %v11669_v36 }
0x121d   :  { %14633 = vmatprep.subr.mxu1 %v11649_v33 }
0x121e   :  { %14634 = vmatpush3.msra.mxu1 %v11649_v33 }
0x121f   :  { %14636 = vmatmul.mubr.msk.f32.vlgmr.msra.gmra.mxu1 %vm279_vm1, %v11670_v28  ;;  %v11791_v28 = vpop.permute.xlu0 %11790 }
0x1220   :  { %14638 = vmatprep.mubr.msk.f32.mxu1 %vm279_vm1, %v11671_v37 }
0x1223   :  { %14639 = vmatmul.mubr.msk.f32.gmra.mxu1 %vm279_vm1, %v11672_v41 }
0x12bf   :  { %v14549_v47 = vpop.f32.mrf.mxu1 }
0x12c0   :  { %v10999_v58 = vadd.f32 %v14549_v47, %v10796_v21  ;;  %v11817_v47 = vld [vmem:[%s15132_s25 + $0x18] sm:$0xff] }
0x12c1   :  { %v10979_v17 = vpop.f32.mrf.mxu1 }
0x12c2   :  { %v10998_v10 = vadd.f32 %v10979_v17, %v10791_v56 }
0x12c3   :  { %v14552_v46 = vpop.f32.mrf.mxu1 }
0x12c4   :  { %v11001_v9 = vadd.f32 %v14552_v46, %v10806_v8  ;;  %v11816_v46 = vld [vmem:[%s15132_s25 + $0x10] sm:$0xff]  ;;  %v11843_v8 = vlaneseq  ;;  %s14993_s25 = smov [#allocation21]  }
0x12c5   :  { %v10989_v48 = vpop.f32.mrf.mxu1  ;;  %s11932_s19 = sshll.u32 %s14993_s25, 4  ;;  %s11933_s19 = int_to_ptr.vmem [resolvable:$true] %s11932_s19 }
0x12c6   :  { %v11000_v27 = vadd.f32 %v10989_v48, %v10801_v14  ;;  %s14914_s4 = scalar_lea.vmem %s11933_s19, 16  ;;  %s14918_s8 = scalar_lea.vmem %s11933_s19, 32 }
0x12c7   :  { %v14571_v29 = vpop.f32.mrf.mxu1  ;;  %p14915_p13 = scmp.ne.s32.totalorder %s11933_s19, %s14914_s4  ;;  %p14919_p0 = scmp.lt.s32.totalorder %s11933_s19, %s11933_s19 }
0x12c8   :  { %v11192_v11 = vadd.f32 %v14571_v29, %v10999_v58  ;;  %p14920_p1 = scmp.lt.s32.totalorder %s14918_s8, %s14914_s4 }
0x12c9   :  { %v11172_v49 = vpop.f32.mrf.mxu1 }
0x12ca   :  { %v11191_v22 = vadd.f32 %v11172_v49, %v10998_v10  ;;  %v11844_v10 = vshrl.u32 %v11843_v8, 7  ;;  %p14921_p2 = por %p14920_p1, %p14919_p0 }
0x12cb   :  { %v14574_v38 = vpop.f32.mrf.mxu1 }
0x12cc   :  { %v11194_v4 = vadd.f32 %v14574_v38, %v11001_v9  ;;  %p14922_p3 = pnand %p14921_p2, %p14915_p13 }
0x12cd   :  { %v11182_v50 = vpop.f32.mrf.mxu1 }
0x12ce   :  { %v11193_v61 = vadd.f32 %v11182_v50, %v11000_v27 }
0x12cf   :  { %v14593_v16 = vpop.f32.mrf.mxu1 }
0x12d0   :  { %v11385_v12 = vadd.f32 %v14593_v16, %v11192_v11  ;;  %v11845_v11 = vsub.s32 0, %v11844_v10 }
0x12d1   :  { %v11365_v51 = vpop.f32.mrf.mxu1 }
0x12d2   :  { %v11384_v24 = vadd.f32 %v11365_v51, %v11191_v22 }
0x12d3   :  { %v14596_v52 = vpop.f32.mrf.mxu1 }
0x12d4   :  { %v11387_v30 = vadd.f32 %v14596_v52, %v11194_v4 }
0x12d5   :  { %v11375_v53 = vpop.f32.mrf.mxu1 }
0x12d6   :  { %v11386_v6 = vadd.f32 %v11375_v53, %v11193_v61 }
0x12d7   :  { %v14615_v54 = vpop.f32.mrf.mxu1 }
0x12d8   :  { %v11578_v3 = vadd.f32 %v14615_v54, %v11385_v12 }
0x12d9   :  { %v11558_v2 = vpop.f32.mrf.mxu1 }
0x12da   :  { %v11577_v63 = vadd.f32 %v11558_v2, %v11384_v24 }
0x12db   :  { %v14618_v1 = vpop.f32.mrf.mxu1 }
0x12dc   :  { %v11580_v26 = vadd.f32 %v14618_v1, %v11387_v30  ;;  %v11841_v1 = vpop.permute.xlu0 %11840 }
0x12dd   :  { %v11568_v23 = vpop.f32.mrf.mxu1  ;;  %v11846_v9 = vrot.slane %v11841_v1, %v11845_v11 }
0x12de   :  { %v11579_v59 = vadd.f32 %v11568_v23, %v11386_v6 }
0x12df   :  { %v14637_v31 = vpop.f32.mrf.mxu1 }
0x12e0   :  { %v11771_v5 = vadd.f32 %v14637_v31, %v11578_v3 }
0x12e1   :  { %v11751_v55 = vpop.f32.mrf.mxu1 }
0x12e2   :  { %v11799_v0 = vadd.f32 %v11786_v60, %v11771_v5  ;;  %v11770_v20 = vadd.f32 %v11751_v55, %v11577_v63 }
0x12e3   :  { %v14640_v7 = vpop.f32.mrf.mxu1 }
0x12e4   :  { %vm11803_vm1 = vcmp.ge.f32.partialorder %v11799_v0, 0.0  ;;  %v11807_v39 = vmul.f32 0.01, %v11799_v0  ;;  %v11798_v15 = vadd.f32 %v11781_v13, %v11770_v20  ;;  %v11773_v32 = vadd.f32 %v14640_v7, %v11580_v26 }
0x12e5   :  { %v11761_v33 = vpop.f32.mrf.mxu1 }
0x12e6   :  { %v11811_v34 = vsel %vm11803_vm1, %v11799_v0, %v11807_v39  ;;  %vm11802_vm4 = vcmp.ge.f32.partialorder %v11798_v15, 0.0  ;;  %v11806_v35 = vmul.f32 0.01, %v11798_v15  ;;  %v11801_v40 = vadd.f32 %v11796_v57, %v11773_v32 }
0x12e7   :  { %v11819_v18 = vmul.f32 %v11815_v19, %v11811_v34  ;;  %v11772_v36 = vadd.f32 %v11761_v33, %v11579_v59 }
0x12e8   :  { %v11810_v37 = vsel %vm11802_vm4, %v11798_v15, %v11806_v35  ;;  %vm11805_vm12 = vcmp.ge.f32.partialorder %v11801_v40, 0.0  ;;  %v11809_v41 = vmul.f32 0.01, %v11801_v40 }
0x12e9   :  { %v11818_v42 = vmul.f32 %v11814_v25, %v11810_v37  ;;  %v11800_v62 = vadd.f32 %v11791_v28, %v11772_v36  ;;  %v11824_v43 = vsel %vm11822_vm11, %v11819_v18, 0.0 }
0x12ea   :  { %v11813_v45 = vsel %vm11805_vm12, %v11801_v40, %v11809_v41 }
0x12eb   :  { %v11823_v44 = vsel %vm11822_vm11, %v11818_v42, 0.0  ;;  %vm11804_vm13 = vcmp.ge.f32.partialorder %v11800_v62, 0.0  ;;  %v11808_v17 = vmul.f32 0.01, %v11800_v62  ;;  %v11821_v49 = vmul.f32 %v11817_v47, %v11813_v45 }
0x12ec   :  { %v11825_v48 = vadd.f32 %v11824_v43, %v11823_v44 }
0x12ed   :  { %v11812_v29 = vsel %vm11804_vm13, %v11800_v62, %v11808_v17  ;;  %v11828_v51 = vsel %vm11822_vm11, %v11821_v49, 0.0 }
0x12ee   :  { %v11820_v38 = vmul.f32 %v11816_v46, %v11812_v29 }
0x12f0   :  { %v11826_v50 = vsel %vm11822_vm11, %v11820_v38, 0.0 }
0x12f1   :  { %v11827_v16 = vadd.f32 %v11826_v50, %v11825_v48 }
0x12f3   :  { %v11829_v52 = vadd.f32 %v11828_v51, %v11827_v16 }
0x12f5   :  { %v11830_v53 = vrot.slane %v11829_v52, 4 }
0x12f7   :  { %v11831_v21 = vadd.f32 %v11830_v53, %v11829_v52 }
0x12f9   :  { %v11832_v54 = vrot.slane %v11831_v21, 2 }
0x12fb   :  { %v11833_v56 = vadd.f32 %v11832_v54, %v11831_v21 }
0x12fd   :  { %v11834_v58 = vrot.slane %v11833_v56, 1 }
0x12ff   :  { %v11835_v2 = vadd.f32 %v11834_v58, %v11833_v56 }
0x1301   :  { %14644 = vmatmul.mubr.msk.f32.vlgmr.msra.gmra.mxu0 %vm11822_vm11, %v11835_v2 }
0x13c1   :  { %v11920_v22 = vpop.f32.mrf.mxu0 }
0x13c2   :  { %v11921_v12 = vadd.f32 %v11920_v22, %v11846_v9 }
0x13c3   :  { %v14645_v14 = vpop.f32.mrf.mxu0 }
0x13c4   :  { %11925 = vst.msk [vmem:[#allocation21] sm:$0x1] %vm11924_vm14, %v11921_v12 }
0x13c5   :  { %14925 = shalt.err (!%p14922_p3)
}
0x13c6   :  { %11935 = dma.vmem_to_hbm [thread:$0]  %s11933_s19, 16, %s15145_s13, [#allocation5]  }
0x13c7   :  { %14946 = dma.done.wait [#allocation5], 16  }
0x13c8   :  { %14947 = vsyncadd [#allocation5], 4294967280 }
0x13c9   :  { %11939 = vsyncpa [#allocation4], 1 }
0x13ca   :  { %11940 = vsyncpa [#allocation7], 1 }
0x13cb   :  { %11941 = vsyncpa [#allocation10], 1 }
0x13cc   :  { %11942 = vsyncpa [#allocation13], 1 }
0x13cd   :  { %11943 = vsyncpa [#allocation16], 1 }
0x13ce   :  { %11944 = vsyncpa [#allocation19], 1 }
0x13cf   :  { %11945 = vsyncpa [#allocation5], 1 }

</bundles_post_ra>
